<compile_context>
chip_gen: v7x
topology: tpu7x:2x2x1
jax: 0.10.0
libtpu: 0.0.40
codegen_flags: <defaults>
</compile_context>

<pallas_src>
import jax
import jax.numpy as jnp
from jax import lax
from jax.experimental import pallas as pl
from jax.experimental.pallas import tpu as pltpu

EPS = 1e-5


def _resnet_block_kernel(x_ref, w1_ref, b1_ref, w2_ref, b2_ref, o_ref, pad_ref):
    """One batch element per grid step.

    x_ref  : (1, H, W, C)  input tile (NHWC), matmul-operand dtype
    w*_ref : (9*C, C)      im2col conv weights (tap-major rows)
    b*_ref : (1, C)        conv biases, f32
    o_ref  : (1, H, W, C)  output tile
    pad_ref: VMEM scratch (H+2, W+2, C), reflection-pad buffer reused by both convs
    """
    _, H, W, C = x_ref.shape
    cdtype = x_ref.dtype
    inv_hw = jnp.float32(1.0 / (H * W))

    def im2col(t):
        # ---- reflection pad (PyTorch ReflectionPad2d(1)) into reused scratch ----
        pad_ref[1:H + 1, 1:W + 1, :] = t
        pad_ref[0:1, 1:W + 1, :] = t[1:2, :, :]                  # top    <- row 1
        pad_ref[H + 1:H + 2, 1:W + 1, :] = t[H - 2:H - 1, :, :]  # bottom <- row H-2
        pad_ref[:, 0:1, :] = pad_ref[:, 2:3, :]                  # left   <- col 1
        pad_ref[:, W + 1:W + 2, :] = pad_ref[:, W - 1:W, :]      # right  <- col W-2
        p = pad_ref[...]
        # ---- build the (H*W, 9C) slab so all 9 taps accumulate inside the MXU ----
        return jnp.concatenate(
            [p[dh:dh + H, dw:dw + W, :].reshape(H * W, C)
             for dh in range(3) for dw in range(3)],
            axis=1)

    def inorm_stats(y):
        # Single-pass stats (biased variance, affine=False), f32.
        s = jnp.sum(y, axis=0, keepdims=True)
        ss = jnp.sum(y * y, axis=0, keepdims=True)
        mean = s * inv_hw
        var = jnp.maximum(ss * inv_hw - mean * mean, 0.0)
        return mean, lax.rsqrt(var + EPS)

    x = x_ref[0]                                           # (H, W, C), cdtype

    # ---- conv1 (single MXU matmul) -> instance-norm -> ReLU (fused) ----
    y = jnp.dot(im2col(x), w1_ref[...],
                preferred_element_type=jnp.float32)        # (H*W, C) f32 acc
    y = y + b1_ref[...]
    mean1, rstd1 = inorm_stats(y)
    y = jnp.maximum((y - mean1) * rstd1, 0.0)

    # ---- conv2 -> instance-norm -> skip-add + output cast (fused) ----
    z = jnp.dot(im2col(y.astype(cdtype).reshape(H, W, C)), w2_ref[...],
                preferred_element_type=jnp.float32)        # (H*W, C) f32 acc
    z = z + b2_ref[...]
    mean2, rstd2 = inorm_stats(z)
    z = (z - mean2) * rstd2

    o_ref[0] = (x.astype(jnp.float32) + z.reshape(H, W, C)).astype(o_ref.dtype)


def resnet_block(x_nchw, w1, b1, w2, b2):
    """x_nchw: (N, C, H, W); w*: (C, C, 3, 3); b*: (C,). Returns NCHW."""
    N, C, H, W = x_nchw.shape
    assert H >= 2 and W >= 2, "ReflectionPad2d(1) requires H >= 2 and W >= 2"
    x = jnp.transpose(x_nchw, (0, 2, 3, 1))  # NHWC: channels on the lane axis

    # (C_out, C_in, kh, kw) -> (kh, kw, C_in, C_out) -> (9*C_in, C_out),
    # rows ordered tap-major to match the im2col column layout.  Keep the matmul
    # operand dtype equal to the activation dtype (no f32 upcast before the MXU).
    def to_mat(w):
        return jnp.transpose(w, (2, 3, 1, 0)).reshape(9 * C, C).astype(x.dtype)

    w1m, w2m = to_mat(w1), to_mat(w2)
    b1r = b1.reshape(1, C).astype(jnp.float32)   # tiny; keep full precision
    b2r = b2.reshape(1, C).astype(jnp.float32)

    # Explicit VMEM budget (double-buffered I/O tiles + weights + pad scratch +
    # im2col slab + f32 conv/norm temporaries), floored at a conservative default
    # and capped so it stays within every generation's physical VMEM (v7x: 64 MiB).
    eb = jnp.dtype(x.dtype).itemsize
    tile = H * W * C * eb
    weights = 2 * (9 * C * C) * eb + 2 * C * 4
    scratch = (H + 2) * (W + 2) * C * eb + H * W * 9 * C * eb
    f32_tmp = 4 * H * W * C * 4
    need = 2 * 2 * tile + 2 * weights + scratch + f32_tmp
    vmem_limit = int(min(max(2 * need, 16 << 20), 64 << 20))

    # Advisory cost hint for XLA's scheduler around the custom call.
    cost = pl.CostEstimate(
        flops=int(N * 2 * 2 * H * W * (9 * C) * C),
        transcendentals=int(2 * N * C),
        bytes_accessed=int(2 * N * H * W * C * eb + 2 * 9 * C * C * eb + 2 * C * 4),
    )

    out = pl.pallas_call(
        _resnet_block_kernel,
        out_shape=jax.ShapeDtypeStruct((N, H, W, C), x.dtype),
        grid_spec=pltpu.PrefetchScalarGridSpec(
            num_scalar_prefetch=0,
            grid=(N,),
            in_specs=[
                pl.BlockSpec((1, H, W, C), lambda n: (n, 0, 0, 0)),
                pl.BlockSpec((9 * C, C), lambda n: (0, 0)),
                pl.BlockSpec((1, C), lambda n: (0, 0)),
                pl.BlockSpec((9 * C, C), lambda n: (0, 0)),
                pl.BlockSpec((1, C), lambda n: (0, 0)),
            ],
            out_specs=pl.BlockSpec((1, H, W, C), lambda n: (n, 0, 0, 0)),
            scratch_shapes=[
                pltpu.VMEM((H + 2, W + 2, C), x.dtype),   # reflection-pad buffer
            ],
        ),
        compiler_params=pltpu.CompilerParams(
            dimension_semantics=("parallel",),
            vmem_limit_bytes=vmem_limit),
        cost_estimate=cost,
    )(x, w1m, b1r, w2m, b2r)

    return jnp.transpose(out, (0, 3, 1, 2))  # back to NCHW


def _reference(x_nchw, w1, b1, w2, b2):
    """Pure-JAX reference (NCHW, like PyTorch) for a sanity check."""
    def pad_reflect(t):
        return jnp.pad(t, ((0, 0), (0, 0), (1, 1), (1, 1)), mode="reflect")

    def conv(t, w, b):
        y = lax.conv_general_dilated(
            t, w, window_strides=(1, 1), padding="VALID",
            dimension_numbers=("NCHW", "OIHW", "NCHW"))
        return y + b[None, :, None, None]

    def inorm(t):
        mean = jnp.mean(t, axis=(2, 3), keepdims=True)
        var = jnp.mean((t - mean) ** 2, axis=(2, 3), keepdims=True)
        return (t - mean) * lax.rsqrt(var + EPS)

    y = conv(pad_reflect(x_nchw), w1, b1)
    y = jnp.maximum(inorm(y), 0.0)
    y = conv(pad_reflect(y), w2, b2)
    y = inorm(y)
    return x_nchw + y


if __name__ == "__main__":
    key = jax.random.PRNGKey(0)
    N, C, H, W = 2, 4, 16, 16
    k_x, k_w1, k_b1, k_w2, k_b2 = jax.random.split(key, 5)

    x = jax.random.normal(k_x, (N, C, H, W), jnp.float32)
    # Deterministic synthetic parameters (bias=True).
    w1 = jax.random.normal(k_w1, (C, C, 3, 3), jnp.float32) * 0.1
    b1 = jax.random.normal(k_b1, (C,), jnp.float32) * 0.1
    w2 = jax.random.normal(k_w2, (C, C, 3, 3), jnp.float32) * 0.1
    b2 = jax.random.normal(k_b2, (C,), jnp.float32) * 0.1

    out = resnet_block(x, w1, b1, w2, b2)
    out = jax.block_until_ready(out)

    ref = jax.block_until_ready(_reference(x, w1, b1, w2, b2))
    assert out.shape == (N, C, H, W)
    assert jnp.max(jnp.abs(out - ref)) < 1e-3, "mismatch vs JAX reference"

    print("KERNEL_OK")
</pallas_src>

<mosaic_0001>
module attributes {stable_mosaic.version = 11 : i64} {
  func.func @_resnet_block_kernel(%arg0: i32, %arg1: memref<1x16x16x4xf32, #tpu.memory_space<vmem>>, %arg2: memref<36x4xf32, #tpu.memory_space<vmem>>, %arg3: memref<1x4xf32, #tpu.memory_space<vmem>>, %arg4: memref<36x4xf32, #tpu.memory_space<vmem>>, %arg5: memref<1x4xf32, #tpu.memory_space<vmem>>, %arg6: memref<1x16x16x4xf32, #tpu.memory_space<vmem>>, %arg7: memref<18x18x4xf32, #tpu.memory_space<vmem>>) attributes {dimension_semantics = [#tpu.dimension_semantics<parallel>], iteration_bounds = array<i64: 2>, scalar_prefetch = 0 : i64, scratch_operands = 1 : i64, tpu.core_type = #tpu.core_type<tc>, window_params = [{transform_indices = @transform_0, window_bounds = array<i64: 1, 16, 16, 4>}, {pipeline_mode = #tpu.pipeline_mode<synchronous>, transform_indices = @transform_1, window_bounds = array<i64: 36, 4>}, {pipeline_mode = #tpu.pipeline_mode<synchronous>, transform_indices = @transform_2, window_bounds = array<i64: 1, 4>}, {pipeline_mode = #tpu.pipeline_mode<synchronous>, transform_indices = @transform_3, window_bounds = array<i64: 36, 4>}, {pipeline_mode = #tpu.pipeline_mode<synchronous>, transform_indices = @transform_4, window_bounds = array<i64: 1, 4>}, {transform_indices = @transform_5, window_bounds = array<i64: 1, 16, 16, 4>}]} {
    %c0 = arith.constant 0 : index
    %c0_0 = arith.constant 0 : index
    %c0_1 = arith.constant 0 : index
    %c0_2 = arith.constant 0 : index
    %0 = vector.load %arg1[%c0, %c0_0, %c0_1, %c0_2] : memref<1x16x16x4xf32, #tpu.memory_space<vmem>>, vector<1x16x16x4xf32>
    %1 = vector.shape_cast %0 : vector<1x16x16x4xf32> to vector<16x16x4xf32>
    %c1 = arith.constant 1 : index
    %c1_3 = arith.constant 1 : index
    %c0_4 = arith.constant 0 : index
    %2 = vector.load %arg7[%c1, %c1_3, %c0_4] : memref<18x18x4xf32, #tpu.memory_space<vmem>>, vector<16x16x4xf32>
    tpu.vector_store %arg7[%c1, %c1_3, %c0_4], %1 {strides = array<i32>} : memref<18x18x4xf32, #tpu.memory_space<vmem>>, vector<16x16x4xf32>,
    %3 = vector.extract_strided_slice %1 {offsets = [1, 0, 0], sizes = [1, 16, 4], strides = [1, 1, 1]} : vector<16x16x4xf32> to vector<1x16x4xf32>
    %c0_5 = arith.constant 0 : index
    %c1_6 = arith.constant 1 : index
    %c0_7 = arith.constant 0 : index
    %4 = vector.load %arg7[%c0_5, %c1_6, %c0_7] : memref<18x18x4xf32, #tpu.memory_space<vmem>>, vector<1x16x4xf32>
    tpu.vector_store %arg7[%c0_5, %c1_6, %c0_7], %3 {strides = array<i32>} : memref<18x18x4xf32, #tpu.memory_space<vmem>>, vector<1x16x4xf32>,
    %5 = vector.extract_strided_slice %1 {offsets = [14, 0, 0], sizes = [1, 16, 4], strides = [1, 1, 1]} : vector<16x16x4xf32> to vector<1x16x4xf32>
    %c17 = arith.constant 17 : index
    %c1_8 = arith.constant 1 : index
    %c0_9 = arith.constant 0 : index
    %6 = vector.load %arg7[%c17, %c1_8, %c0_9] : memref<18x18x4xf32, #tpu.memory_space<vmem>>, vector<1x16x4xf32>
    tpu.vector_store %arg7[%c17, %c1_8, %c0_9], %5 {strides = array<i32>} : memref<18x18x4xf32, #tpu.memory_space<vmem>>, vector<1x16x4xf32>,
    %c0_10 = arith.constant 0 : index
    %c2 = arith.constant 2 : index
    %c0_11 = arith.constant 0 : index
    %7 = vector.load %arg7[%c0_10, %c2, %c0_11] : memref<18x18x4xf32, #tpu.memory_space<vmem>>, vector<18x1x4xf32>
    %c0_12 = arith.constant 0 : index
    %c0_13 = arith.constant 0 : index
    %c0_14 = arith.constant 0 : index
    %8 = vector.load %arg7[%c0_12, %c0_13, %c0_14] : memref<18x18x4xf32, #tpu.memory_space<vmem>>, vector<18x1x4xf32>
    tpu.vector_store %arg7[%c0_12, %c0_13, %c0_14], %7 {strides = array<i32>} : memref<18x18x4xf32, #tpu.memory_space<vmem>>, vector<18x1x4xf32>,
    %c0_15 = arith.constant 0 : index
    %c15 = arith.constant 15 : index
    %c0_16 = arith.constant 0 : index
    %9 = vector.load %arg7[%c0_15, %c15, %c0_16] : memref<18x18x4xf32, #tpu.memory_space<vmem>>, vector<18x1x4xf32>
    %c0_17 = arith.constant 0 : index
    %c17_18 = arith.constant 17 : index
    %c0_19 = arith.constant 0 : index
    %10 = vector.load %arg7[%c0_17, %c17_18, %c0_19] : memref<18x18x4xf32, #tpu.memory_space<vmem>>, vector<18x1x4xf32>
    tpu.vector_store %arg7[%c0_17, %c17_18, %c0_19], %9 {strides = array<i32>} : memref<18x18x4xf32, #tpu.memory_space<vmem>>, vector<18x1x4xf32>,
    %c0_20 = arith.constant 0 : index
    %c0_21 = arith.constant 0 : index
    %c0_22 = arith.constant 0 : index
    %11 = vector.load %arg7[%c0_20, %c0_21, %c0_22] : memref<18x18x4xf32, #tpu.memory_space<vmem>>, vector<18x18x4xf32>
    %12 = vector.extract_strided_slice %11 {offsets = [0, 0, 0], sizes = [16, 16, 4], strides = [1, 1, 1]} : vector<18x18x4xf32> to vector<16x16x4xf32>
    %13 = vector.shape_cast %12 : vector<16x16x4xf32> to vector<256x4xf32>
    %14 = vector.extract_strided_slice %11 {offsets = [0, 1, 0], sizes = [16, 16, 4], strides = [1, 1, 1]} : vector<18x18x4xf32> to vector<16x16x4xf32>
    %15 = vector.shape_cast %14 : vector<16x16x4xf32> to vector<256x4xf32>
    %16 = vector.extract_strided_slice %11 {offsets = [0, 2, 0], sizes = [16, 16, 4], strides = [1, 1, 1]} : vector<18x18x4xf32> to vector<16x16x4xf32>
    %17 = vector.shape_cast %16 : vector<16x16x4xf32> to vector<256x4xf32>
    %18 = vector.extract_strided_slice %11 {offsets = [1, 0, 0], sizes = [16, 16, 4], strides = [1, 1, 1]} : vector<18x18x4xf32> to vector<16x16x4xf32>
    %19 = vector.shape_cast %18 : vector<16x16x4xf32> to vector<256x4xf32>
    %20 = vector.extract_strided_slice %11 {offsets = [1, 1, 0], sizes = [16, 16, 4], strides = [1, 1, 1]} : vector<18x18x4xf32> to vector<16x16x4xf32>
    %21 = vector.shape_cast %20 : vector<16x16x4xf32> to vector<256x4xf32>
    %22 = vector.extract_strided_slice %11 {offsets = [1, 2, 0], sizes = [16, 16, 4], strides = [1, 1, 1]} : vector<18x18x4xf32> to vector<16x16x4xf32>
    %23 = vector.shape_cast %22 : vector<16x16x4xf32> to vector<256x4xf32>
    %24 = vector.extract_strided_slice %11 {offsets = [2, 0, 0], sizes = [16, 16, 4], strides = [1, 1, 1]} : vector<18x18x4xf32> to vector<16x16x4xf32>
    %25 = vector.shape_cast %24 : vector<16x16x4xf32> to vector<256x4xf32>
    %26 = vector.extract_strided_slice %11 {offsets = [2, 1, 0], sizes = [16, 16, 4], strides = [1, 1, 1]} : vector<18x18x4xf32> to vector<16x16x4xf32>
    %27 = vector.shape_cast %26 : vector<16x16x4xf32> to vector<256x4xf32>
    %28 = vector.extract_strided_slice %11 {offsets = [2, 2, 0], sizes = [16, 16, 4], strides = [1, 1, 1]} : vector<18x18x4xf32> to vector<16x16x4xf32>
    %29 = vector.shape_cast %28 : vector<16x16x4xf32> to vector<256x4xf32>
    %30 = tpu.concatenate %13, %15, %17, %19, %21, %23, %25, %27, %29 in 1 : vector<256x4xf32>, vector<256x4xf32>, vector<256x4xf32>, vector<256x4xf32>, vector<256x4xf32>, vector<256x4xf32>, vector<256x4xf32>, vector<256x4xf32>, vector<256x4xf32> -> vector<256x36xf32>
    %c0_23 = arith.constant 0 : index
    %c0_24 = arith.constant 0 : index
    %31 = vector.load %arg2[%c0_23, %c0_24] : memref<36x4xf32, #tpu.memory_space<vmem>>, vector<36x4xf32>
    %cst = arith.constant dense<0.000000e+00> : vector<256x4xf32>
    %32 = tpu.matmul %30, %31, %cst {dimension_numbers = #tpu.dot_dimension_numbers<[1], [0], [0], [1], [0, 0, 1, 1], [], []>} : vector<256x36xf32>, vector<36x4xf32>, vector<256x4xf32> -> vector<256x4xf32>
    %c0_25 = arith.constant 0 : index
    %c0_26 = arith.constant 0 : index
    %33 = vector.load %arg3[%c0_25, %c0_26] : memref<1x4xf32, #tpu.memory_space<vmem>>, vector<1x4xf32>
    %34 = vector.broadcast %33 : vector<1x4xf32> to vector<256x4xf32>
    %35 = arith.addf %32, %34 : vector<256x4xf32>
    %cst_27 = arith.constant dense<0.000000e+00> : vector<4xf32>
    %36 = vector.multi_reduction <add>, %35, %cst_27 [0] : vector<256x4xf32> to vector<4xf32>
    %37 = vector.shape_cast %36 : vector<4xf32> to vector<1x4xf32>
    %38 = arith.mulf %35, %35 : vector<256x4xf32>
    %cst_28 = arith.constant dense<0.000000e+00> : vector<4xf32>
    %39 = vector.multi_reduction <add>, %38, %cst_28 [0] : vector<256x4xf32> to vector<4xf32>
    %40 = vector.shape_cast %39 : vector<4xf32> to vector<1x4xf32>
    %cst_29 = arith.constant 3.906250e-03 : f32
    %41 = vector.broadcast %cst_29 : f32 to vector<1x4xf32>
    %42 = arith.mulf %37, %41 : vector<1x4xf32>
    %cst_30 = arith.constant 3.906250e-03 : f32
    %43 = vector.broadcast %cst_30 : f32 to vector<1x4xf32>
    %44 = arith.mulf %40, %43 : vector<1x4xf32>
    %45 = arith.mulf %42, %42 : vector<1x4xf32>
    %46 = arith.subf %44, %45 : vector<1x4xf32>
    %cst_31 = arith.constant 0.000000e+00 : f32
    %47 = vector.broadcast %cst_31 : f32 to vector<1x4xf32>
    %48 = arith.maximumf %46, %47 : vector<1x4xf32>
    %cst_32 = arith.constant 9.99999974E-6 : f32
    %49 = vector.broadcast %cst_32 : f32 to vector<1x4xf32>
    %50 = arith.addf %48, %49 : vector<1x4xf32>
    %51 = math.rsqrt %50 : vector<1x4xf32>
    %52 = vector.broadcast %42 : vector<1x4xf32> to vector<256x4xf32>
    %53 = arith.subf %35, %52 : vector<256x4xf32>
    %54 = vector.broadcast %51 : vector<1x4xf32> to vector<256x4xf32>
    %55 = arith.mulf %53, %54 : vector<256x4xf32>
    %cst_33 = arith.constant 0.000000e+00 : f32
    %56 = vector.broadcast %cst_33 : f32 to vector<256x4xf32>
    %57 = arith.maximumf %55, %56 : vector<256x4xf32>
    %58 = vector.shape_cast %57 : vector<256x4xf32> to vector<16x16x4xf32>
    %c1_34 = arith.constant 1 : index
    %c1_35 = arith.constant 1 : index
    %c0_36 = arith.constant 0 : index
    %59 = vector.load %arg7[%c1_34, %c1_35, %c0_36] : memref<18x18x4xf32, #tpu.memory_space<vmem>>, vector<16x16x4xf32>
    tpu.vector_store %arg7[%c1_34, %c1_35, %c0_36], %58 {strides = array<i32>} : memref<18x18x4xf32, #tpu.memory_space<vmem>>, vector<16x16x4xf32>,
    %60 = vector.extract_strided_slice %58 {offsets = [1, 0, 0], sizes = [1, 16, 4], strides = [1, 1, 1]} : vector<16x16x4xf32> to vector<1x16x4xf32>
    %c0_37 = arith.constant 0 : index
    %c1_38 = arith.constant 1 : index
    %c0_39 = arith.constant 0 : index
    %61 = vector.load %arg7[%c0_37, %c1_38, %c0_39] : memref<18x18x4xf32, #tpu.memory_space<vmem>>, vector<1x16x4xf32>
    tpu.vector_store %arg7[%c0_37, %c1_38, %c0_39], %60 {strides = array<i32>} : memref<18x18x4xf32, #tpu.memory_space<vmem>>, vector<1x16x4xf32>,
    %62 = vector.extract_strided_slice %58 {offsets = [14, 0, 0], sizes = [1, 16, 4], strides = [1, 1, 1]} : vector<16x16x4xf32> to vector<1x16x4xf32>
    %c17_40 = arith.constant 17 : index
    %c1_41 = arith.constant 1 : index
    %c0_42 = arith.constant 0 : index
    %63 = vector.load %arg7[%c17_40, %c1_41, %c0_42] : memref<18x18x4xf32, #tpu.memory_space<vmem>>, vector<1x16x4xf32>
    tpu.vector_store %arg7[%c17_40, %c1_41, %c0_42], %62 {strides = array<i32>} : memref<18x18x4xf32, #tpu.memory_space<vmem>>, vector<1x16x4xf32>,
    %c0_43 = arith.constant 0 : index
    %c2_44 = arith.constant 2 : index
    %c0_45 = arith.constant 0 : index
    %64 = vector.load %arg7[%c0_43, %c2_44, %c0_45] : memref<18x18x4xf32, #tpu.memory_space<vmem>>, vector<18x1x4xf32>
    %c0_46 = arith.constant 0 : index
    %c0_47 = arith.constant 0 : index
    %c0_48 = arith.constant 0 : index
    %65 = vector.load %arg7[%c0_46, %c0_47, %c0_48] : memref<18x18x4xf32, #tpu.memory_space<vmem>>, vector<18x1x4xf32>
    tpu.vector_store %arg7[%c0_46, %c0_47, %c0_48], %64 {strides = array<i32>} : memref<18x18x4xf32, #tpu.memory_space<vmem>>, vector<18x1x4xf32>,
    %c0_49 = arith.constant 0 : index
    %c15_50 = arith.constant 15 : index
    %c0_51 = arith.constant 0 : index
    %66 = vector.load %arg7[%c0_49, %c15_50, %c0_51] : memref<18x18x4xf32, #tpu.memory_space<vmem>>, vector<18x1x4xf32>
    %c0_52 = arith.constant 0 : index
    %c17_53 = arith.constant 17 : index
    %c0_54 = arith.constant 0 : index
    %67 = vector.load %arg7[%c0_52, %c17_53, %c0_54] : memref<18x18x4xf32, #tpu.memory_space<vmem>>, vector<18x1x4xf32>
    tpu.vector_store %arg7[%c0_52, %c17_53, %c0_54], %66 {strides = array<i32>} : memref<18x18x4xf32, #tpu.memory_space<vmem>>, vector<18x1x4xf32>,
    %c0_55 = arith.constant 0 : index
    %c0_56 = arith.constant 0 : index
    %c0_57 = arith.constant 0 : index
    %68 = vector.load %arg7[%c0_55, %c0_56, %c0_57] : memref<18x18x4xf32, #tpu.memory_space<vmem>>, vector<18x18x4xf32>
    %69 = vector.extract_strided_slice %68 {offsets = [0, 0, 0], sizes = [16, 16, 4], strides = [1, 1, 1]} : vector<18x18x4xf32> to vector<16x16x4xf32>
    %70 = vector.shape_cast %69 : vector<16x16x4xf32> to vector<256x4xf32>
    %71 = vector.extract_strided_slice %68 {offsets = [0, 1, 0], sizes = [16, 16, 4], strides = [1, 1, 1]} : vector<18x18x4xf32> to vector<16x16x4xf32>
    %72 = vector.shape_cast %71 : vector<16x16x4xf32> to vector<256x4xf32>
    %73 = vector.extract_strided_slice %68 {offsets = [0, 2, 0], sizes = [16, 16, 4], strides = [1, 1, 1]} : vector<18x18x4xf32> to vector<16x16x4xf32>
    %74 = vector.shape_cast %73 : vector<16x16x4xf32> to vector<256x4xf32>
    %75 = vector.extract_strided_slice %68 {offsets = [1, 0, 0], sizes = [16, 16, 4], strides = [1, 1, 1]} : vector<18x18x4xf32> to vector<16x16x4xf32>
    %76 = vector.shape_cast %75 : vector<16x16x4xf32> to vector<256x4xf32>
    %77 = vector.extract_strided_slice %68 {offsets = [1, 1, 0], sizes = [16, 16, 4], strides = [1, 1, 1]} : vector<18x18x4xf32> to vector<16x16x4xf32>
    %78 = vector.shape_cast %77 : vector<16x16x4xf32> to vector<256x4xf32>
    %79 = vector.extract_strided_slice %68 {offsets = [1, 2, 0], sizes = [16, 16, 4], strides = [1, 1, 1]} : vector<18x18x4xf32> to vector<16x16x4xf32>
    %80 = vector.shape_cast %79 : vector<16x16x4xf32> to vector<256x4xf32>
    %81 = vector.extract_strided_slice %68 {offsets = [2, 0, 0], sizes = [16, 16, 4], strides = [1, 1, 1]} : vector<18x18x4xf32> to vector<16x16x4xf32>
    %82 = vector.shape_cast %81 : vector<16x16x4xf32> to vector<256x4xf32>
    %83 = vector.extract_strided_slice %68 {offsets = [2, 1, 0], sizes = [16, 16, 4], strides = [1, 1, 1]} : vector<18x18x4xf32> to vector<16x16x4xf32>
    %84 = vector.shape_cast %83 : vector<16x16x4xf32> to vector<256x4xf32>
    %85 = vector.extract_strided_slice %68 {offsets = [2, 2, 0], sizes = [16, 16, 4], strides = [1, 1, 1]} : vector<18x18x4xf32> to vector<16x16x4xf32>
    %86 = vector.shape_cast %85 : vector<16x16x4xf32> to vector<256x4xf32>
    %87 = tpu.concatenate %70, %72, %74, %76, %78, %80, %82, %84, %86 in 1 : vector<256x4xf32>, vector<256x4xf32>, vector<256x4xf32>, vector<256x4xf32>, vector<256x4xf32>, vector<256x4xf32>, vector<256x4xf32>, vector<256x4xf32>, vector<256x4xf32> -> vector<256x36xf32>
    %c0_58 = arith.constant 0 : index
    %c0_59 = arith.constant 0 : index
    %88 = vector.load %arg4[%c0_58, %c0_59] : memref<36x4xf32, #tpu.memory_space<vmem>>, vector<36x4xf32>
    %cst_60 = arith.constant dense<0.000000e+00> : vector<256x4xf32>
    %89 = tpu.matmul %87, %88, %cst_60 {dimension_numbers = #tpu.dot_dimension_numbers<[1], [0], [0], [1], [0, 0, 1, 1], [], []>} : vector<256x36xf32>, vector<36x4xf32>, vector<256x4xf32> -> vector<256x4xf32>
    %c0_61 = arith.constant 0 : index
    %c0_62 = arith.constant 0 : index
    %90 = vector.load %arg5[%c0_61, %c0_62] : memref<1x4xf32, #tpu.memory_space<vmem>>, vector<1x4xf32>
    %91 = vector.broadcast %90 : vector<1x4xf32> to vector<256x4xf32>
    %92 = arith.addf %89, %91 : vector<256x4xf32>
    %cst_63 = arith.constant dense<0.000000e+00> : vector<4xf32>
    %93 = vector.multi_reduction <add>, %92, %cst_63 [0] : vector<256x4xf32> to vector<4xf32>
    %94 = vector.shape_cast %93 : vector<4xf32> to vector<1x4xf32>
    %95 = arith.mulf %92, %92 : vector<256x4xf32>
    %cst_64 = arith.constant dense<0.000000e+00> : vector<4xf32>
    %96 = vector.multi_reduction <add>, %95, %cst_64 [0] : vector<256x4xf32> to vector<4xf32>
    %97 = vector.shape_cast %96 : vector<4xf32> to vector<1x4xf32>
    %cst_65 = arith.constant 3.906250e-03 : f32
    %98 = vector.broadcast %cst_65 : f32 to vector<1x4xf32>
    %99 = arith.mulf %94, %98 : vector<1x4xf32>
    %cst_66 = arith.constant 3.906250e-03 : f32
    %100 = vector.broadcast %cst_66 : f32 to vector<1x4xf32>
    %101 = arith.mulf %97, %100 : vector<1x4xf32>
    %102 = arith.mulf %99, %99 : vector<1x4xf32>
    %103 = arith.subf %101, %102 : vector<1x4xf32>
    %cst_67 = arith.constant 0.000000e+00 : f32
    %104 = vector.broadcast %cst_67 : f32 to vector<1x4xf32>
    %105 = arith.maximumf %103, %104 : vector<1x4xf32>
    %cst_68 = arith.constant 9.99999974E-6 : f32
    %106 = vector.broadcast %cst_68 : f32 to vector<1x4xf32>
    %107 = arith.addf %105, %106 : vector<1x4xf32>
    %108 = math.rsqrt %107 : vector<1x4xf32>
    %109 = vector.broadcast %99 : vector<1x4xf32> to vector<256x4xf32>
    %110 = arith.subf %92, %109 : vector<256x4xf32>
    %111 = vector.broadcast %108 : vector<1x4xf32> to vector<256x4xf32>
    %112 = arith.mulf %110, %111 : vector<256x4xf32>
    %113 = vector.shape_cast %112 : vector<256x4xf32> to vector<16x16x4xf32>
    %114 = arith.addf %1, %113 : vector<16x16x4xf32>
    %c0_69 = arith.constant 0 : index
    %c0_70 = arith.constant 0 : index
    %c0_71 = arith.constant 0 : index
    %c0_72 = arith.constant 0 : index
    %115 = vector.load %arg6[%c0_69, %c0_70, %c0_71, %c0_72] : memref<1x16x16x4xf32, #tpu.memory_space<vmem>>, vector<1x16x16x4xf32>
    %116 = vector.shape_cast %115 : vector<1x16x16x4xf32> to vector<16x16x4xf32>
    %117 = vector.shape_cast %114 : vector<16x16x4xf32> to vector<1x16x16x4xf32>
    tpu.vector_store %arg6[%c0_69, %c0_70, %c0_71, %c0_72], %117 {strides = array<i32>} : memref<1x16x16x4xf32, #tpu.memory_space<vmem>>, vector<1x16x16x4xf32>,
    return
  }
  func.func @transform_0(%arg0: i32) -> (i32, i32, i32, i32) {
    %c0_i32 = arith.constant 0 : i32
    %c0_i32_0 = arith.constant 0 : i32
    %c0_i32_1 = arith.constant 0 : i32
    %c0_i32_2 = arith.constant 0 : i32
    return %arg0, %c0_i32, %c0_i32_0, %c0_i32_1 : i32, i32, i32, i32
  }
  func.func @transform_1(%arg0: i32) -> (i32, i32) {
    %c0_i32 = arith.constant 0 : i32
    %c0_i32_0 = arith.constant 0 : i32
    %c0_i32_1 = arith.constant 0 : i32
    return %c0_i32, %c0_i32_0 : i32, i32
  }
  func.func @transform_2(%arg0: i32) -> (i32, i32) {
    %c0_i32 = arith.constant 0 : i32
    %c0_i32_0 = arith.constant 0 : i32
    %c0_i32_1 = arith.constant 0 : i32
    return %c0_i32, %c0_i32_0 : i32, i32
  }
  func.func @transform_3(%arg0: i32) -> (i32, i32) {
    %c0_i32 = arith.constant 0 : i32
    %c0_i32_0 = arith.constant 0 : i32
    %c0_i32_1 = arith.constant 0 : i32
    return %c0_i32, %c0_i32_0 : i32, i32
  }
  func.func @transform_4(%arg0: i32) -> (i32, i32) {
    %c0_i32 = arith.constant 0 : i32
    %c0_i32_0 = arith.constant 0 : i32
    %c0_i32_1 = arith.constant 0 : i32
    return %c0_i32, %c0_i32_0 : i32, i32
  }
  func.func @transform_5(%arg0: i32) -> (i32, i32, i32, i32) {
    %c0_i32 = arith.constant 0 : i32
    %c0_i32_0 = arith.constant 0 : i32
    %c0_i32_1 = arith.constant 0 : i32
    %c0_i32_2 = arith.constant 0 : i32
    return %arg0, %c0_i32, %c0_i32_0, %c0_i32_1 : i32, i32, i32, i32
  }
}

</mosaic_0001>

<bundles_post_ra>
// kernel: tpu_custom_call.1
= control target key start
LH: loop header
LB: loop body
LE: loop exit
PB: predicated region body
PF: predicated region fallthrough
CT: control target
= control target key end

     0   :  { %s4832_s18 = smov 0   ;;  %s9051_s0 = inlined_call_operand.vmem [shape: f32[2,16,16,4], index: 0, kind: input, shape index: {}]   ;;  %s9052_s1 = inlined_call_operand.vmem [shape: f32[36,4], index: 1, kind: input, shape index: {}]   ;;  %s9053_s2 = inlined_call_operand.vmem [shape: f32[1,4], index: 2, kind: input, shape index: {}]   ;;  %s9054_s3 = inlined_call_operand.vmem [shape: f32[36,4], index: 3, kind: input, shape index: {}]   ;;  %s9055_s4 = inlined_call_operand.vmem [shape: f32[1,4], index: 4, kind: input, shape index: {}]   ;;  %s9056_s5 = inlined_call_operand.vmem [shape: f32[2,16,16,4], index: 5, kind: output, shape index: {}]  }
   0x1 LB: > { %s4417_s19 = sadd.s32 4294967295, %s4792_s18   ;;  %p4421_p0 = scmp.ge.s32.totalorder %s4792_s18, 1  ;;  %s4792_s18 = sphi %s4832_s18, %s15_s18  }
   0x2   : > { %p187_p1 = scmp.lt.s32.totalorder %s4792_s18, 3 }
   0x4   : > { %p188_p2 = pnand %p4421_p0, %p187_p1 }
   0x6   : > { %191 = sbr.rel (%p188_p2) target bundleno = 1874 (0x752), region = 40 }
   0xd   : > { %p215_p3 = scmp.lt.s32.totalorder %s4417_s19, 1  ;;  %vm258_vm0 = vcmask 31744   ;;  %vm314_vm1 = vcmask 24576   ;;  %vm471_vm2 = vcmask 1046528   ;;  %s4794_s24 = smov 4   ;;  %vm552_vm3 = vcmask 1045504  }
   0xe   : > { %s4795_s25 = smov 8   ;;  %s4796_s26 = smov 12   ;;  %vm1799_vm4 = vcmask 1043456   ;;  %vm1459_vm5 = vcmask 64512   ;;  %vm1492_vm6 = vcmask 97280   ;;  %vm1525_vm7 = vcmask 130048  }
   0xf   : > { %s9701_s19 = smov (!%p215_p3, %s4417_s19), 1  ;;  %s4797_s27 = smov 16   ;;  %vm1558_vm8 = vcmask 162816   ;;  %vm1591_vm9 = vcmask 195584   ;;  %vm1624_vm10 = vcmask 228352   ;;  %vm1657_vm11 = vcmask 261120  }
  0x10   : > { %s4496_s20 = sshll.u32 %s9701_s19, 8  ;;  %s4798_s11 = smov 20   ;;  %vm1702_vm12 = vcmask 293888  }
  0x11   : > { %s4848_s23 = scalar_lea.vmem %s9051_s0, %s4496_s20  ;;  %s4799_s14 = smov 24  }
  0x12   : > { %v4851_v0 = vld [vmem:[%s4848_s23 + $0x10] sm:$0xff]  ;;  %v4854_v1 = vld [vmem:[%s4848_s23 + $0x18] sm:$0xff]  ;;  %v4857_v2 = vld [vmem:[%s4848_s23] sm:$0xff]  ;;  %s4800_s15 = smov 28   ;;  %s4801_s16 = smov 32  }
  0x13   : > { %9248 = vst [vmem:[#allocation3_spill] sm:$0xff] %v4851_v0  ;;  %9249 = vst [vmem:[#allocation4_spill] sm:$0xff] %v4854_v1  ;;  %v4868_v3 = vld [vmem:[%s4848_s23 + $0x8] sm:$0xff]  ;;  %v4873_v4 = vld [vmem:[%s4848_s23 + $0x20] sm:$0xff] }
  0x14   : > { %9250 = vst [vmem:[#allocation5_spill] sm:$0xff] %v4857_v2  ;;  %262 = vst.msk [vmem:[#allocation2 + $0x39] sm:$0xff] %vm258_vm0, %v4854_v1  ;;  %v4876_v5 = vld [vmem:[%s4848_s23 + $0x28] sm:$0xff]  ;;  %v4885_v6 = vld [vmem:[%s4848_s23 + $0x30] sm:$0xff] }
  0x15   : > { %291 = vst.msk [vmem:[#allocation2 + $0x1] sm:$0xff] %vm258_vm0, %v4851_v0  ;;  %292 = vst.msk [vmem:[#allocation2 + $0x9] sm:$0xff] %vm258_vm0, %v4854_v1  ;;  %v4888_v7 = vld [vmem:[%s4848_s23 + $0x38] sm:$0xff]  ;;  %v4891_v8 = vld [vmem:[%s4848_s23 + $0x40] sm:$0xff] }
  0x16   : > { %261 = vst.msk [vmem:[#allocation2 + $0x31] sm:$0xff] %vm258_vm0, %v4851_v0  ;;  %9251 = vst [vmem:[#allocation6_spill] sm:$0xff] %v4868_v3  ;;  %v4898_v9 = vld [vmem:[%s4848_s23 + $0x48] sm:$0xff]  ;;  %v4903_v10 = vld [vmem:[%s4848_s23 + $0x50] sm:$0xff] }
  0x17   : > { %259 = vst.msk [vmem:[#allocation2 + $0x19] sm:$0xff] %vm258_vm0, %v4857_v2  ;;  %9252 = vst [vmem:[#allocation7_spill] sm:$0xff] %v4873_v4  ;;  %v4906_v11 = vld [vmem:[%s4848_s23 + $0x58] sm:$0xff]  ;;  %v4915_v12 = vld [vmem:[%s4848_s23 + $0x60] sm:$0xff] }
  0x18   : > { %9253 = vst [vmem:[#allocation8_spill] sm:$0xff] %v4876_v5  ;;  %260 = vst.msk [vmem:[#allocation2 + $0x21] sm:$0xff] %vm258_vm0, %v4868_v3  ;;  %v4918_v13 = vld [vmem:[%s4848_s23 + $0x68] sm:$0xff]  ;;  %v4921_v14 = vld [vmem:[%s4848_s23 + $0x70] sm:$0xff] }
  0x19   : > { %263 = vst.msk [vmem:[#allocation2 + $0x49] sm:$0xff] %vm258_vm0, %v4873_v4  ;;  %264 = vst.msk [vmem:[#allocation2 + $0x51] sm:$0xff] %vm258_vm0, %v4876_v5  ;;  %v4928_v15 = vld [vmem:[%s4848_s23 + $0x78] sm:$0xff]  ;;  %v4933_v16 = vld [vmem:[%s4848_s23 + $0x80] sm:$0xff] }
  0x1a   : > { %9254 = vst [vmem:[#allocation9_spill] sm:$0xff] %v4885_v6  ;;  %9255 = vst [vmem:[#allocation10_spill] sm:$0xff] %v4888_v7  ;;  %v4936_v17 = vld [vmem:[%s4848_s23 + $0x88] sm:$0xff]  ;;  %v4945_v18 = vld [vmem:[%s4848_s23 + $0x90] sm:$0xff] }
  0x1b   : > { %9256 = vst [vmem:[#allocation11_spill] sm:$0xff] %v4891_v8  ;;  %265 = vst.msk [vmem:[#allocation2 + $0x61] sm:$0xff] %vm258_vm0, %v4885_v6  ;;  %v4948_v19 = vld [vmem:[%s4848_s23 + $0x98] sm:$0xff]  ;;  %v4951_v20 = vld [vmem:[%s4848_s23 + $0xa0] sm:$0xff] }
  0x1c   : > { %266 = vst.msk [vmem:[#allocation2 + $0x69] sm:$0xff] %vm258_vm0, %v4888_v7  ;;  %9257 = vst [vmem:[#allocation12_spill] sm:$0xff] %v4898_v9  ;;  %v4958_v21 = vld [vmem:[%s4848_s23 + $0xa8] sm:$0xff]  ;;  %v4963_v22 = vld [vmem:[%s4848_s23 + $0xb0] sm:$0xff] }
  0x1d   : > { %267 = vst.msk [vmem:[#allocation2 + $0x79] sm:$0xff] %vm258_vm0, %v4891_v8  ;;  %9258 = vst [vmem:[#allocation13_spill] sm:$0xff] %v4903_v10  ;;  %v4966_v23 = vld [vmem:[%s4848_s23 + $0xb8] sm:$0xff]  ;;  %v296_v24 = vld [vmem:[#allocation2 + $0x2] sm:$0x1] }
  0x1e   : > { %9259 = vst [vmem:[#allocation14_spill] sm:$0xff] %v4906_v11  ;;  %268 = vst.msk [vmem:[#allocation2 + $0x81] sm:$0xff] %vm258_vm0, %v4898_v9  ;;  %v297_v25 = vld [vmem:[#allocation2 + $0x1a] sm:$0x1]  ;;  %v333_v26 = vld [vmem:[#allocation2 + $0xf] sm:$0x1] }
  0x1f   : > { %269 = vst.msk [vmem:[#allocation2 + $0x91] sm:$0xff] %vm258_vm0, %v4903_v10  ;;  %270 = vst.msk [vmem:[#allocation2 + $0x99] sm:$0xff] %vm258_vm0, %v4906_v11  ;;  %v334_v27 = vld [vmem:[#allocation2 + $0x27] sm:$0x1]  ;;  %v298_v28 = vld [vmem:[#allocation2 + $0x32] sm:$0x1] }
  0x20   : > { %9260 = vst [vmem:[#allocation15_spill] sm:$0xff] %v4915_v12  ;;  %9261 = vst [vmem:[#allocation16_spill] sm:$0xff] %v4918_v13  ;;  %v335_v29 = vld [vmem:[#allocation2 + $0x3f] sm:$0x1]  ;;  %v4978_v30 = vld [vmem:[#allocation2 + $0x8] sm:$0xff] }
  0x21   : > { %9262 = vst [vmem:[#allocation17_spill] sm:$0xff] %v4921_v14  ;;  %271 = vst.msk [vmem:[#allocation2 + $0xa9] sm:$0xff] %vm258_vm0, %v4915_v12  ;;  %v299_v31 = vld [vmem:[#allocation2 + $0x4a] sm:$0x1]  ;;  %v336_v32 = vld [vmem:[#allocation2 + $0x57] sm:$0x1] }
  0x22   : > { %272 = vst.msk [vmem:[#allocation2 + $0xb1] sm:$0xff] %vm258_vm0, %v4918_v13  ;;  %9263 = vst [vmem:[#allocation18_spill] sm:$0xff] %v4928_v15  ;;  %v4982_v33 = vld [vmem:[#allocation2 + $0x20] sm:$0xff]  ;;  %v473_v38 = vrot.slane %v4978_v30, 1  ;;  %v4992_v42 = vld [vmem:[#allocation2 + $0x38] sm:$0xff] }
  0x23   : > { %273 = vst.msk [vmem:[#allocation2 + $0xc1] sm:$0xff] %vm258_vm0, %v4921_v14  ;;  %9264 = vst [vmem:[#allocation19_spill] sm:$0xff] %v4933_v16  ;;  %v300_v34 = vld [vmem:[#allocation2 + $0x62] sm:$0x1]  ;;  %v337_v35 = vld [vmem:[#allocation2 + $0x6f] sm:$0x1] }
  0x24   : > { %9265 = vst [vmem:[#allocation20_spill] sm:$0xff] %v4936_v17  ;;  %274 = vst.msk [vmem:[#allocation2 + $0xc9] sm:$0xff] %vm258_vm0, %v4928_v15  ;;  %v301_v36 = vld [vmem:[#allocation2 + $0x7a] sm:$0x1]  ;;  %v478_v41 = vrot.slane %v4982_v33, 1  ;;  %v483_v58 = vrot.slane %v4992_v42, 1 }
  0x25   : > { %275 = vst.msk [vmem:[#allocation2 + $0xd9] sm:$0xff] %vm258_vm0, %v4933_v16  ;;  %276 = vst.msk [vmem:[#allocation2 + $0xe1] sm:$0xff] %vm258_vm0, %v4936_v17  ;;  %v338_v37 = vld [vmem:[#allocation2 + $0x87] sm:$0x1] }
  0x26   : > { %9266 = vst [vmem:[#allocation21_spill] sm:$0xff] %v4945_v18  ;;  %9267 = vst [vmem:[#allocation22_spill] sm:$0xff] %v4948_v19  ;;  %v302_v39 = vld [vmem:[#allocation2 + $0x92] sm:$0x1]  ;;  %v339_v40 = vld [vmem:[#allocation2 + $0x9f] sm:$0x1] }
  0x27   : > { %9268 = vst [vmem:[#allocation23_spill] sm:$0xff] %v4951_v20  ;;  %277 = vst.msk [vmem:[#allocation2 + $0xf1] sm:$0xff] %vm258_vm0, %v4945_v18 }
  0x28   : > { %278 = vst.msk [vmem:[#allocation2 + $0xf9] sm:$0xff] %vm258_vm0, %v4948_v19  ;;  %9269 = vst [vmem:[#allocation24_spill] sm:$0xff] %v4958_v21  ;;  %v303_v43 = vld [vmem:[#allocation2 + $0xaa] sm:$0x1] }
  0x29   : > { %279 = vst.msk [vmem:[#allocation2 + $0x109] sm:$0xff] %vm258_vm0, %v4951_v20  ;;  %9270 = vst [vmem:[#allocation25_spill] sm:$0xff] %v4963_v22  ;;  %v340_v44 = vld [vmem:[#allocation2 + $0xb7] sm:$0x1] }
  0x2a   : > { %9271 = vst [vmem:[#allocation26_spill] sm:$0xff] %v4966_v23  ;;  %280 = vst.msk [vmem:[#allocation2 + $0x111] sm:$0xff] %vm258_vm0, %v4958_v21  ;;  %v304_v47 = vld [vmem:[#allocation2 + $0xc2] sm:$0x1] }
  0x2b   : > { %281 = vst.msk [vmem:[#allocation2 + $0x121] sm:$0xff] %vm258_vm0, %v4963_v22  ;;  %282 = vst.msk [vmem:[#allocation2 + $0x129] sm:$0xff] %vm258_vm0, %v4966_v23  ;;  %v5174_v19 = vld [vmem:[#allocation2 + $0xc8] sm:$0xff] }
  0x2c   : > { %315 = vst.msk [vmem:[#allocation2] sm:$0x1] %vm314_vm1, %v296_v24  ;;  %316 = vst.msk [vmem:[#allocation2 + $0x18] sm:$0x1] %vm314_vm1, %v297_v25  ;;  %v5031_v24 = vld [vmem:[#allocation2 + $0x50] sm:$0xff]  ;;  %v5191_v16 = vld [vmem:[#allocation2 + $0xe0] sm:$0xff] }
  0x2d   : > { %351 = vst.msk [vmem:[#allocation2 + $0x11] sm:$0x1] %vm314_vm1, %v333_v26  ;;  %352 = vst.msk [vmem:[#allocation2 + $0x29] sm:$0x1] %vm314_vm1, %v334_v27  ;;  %v5036_v26 = vld [vmem:[%s4848_s23 + $0xc0] sm:$0xff] }
  0x2e   : > { %317 = vst.msk [vmem:[#allocation2 + $0x30] sm:$0x1] %vm314_vm1, %v298_v28  ;;  %353 = vst.msk [vmem:[#allocation2 + $0x41] sm:$0x1] %vm314_vm1, %v335_v29  ;;  %v488_v28 = vrot.slane %v5031_v24, 1  ;;  %v5043_v29 = vld [vmem:[#allocation2 + $0x68] sm:$0xff] }
  0x2f   : > { %318 = vst.msk [vmem:[#allocation2 + $0x48] sm:$0x1] %vm314_vm1, %v299_v31  ;;  %354 = vst.msk [vmem:[#allocation2 + $0x59] sm:$0x1] %vm314_vm1, %v336_v32  ;;  %v341_v31 = vld [vmem:[#allocation2 + $0xcf] sm:$0x1] }
  0x30   : > { %319 = vst.msk [vmem:[#allocation2 + $0x60] sm:$0x1] %vm314_vm1, %v300_v34  ;;  %355 = vst.msk [vmem:[#allocation2 + $0x71] sm:$0x1] %vm314_vm1, %v337_v35  ;;  %v5046_v32 = vld [vmem:[%s4848_s23 + $0xc8] sm:$0xff]  ;;  %v5210_v11 = vld [vmem:[#allocation2 + $0xf8] sm:$0xff] }
  0x31   : > { %320 = vst.msk [vmem:[#allocation2 + $0x78] sm:$0x1] %vm314_vm1, %v301_v36  ;;  %356 = vst.msk [vmem:[#allocation2 + $0x89] sm:$0x1] %vm314_vm1, %v338_v37  ;;  %v5229_v6 = vld [vmem:[#allocation2 + $0x110] sm:$0xff] }
  0x32   : > { %321 = vst.msk [vmem:[#allocation2 + $0x90] sm:$0x1] %vm314_vm1, %v302_v39  ;;  %357 = vst.msk [vmem:[#allocation2 + $0xa1] sm:$0x1] %vm314_vm1, %v339_v40  ;;  %v342_v39 = vld [vmem:[#allocation2 + $0xe7] sm:$0x1] }
  0x33   : > { %v4996_v45 = vld [vmem:[#allocation2] sm:$0xff]  ;;  %v4998_v46 = vld [vmem:[#allocation2 + $0x18] sm:$0xff]  ;;  %322 = vst.msk [vmem:[#allocation2 + $0xa8] sm:$0x1] %vm314_vm1, %v303_v43  ;;  %358 = vst.msk [vmem:[#allocation2 + $0xb9] sm:$0x1] %vm314_vm1, %v340_v44 }
  0x34   : > { %v472_v48 = vrot.slane %v4996_v45, 1  ;;  %v477_v49 = vrot.slane %v4998_v46, 1  ;;  %v5004_v50 = vld [vmem:[#allocation2 + $0x10] sm:$0x3]  ;;  %v5006_v51 = vld [vmem:[#allocation2 + $0x28] sm:$0x3] }
  0x35   : > { %323 = vst.msk [vmem:[#allocation2 + $0xc0] sm:$0x1] %vm314_vm1, %v304_v47  ;;  %v475_v52 = vrot.slane %v5004_v50, 1  ;;  %v480_v53 = vrot.slane %v5006_v51, 1  ;;  %v5011_v54 = vld [vmem:[#allocation2 + $0x30] sm:$0xff]  ;;  %9272 = vst [vmem:[#allocation27_spill] sm:$0xff] %v5036_v26 }
  0x36   : > { %v5013_v55 = vld [vmem:[#allocation2 + $0x40] sm:$0x3]  ;;  %v474_v56 = vsel %vm471_vm2, %v472_v48, %v473_v38  ;;  %v5017_v57 = vsel %vm471_vm2, %v477_v49, %v478_v41  ;;  %v482_v61 = vrot.slane %v5011_v54, 1  ;;  %v5029_v63 = vld [vmem:[#allocation2 + $0x48] sm:$0xff]  ;;  %v5033_v25 = vld [vmem:[#allocation2 + $0x58] sm:$0x3] }
  0x37   : > { %659 = vrot.lane.b32.xlu0 %v474_v56, %s4794_s24  ;;  %663 = vrot.lane.b32.xlu1 %v5017_v57, %s4794_s24  ;;  %v476_v59 = vsel %vm471_vm2, %v473_v38, %v475_v52  ;;  %v5025_v60 = vsel %vm471_vm2, %v478_v41, %v480_v53  ;;  %v485_v62 = vrot.slane %v5013_v55, 1  ;;  %v487_v27 = vrot.slane %v5029_v63, 1  ;;  %9273 = vst [vmem:[#allocation28_spill] sm:$0xff] %v5046_v32  ;;  %v5057_v37 = vld [vmem:[#allocation2 + $0x60] sm:$0xff]  ;;  %v305_v38 = vld [vmem:[#allocation2 + $0xda] sm:$0x1] }
  0x38   : > { %283 = vst.msk [vmem:[#allocation2 + $0x139] sm:$0xff] %vm258_vm0, %v5036_v26  ;;  %v5051_v34 = vsel %vm471_vm2, %v482_v61, %v483_v58  ;;  %v490_v36 = vrot.slane %v5033_v25, 1  ;;  %284 = vst.msk [vmem:[#allocation2 + $0x141] sm:$0xff] %vm258_vm0, %v5046_v32  ;;  %v5062_v40 = vld [vmem:[#allocation2 + $0x70] sm:$0x3]  ;;  %v5066_v44 = vld [vmem:[#allocation2 + $0x80] sm:$0xff] }
  0x39   : > { %v5054_v35 = vsel %vm471_vm2, %v483_v58, %v485_v62  ;;  %359 = vst.msk [vmem:[#allocation2 + $0xd1] sm:$0x1] %vm314_vm1, %v341_v31  ;;  %324 = vst.msk [vmem:[#allocation2 + $0xd8] sm:$0x1] %vm314_vm1, %v305_v38  ;;  %v306_v41 = vld [vmem:[#allocation2 + $0xf2] sm:$0x1]  ;;  %v5081_v58 = vsel %vm471_vm2, %v487_v27, %v488_v28 }
  0x3a   : > { %360 = vst.msk [vmem:[#allocation2 + $0xe9] sm:$0x1] %vm314_vm1, %v342_v39  ;;  %v343_v43 = vld [vmem:[#allocation2 + $0xff] sm:$0x1]  ;;  %325 = vst.msk [vmem:[#allocation2 + $0xf0] sm:$0x1] %vm314_vm1, %v306_v41 }
  0x3b   : > { %661 = vrot.lane.b32.xlu0 %v476_v59, %s4794_s24  ;;  %665 = vrot.lane.b32.xlu1 %v5025_v60, %s4794_s24  ;;  %361 = vst.msk [vmem:[#allocation2 + $0x101] sm:$0x1] %vm314_vm1, %v343_v43  ;;  %v307_v47 = vld [vmem:[#allocation2 + $0x10a] sm:$0x1]  ;;  %v344_v48 = vld [vmem:[#allocation2 + $0x117] sm:$0x1]  ;;  %v5084_v59 = vsel %vm471_vm2, %v488_v28, %v490_v36 }
  0x3c   : > { %v493_v49 = vrot.slane %v5043_v29, 1  ;;  %326 = vst.msk [vmem:[#allocation2 + $0x108] sm:$0x1] %vm314_vm1, %v307_v47  ;;  %362 = vst.msk [vmem:[#allocation2 + $0x119] sm:$0x1] %vm314_vm1, %v344_v48  ;;  %v5078_v56 = vld [vmem:[%s4848_s23 + $0xd0] sm:$0xff] }
  0x3d   : > { %v308_v52 = vld [vmem:[#allocation2 + $0x122] sm:$0x1]  ;;  %v345_v53 = vld [vmem:[#allocation2 + $0x12f] sm:$0x1]  ;;  %9274 = vst [vmem:[#allocation29_spill] sm:$0xff] %v5078_v56  ;;  %9275 = vst [vmem:[#allocation30_spill] sm:$0xff] %v5084_v59 }
  0x3e   : > { %v492_v61 = vrot.slane %v5057_v37, 1  ;;  %v495_v62 = vrot.slane %v5062_v40, 1  ;;  %327 = vst.msk [vmem:[#allocation2 + $0x120] sm:$0x1] %vm314_vm1, %v308_v52  ;;  %363 = vst.msk [vmem:[#allocation2 + $0x131] sm:$0x1] %vm314_vm1, %v345_v53 }
  0x3f   : > { %667 = vrot.lane.b32.xlu0 %v5051_v34, %s4794_s24  ;;  %669 = vrot.lane.b32.xlu1 %v5054_v35, %s4794_s24  ;;  %v5091_v31 = vld [vmem:[%s4848_s23 + $0xd8] sm:$0xff]  ;;  %285 = vst.msk [vmem:[#allocation2 + $0x151] sm:$0xff] %vm258_vm0, %v5078_v56  ;;  %v5096_v38 = vld [vmem:[%s4848_s23 + $0xe0] sm:$0xff]  ;;  %v5103_v28 = vld [vmem:[#allocation2 + $0x88] sm:$0x3]  ;;  %v498_v41 = vrot.slane %v5066_v44, 1 }
  0x40   : > { %9276 = vst [vmem:[#allocation31_spill] sm:$0xff] %v5091_v31  ;;  %9277 = vst [vmem:[#allocation32_spill] sm:$0xff] %v5096_v38  ;;  %v5099_v27 = vld [vmem:[%s4848_s23 + $0xe8] sm:$0xff]  ;;  %v5101_v39 = vld [vmem:[#allocation2 + $0x78] sm:$0xff]  ;;  %v5122_v47 = vsel %vm471_vm2, %v492_v61, %v493_v49  ;;  %v5125_v48 = vsel %vm471_vm2, %v493_v49, %v495_v62  ;;  %v500_v53 = vrot.slane %v5103_v28, 1 }
  0x41   : > { %9278 = vst [vmem:[#allocation33_spill] sm:$0xff] %v5099_v27  ;;  %286 = vst.msk [vmem:[#allocation2 + $0x159] sm:$0xff] %vm258_vm0, %v5091_v31  ;;  %v309_v36 = vld [vmem:[#allocation2 + $0x13a] sm:$0x1]  ;;  %v346_v43 = vld [vmem:[#allocation2 + $0x147] sm:$0x1] }
  0x42   : > { %287 = vst.msk [vmem:[#allocation2 + $0x169] sm:$0xff] %vm258_vm0, %v5096_v38  ;;  %288 = vst.msk [vmem:[#allocation2 + $0x171] sm:$0xff] %vm258_vm0, %v5099_v27  ;;  %v497_v52 = vrot.slane %v5101_v39, 1  ;;  %v5134_v31 = vld [vmem:[#allocation2 + $0xa0] sm:$0x3]  ;;  %v5145_v62 = vsel %vm471_vm2, %v498_v41, %v500_v53  ;;  %v5149_v56 = vld [vmem:[#allocation2 + $0xa8] sm:$0xff] }
  0x43   : > { %294 = vst.msk [vmem:[#allocation2 + $0x199] sm:$0xff] %vm258_vm0, %v5096_v38  ;;  %295 = vst.msk [vmem:[#allocation2 + $0x1a1] sm:$0xff] %vm258_vm0, %v5099_v27  ;;  %671 = vrot.lane.b32.xlu0 %v5081_v58, %s4794_s24  ;;  %673 = vrot.lane.b32.xlu1 %v5084_v59, %s4794_s24  ;;  %v5129_v27 = vld [vmem:[#allocation2 + $0x98] sm:$0xff]  ;;  %v5132_v38 = vld [vmem:[#allocation2 + $0x90] sm:$0xff] }
  0x44   : > { %328 = vst.msk [vmem:[#allocation2 + $0x138] sm:$0x1] %vm314_vm1, %v309_v36  ;;  %9279 = vst [vmem:[#allocation34_spill] sm:$0xff] %v5122_v47  ;;  %v503_v49 = vrot.slane %v5129_v27, 1  ;;  %v5142_v61 = vsel %vm471_vm2, %v497_v52, %v498_v41  ;;  %v502_v36 = vrot.slane %v5132_v38, 1  ;;  %v5151_v32 = vld [vmem:[#allocation2 + $0xb0] sm:$0xff] }
  0x45   : > { %9280 = vst [vmem:[#allocation35_spill] sm:$0xff] %v5125_v48  ;;  %364 = vst.msk [vmem:[#allocation2 + $0x149] sm:$0x1] %vm314_vm1, %v346_v43  ;;  %v505_v43 = vrot.slane %v5134_v31, 1  ;;  %v5153_v23 = vld [vmem:[#allocation2 + $0xb8] sm:$0x3] }
  0x46   : > { %9281 = vst [vmem:[#allocation36_spill] sm:$0xff] %v5142_v61  ;;  %9282 = vst [vmem:[#allocation37_spill] sm:$0xff] %v5145_v62  ;;  %v310_v26 = vld [vmem:[#allocation2 + $0x152] sm:$0x1]  ;;  %v508_v52 = vrot.slane %v5151_v32, 1  ;;  %v5165_v53 = vsel %vm471_vm2, %v502_v36, %v503_v49  ;;  %v5172_v20 = vld [vmem:[#allocation2 + $0xc0] sm:$0xff] }
  0x47   : > { %675 = vrot.lane.b32.xlu0 %v5122_v47, %s4794_s24  ;;  %677 = vrot.lane.b32.xlu1 %v5125_v48, %s4794_s24  ;;  %329 = vst.msk [vmem:[#allocation2 + $0x150] sm:$0x1] %vm314_vm1, %v310_v26  ;;  %9283 = vst [vmem:[#allocation38_spill] sm:$0xff] %v5165_v53  ;;  %v5168_v26 = vsel %vm471_vm2, %v503_v49, %v505_v43  ;;  %v5176_v18 = vld [vmem:[#allocation2 + $0xd0] sm:$0x3]  ;;  %v512_v36 = vrot.slane %v5172_v20, 1 }
  0x48   : > { %v347_v22 = vld [vmem:[#allocation2 + $0x15f] sm:$0x1]  ;;  %9284 = vst [vmem:[#allocation39_spill] sm:$0xff] %v5168_v26  ;;  %v515_v17 = vrot.slane %v5176_v18, 1  ;;  %v5195_v14 = vld [vmem:[#allocation2 + $0xe8] sm:$0x3] }
  0x49   : > { %v311_v21 = vld [vmem:[#allocation2 + $0x16a] sm:$0x1]  ;;  %365 = vst.msk [vmem:[#allocation2 + $0x161] sm:$0x1] %vm314_vm1, %v347_v22  ;;  %v348_v41 = vld [vmem:[#allocation2 + $0x177] sm:$0x1] }
  0x4a   : > { %330 = vst.msk [vmem:[#allocation2 + $0x168] sm:$0x1] %vm314_vm1, %v311_v21  ;;  %366 = vst.msk [vmem:[#allocation2 + $0x179] sm:$0x1] %vm314_vm1, %v348_v41  ;;  %v507_v22 = vrot.slane %v5149_v56, 1  ;;  %v510_v21 = vrot.slane %v5153_v23, 1 }
  0x4b   : > { %679 = vrot.lane.b32.xlu0 %v5142_v61, %s4794_s24  ;;  %681 = vrot.lane.b32.xlu1 %v5145_v62, %s4794_s24  ;;  %v513_v41 = vrot.slane %v5174_v19, 1  ;;  %v5193_v15 = vld [vmem:[#allocation2 + $0xd8] sm:$0xff]  ;;  %v520_v12 = vrot.slane %v5195_v14, 1  ;;  %v5212_v10 = vld [vmem:[#allocation2 + $0xf0] sm:$0xff]  ;;  %v5214_v9 = vld [vmem:[#allocation2 + $0x100] sm:$0x3] }
  0x4c   : > { %v5184_v49 = vsel %vm471_vm2, %v507_v22, %v508_v52  ;;  %v5187_v43 = vsel %vm471_vm2, %v508_v52, %v510_v21  ;;  %v518_v22 = vrot.slane %v5191_v16, 1  ;;  %v517_v13 = vrot.slane %v5193_v15, 1  ;;  %v5231_v5 = vld [vmem:[#allocation2 + $0x108] sm:$0xff]  ;;  %v5233_v4 = vld [vmem:[#allocation2 + $0x118] sm:$0x3]  ;;  %v5250_v2 = vld [vmem:[#allocation2 + $0x120] sm:$0xff] }
  0x4d   : > { %9285 = vst [vmem:[#allocation40_spill] sm:$0xff] %v5184_v49  ;;  %9286 = vst [vmem:[#allocation41_spill] sm:$0xff] %v5187_v43  ;;  %v5203_v52 = vsel %vm471_vm2, %v512_v36, %v513_v41  ;;  %v5206_v21 = vsel %vm471_vm2, %v513_v41, %v515_v17  ;;  %v523_v36 = vrot.slane %v5210_v11, 1  ;;  %v522_v8 = vrot.slane %v5212_v10, 1  ;;  %v5248_v3 = vld [vmem:[#allocation2 + $0x128] sm:$0xff]  ;;  %v5310_v61 = vld [vmem:[#allocation2 + $0x170] sm:$0xff] }
  0x4e   : > { %9287 = vst [vmem:[#allocation42_spill] sm:$0xff] %v5203_v52  ;;  %9288 = vst [vmem:[#allocation43_spill] sm:$0xff] %v5206_v21  ;;  %v5222_v17 = vsel %vm471_vm2, %v517_v13, %v518_v22  ;;  %v5225_v41 = vsel %vm471_vm2, %v518_v22, %v520_v12  ;;  %v525_v7 = vrot.slane %v5214_v9, 1  ;;  %v528_v13 = vrot.slane %v5229_v6, 1 }
  0x4f   : > { %683 = vrot.lane.b32.xlu0 %v5165_v53, %s4794_s24  ;;  %685 = vrot.lane.b32.xlu1 %v5168_v26, %s4794_s24  ;;  %9289 = vst [vmem:[#allocation44_spill] sm:$0xff] %v5222_v17  ;;  %9290 = vst [vmem:[#allocation45_spill] sm:$0xff] %v5225_v41  ;;  %v5241_v12 = vsel %vm471_vm2, %v522_v8, %v523_v36  ;;  %v527_v1 = vrot.slane %v5231_v5, 1  ;;  %v530_v0 = vrot.slane %v5233_v4, 1  ;;  %v5293_v53 = vld [vmem:[#allocation2 + $0x150] sm:$0xff] }
  0x50   : > { %9291 = vst [vmem:[#allocation46_spill] sm:$0xff] %v5241_v12  ;;  %v5244_v22 = vsel %vm471_vm2, %v523_v36, %v525_v7  ;;  %v533_v7 = vrot.slane %v5248_v3, 1 }
  0x51   : > { %9292 = vst [vmem:[#allocation47_spill] sm:$0xff] %v5244_v22  ;;  %v5260_v8 = vsel %vm471_vm2, %v527_v1, %v528_v13  ;;  %v5263_v36 = vsel %vm471_vm2, %v528_v13, %v530_v0  ;;  %v5312_v48 = vld [vmem:[#allocation2 + $0x168] sm:$0xff] }
  0x52   : > { %9293 = vst [vmem:[#allocation48_spill] sm:$0xff] %v5260_v8  ;;  %9294 = vst [vmem:[#allocation49_spill] sm:$0xff] %v5263_v36  ;;  %v547_v59 = vrot.slane %v5312_v48, 1 }
  0x53   : > { %687 = vrot.lane.b32.xlu0 %v5184_v49, %s4794_s24  ;;  %689 = vrot.lane.b32.xlu1 %v5187_v43, %s4794_s24  ;;  %v5269_v43 = vld [vmem:[#allocation2 + $0x138] sm:$0xff]  ;;  %v5274_v49 = vld [vmem:[%s4848_s23 + $0xf0] sm:$0xff] }
  0x54   : > { %9295 = vst [vmem:[#allocation50_spill] sm:$0xff] %v5274_v49  ;;  %289 = vst.msk [vmem:[#allocation2 + $0x181] sm:$0xff] %vm258_vm0, %v5274_v49  ;;  %v542_v49 = vrot.slane %v5293_v53, 1 }
  0x57   : > { %691 = vrot.lane.b32.xlu0 %v5203_v52, %s4794_s24  ;;  %693 = vrot.lane.b32.xlu1 %v5206_v21, %s4794_s24  ;;  %v5267_v52 = vld [vmem:[#allocation2 + $0x140] sm:$0xff] }
  0x58   : > { %v538_v0 = vrot.slane %v5267_v52, 1 }
  0x5b   : > { %695 = vrot.lane.b32.xlu0 %v5222_v17, %s4794_s24  ;;  %697 = vrot.lane.b32.xlu1 %v5225_v41, %s4794_s24  ;;  %v5252_v17 = vld [vmem:[#allocation2 + $0x130] sm:$0x3]  ;;  %v532_v41 = vrot.slane %v5250_v2, 1  ;;  %v312_v47 = vld [vmem:[#allocation2 + $0x182] sm:$0x1] }
  0x5c   : > { %v535_v21 = vrot.slane %v5252_v17, 1  ;;  %331 = vst.msk [vmem:[#allocation2 + $0x180] sm:$0x1] %vm314_vm1, %v312_v47  ;;  %v554_v47 = vrot.slane %v4978_v30, 2 }
  0x5d   : > { %v5284_v1 = vsel %vm471_vm2, %v532_v41, %v533_v7 }
  0x5e   : > { %9296 = vst [vmem:[#allocation51_spill] sm:$0xff] %v5284_v1  ;;  %v5287_v13 = vsel %vm471_vm2, %v533_v7, %v535_v21 }
  0x5f   : > { %699 = vrot.lane.b32.xlu0 %v5241_v12, %s4794_s24  ;;  %701 = vrot.lane.b32.xlu1 %v5244_v22, %s4794_s24  ;;  %v5271_v12 = vld [vmem:[#allocation2 + $0x148] sm:$0x3]  ;;  %9297 = vst [vmem:[#allocation52_spill] sm:$0xff] %v5287_v13  ;;  %v537_v22 = vrot.slane %v5269_v43, 1 }
  0x60   : > { %v540_v26 = vrot.slane %v5271_v12, 1 }
  0x61   : > { %v5303_v41 = vsel %vm471_vm2, %v537_v22, %v538_v0 }
  0x62   : > { %9298 = vst [vmem:[#allocation53_spill] sm:$0xff] %v5303_v41  ;;  %v5306_v7 = vsel %vm471_vm2, %v538_v0, %v540_v26  ;;  %v548_v26 = vrot.slane %v5310_v61, 1 }
  0x63   : > { %703 = vrot.lane.b32.xlu0 %v5260_v8, %s4794_s24  ;;  %705 = vrot.lane.b32.xlu1 %v5263_v36, %s4794_s24  ;;  %v5291_v8 = vld [vmem:[#allocation2 + $0x158] sm:$0xff]  ;;  %v5295_v36 = vld [vmem:[#allocation2 + $0x160] sm:$0x3]  ;;  %9299 = vst [vmem:[#allocation54_spill] sm:$0xff] %v5306_v7 }
  0x64   : > { %v543_v21 = vrot.slane %v5291_v8, 1  ;;  %v545_v62 = vrot.slane %v5295_v36, 1 }
  0x66   : > { %v5328_v22 = vsel %vm471_vm2, %v542_v49, %v543_v21  ;;  %v5331_v0 = vsel %vm471_vm2, %v543_v21, %v545_v62  ;;  %v553_v62 = vrot.slane %v4996_v45, 2  ;;  %v556_v21 = vrot.slane %v5004_v50, 2 }
  0x67   : > { %707 = vrot.lane.b32.xlu0 %v5284_v1, %s4794_s24  ;;  %709 = vrot.lane.b32.xlu1 %v5287_v13, %s4794_s24  ;;  %v5314_v1 = vld [vmem:[#allocation2 + $0x178] sm:$0x3]  ;;  %9301 = vst [vmem:[#allocation56_spill] sm:$0xff] %v5328_v22  ;;  %9302 = vst [vmem:[#allocation57_spill] sm:$0xff] %v5331_v0  ;;  %v563_v45 = vrot.slane %v5011_v54, 2 }
  0x68   : > { %v5317_v13 = vld [vmem:[%s4848_s23 + $0xf8] sm:$0xff]  ;;  %v555_v30 = vsel %vm552_vm3, %v553_v62, %v554_v47  ;;  %v564_v62 = vrot.slane %v4992_v42, 2 }
  0x69   : > { %9300 = vst [vmem:[#allocation55_spill] sm:$0xff] %v5317_v13  ;;  %290 = vst.msk [vmem:[#allocation2 + $0x189] sm:$0xff] %vm258_vm0, %v5317_v13  ;;  %v5341_v13 = vsel %vm471_vm2, %v547_v59, %v548_v26  ;;  %v557_v59 = vsel %vm552_vm3, %v554_v47, %v556_v21  ;;  %v566_v47 = vrot.slane %v5013_v55, 2  ;;  %v569_v21 = vrot.slane %v5031_v24, 2 }
  0x6a   : > { %9303 = vst [vmem:[#allocation58_spill] sm:$0xff] %v5341_v13 }
  0x6b   : > { %711 = vrot.lane.b32.xlu0 %v5303_v41, %s4794_s24  ;;  %713 = vrot.lane.b32.xlu1 %v5306_v7, %s4794_s24  ;;  %v550_v41 = vrot.slane %v5314_v1, 1 }
  0x6d   : > { %v5344_v49 = vsel %vm471_vm2, %v548_v26, %v550_v41  ;;  %v559_v41 = vrot.slane %v4982_v33, 2  ;;  %v561_v26 = vrot.slane %v5006_v51, 2  ;;  %v568_v51 = vrot.slane %v5029_v63, 2 }
  0x6e   : > { %9304 = vst [vmem:[#allocation59_spill] sm:$0xff] %v5344_v49 }
  0x6f   : > { %715 = vrot.lane.b32.xlu0 %v5328_v22, %s4794_s24  ;;  %717 = vrot.lane.b32.xlu1 %v5331_v0, %s4794_s24  ;;  %v558_v0 = vrot.slane %v4998_v46, 2  ;;  %v5386_v55 = vsel %vm552_vm3, %v568_v51, %v569_v21 }
  0x71   : > { %v5361_v50 = vsel %vm552_vm3, %v558_v0, %v559_v41  ;;  %v5375_v0 = vsel %vm552_vm3, %v563_v45, %v564_v62  ;;  %v574_v45 = vrot.slane %v5043_v29, 2 }
  0x73   : > { %719 = vrot.lane.b32.xlu0 %v5341_v13, %s4794_s24  ;;  %721 = vrot.lane.b32.xlu1 %v5344_v49, %s4794_s24  ;;  %v5364_v49 = vsel %vm552_vm3, %v559_v41, %v561_v26  ;;  %v573_v26 = vrot.slane %v5057_v37, 2 }
  0x77   : > { %755 = vrot.lane.b32.xlu0 %v555_v30, %s4795_s25  ;;  %757 = vrot.lane.b32.xlu1 %v557_v59, %s4795_s25  ;;  %v5378_v30 = vsel %vm552_vm3, %v564_v62, %v566_v47  ;;  %v571_v59 = vrot.slane %v5033_v25, 2  ;;  %v576_v62 = vrot.slane %v5062_v40, 2  ;;  %v578_v25 = vrot.slane %v5101_v39, 2 }
  0x78   : > { %v5400_v47 = vsel %vm552_vm3, %v573_v26, %v574_v45  ;;  %v583_v40 = vrot.slane %v5132_v38, 2 }
  0x79   : > { %v5389_v41 = vsel %vm552_vm3, %v569_v21, %v571_v59  ;;  %v5403_v51 = vsel %vm552_vm3, %v574_v45, %v576_v62  ;;  %v579_v21 = vrot.slane %v5066_v44, 2  ;;  %v581_v59 = vrot.slane %v5103_v28, 2 }
  0x7a   : > { %v584_v45 = vrot.slane %v5129_v27, 2  ;;  %v586_v62 = vrot.slane %v5134_v31, 2  ;;  %v588_v28 = vrot.slane %v5149_v56, 2  ;;  %v593_v31 = vrot.slane %v5172_v20, 2 }
  0x7b   : > { %759 = vrot.lane.b32.xlu0 %v5361_v50, %s4795_s25  ;;  %761 = vrot.lane.b32.xlu1 %v5364_v49, %s4795_s25  ;;  %v5413_v13 = vsel %vm552_vm3, %v578_v25, %v579_v21  ;;  %v5416_v26 = vsel %vm552_vm3, %v579_v21, %v581_v59  ;;  %v589_v21 = vrot.slane %v5151_v32, 2  ;;  %v591_v59 = vrot.slane %v5153_v23, 2 }
  0x7c   : > { %v5426_v22 = vsel %vm552_vm3, %v583_v40, %v584_v45  ;;  %v5429_v25 = vsel %vm552_vm3, %v584_v45, %v586_v62  ;;  %v594_v45 = vrot.slane %v5174_v19, 2  ;;  %v596_v62 = vrot.slane %v5176_v18, 2 }
  0x7d   : > { %9305 = vst [vmem:[#allocation60_spill] sm:$0xff] %v5429_v25  ;;  %v5439_v7 = vsel %vm552_vm3, %v588_v28, %v589_v21  ;;  %v5442_v40 = vsel %vm552_vm3, %v589_v21, %v591_v59  ;;  %v598_v23 = vrot.slane %v5193_v15, 2  ;;  %v601_v59 = vrot.slane %v5195_v14, 2 }
  0x7e   : > { %9306 = vst [vmem:[#allocation61_spill] sm:$0xff] %v5439_v7  ;;  %9307 = vst [vmem:[#allocation62_spill] sm:$0xff] %v5442_v40  ;;  %v5453_v28 = vsel %vm552_vm3, %v593_v31, %v594_v45  ;;  %v5456_v21 = vsel %vm552_vm3, %v594_v45, %v596_v62  ;;  %v603_v31 = vrot.slane %v5212_v10, 2  ;;  %v606_v45 = vrot.slane %v5214_v9, 2 }
  0x7f   : > { %763 = vrot.lane.b32.xlu0 %v5375_v0, %s4795_s25  ;;  %765 = vrot.lane.b32.xlu1 %v5378_v30, %s4795_s25  ;;  %v608_v14 = vrot.slane %v5231_v5, 2  ;;  %v613_v9 = vrot.slane %v5250_v2, 2 }
  0x83   : > { %767 = vrot.lane.b32.xlu0 %v5386_v55, %s4795_s25  ;;  %769 = vrot.lane.b32.xlu1 %v5389_v41, %s4795_s25 }
  0x87   : > { %771 = vrot.lane.b32.xlu0 %v5400_v47, %s4795_s25  ;;  %773 = vrot.lane.b32.xlu1 %v5403_v51, %s4795_s25 }
  0x8b   : > { %775 = vrot.lane.b32.xlu0 %v5413_v13, %s4795_s25  ;;  %777 = vrot.lane.b32.xlu1 %v5416_v26, %s4795_s25 }
  0x8f   : > { %779 = vrot.lane.b32.xlu0 %v5426_v22, %s4795_s25  ;;  %781 = vrot.lane.b32.xlu1 %v5429_v25, %s4795_s25  ;;  %v599_v25 = vrot.slane %v5191_v16, 2 }
  0x91   : > { %v5464_v18 = vsel %vm552_vm3, %v598_v23, %v599_v25  ;;  %v609_v23 = vrot.slane %v5229_v6, 2 }
  0x93   : > { %783 = vrot.lane.b32.xlu0 %v5439_v7, %s4795_s25  ;;  %785 = vrot.lane.b32.xlu1 %v5442_v40, %s4795_s25  ;;  %v5467_v40 = vsel %vm552_vm3, %v599_v25, %v601_v59  ;;  %v604_v7 = vrot.slane %v5210_v11, 2  ;;  %v611_v59 = vrot.slane %v5233_v4, 2  ;;  %v618_v4 = vrot.slane %v5269_v43, 2 }
  0x94   : > { %9308 = vst [vmem:[#allocation63_spill] sm:$0xff] %v5467_v40 }
  0x95   : > { %v5478_v62 = vsel %vm552_vm3, %v603_v31, %v604_v7  ;;  %v5481_v25 = vsel %vm552_vm3, %v604_v7, %v606_v45  ;;  %v5494_v31 = vsel %vm552_vm3, %v609_v23, %v611_v59  ;;  %v614_v7 = vrot.slane %v5248_v3, 2 }
  0x96   : > { %9309 = vst [vmem:[#allocation64_spill] sm:$0xff] %v5478_v62  ;;  %9310 = vst [vmem:[#allocation65_spill] sm:$0xff] %v5481_v25  ;;  %v616_v45 = vrot.slane %v5252_v17, 2  ;;  %v621_v59 = vrot.slane %v5271_v12, 2  ;;  %v623_v17 = vrot.slane %v5293_v53, 2 }
  0x97   : > { %787 = vrot.lane.b32.xlu0 %v5453_v28, %s4795_s25  ;;  %789 = vrot.lane.b32.xlu1 %v5456_v21, %s4795_s25  ;;  %9312 = vst [vmem:[#allocation67_spill] sm:$0xff] %v5494_v31 }
  0x9b   : > { %791 = vrot.lane.b32.xlu0 %v5464_v18, %s4795_s25  ;;  %793 = vrot.lane.b32.xlu1 %v5467_v40, %s4795_s25  ;;  %v5491_v40 = vsel %vm552_vm3, %v608_v14, %v609_v23  ;;  %v5507_v14 = vsel %vm552_vm3, %v614_v7, %v616_v45  ;;  %v619_v23 = vrot.slane %v5267_v52, 2  ;;  %v626_v45 = vrot.slane %v5295_v36, 2 }
  0x9c   : > { %9311 = vst [vmem:[#allocation66_spill] sm:$0xff] %v5491_v40  ;;  %9314 = vst [vmem:[#allocation69_spill] sm:$0xff] %v5507_v14  ;;  %v629_v36 = vrot.slane %v5310_v61, 2 }
  0x9f   : > { %795 = vrot.lane.b32.xlu0 %v5478_v62, %s4795_s25  ;;  %797 = vrot.lane.b32.xlu1 %v5481_v25, %s4795_s25  ;;  %v5504_v25 = vsel %vm552_vm3, %v613_v9, %v614_v7  ;;  %v5520_v9 = vsel %vm552_vm3, %v619_v23, %v621_v59  ;;  %v624_v7 = vrot.slane %v5291_v8, 2  ;;  %v631_v59 = vrot.slane %v5314_v1, 2 }
  0xa0   : > { %9313 = vst [vmem:[#allocation68_spill] sm:$0xff] %v5504_v25  ;;  %9316 = vst [vmem:[#allocation71_spill] sm:$0xff] %v5520_v9 }
  0xa3   : > { %799 = vrot.lane.b32.xlu0 %v5491_v40, %s4795_s25  ;;  %801 = vrot.lane.b32.xlu1 %v5494_v31, %s4795_s25  ;;  %v5517_v31 = vsel %vm552_vm3, %v618_v4, %v619_v23  ;;  %v628_v4 = vrot.slane %v5312_v48, 2  ;;  %v5537_v23 = vsel %vm552_vm3, %v624_v7, %v626_v45 }
  0xa4   : > { %9315 = vst [vmem:[#allocation70_spill] sm:$0xff] %v5517_v31  ;;  %9318 = vst [vmem:[#allocation73_spill] sm:$0xff] %v5537_v23 }
  0xa7   : > { %803 = vrot.lane.b32.xlu0 %v5504_v25, %s4795_s25  ;;  %805 = vrot.lane.b32.xlu1 %v5507_v14, %s4795_s25  ;;  %v5534_v14 = vsel %vm552_vm3, %v623_v17, %v624_v7  ;;  %v5550_v17 = vsel %vm552_vm3, %v628_v4, %v629_v36  ;;  %v5553_v7 = vsel %vm552_vm3, %v629_v36, %v631_v59 }
  0xa8   : > { %9317 = vst [vmem:[#allocation72_spill] sm:$0xff] %v5534_v14  ;;  %9320 = vst [vmem:[#allocation75_spill] sm:$0xff] %v5550_v17 }
  0xa9   : > { %v5524_v40 = vpop.permute.xlu0 %659  ;;  %v5526_v12 = vpop.permute.xlu1 %663  ;;  %9321 = vst [vmem:[#allocation76_spill] sm:$0xff] %v5553_v7 }
  0xab   : > { %807 = vrot.lane.b32.xlu0 %v5517_v31, %s4795_s25  ;;  %809 = vrot.lane.b32.xlu1 %v5520_v9, %s4795_s25 }
  0xad   : > { %v5541_v25 = vpop.permute.xlu0 %661  ;;  %v5543_v62 = vpop.permute.xlu1 %665 }
  0xae   : > { %9319 = vst [vmem:[#allocation74_spill] sm:$0xff] %v5543_v62  ;;  %v1693_v62 = vld [vmem:[%s9052_s1 + $0x18] sm:$0xff] }
  0xaf   : > { %811 = vrot.lane.b32.xlu0 %v5534_v14, %s4795_s25  ;;  %813 = vrot.lane.b32.xlu1 %v5537_v23, %s4795_s25 }
  0xb1   : > { %v5555_v45 = vpop.permute.xlu0 %667  ;;  %v5557_v9 = vpop.permute.xlu1 %669 }
  0xb2   : > { %9322 = vst [vmem:[#allocation77_spill] sm:$0xff] %v5555_v45  ;;  %9323 = vst [vmem:[#allocation78_spill] sm:$0xff] %v5557_v9  ;;  %v9389_v9 = vld [vmem:[#allocation47_spill] sm:$0xff]  ;;  %v9393_v45 = vld [vmem:[#allocation49_spill] sm:$0xff] }
  0xb3   : > { %815 = vrot.lane.b32.xlu0 %v5550_v17, %s4795_s25  ;;  %817 = vrot.lane.b32.xlu1 %v5553_v7, %s4795_s25 }
  0xb5   : > { %v5563_v1 = vpop.permute.xlu0 %671  ;;  %v5565_v14 = vpop.permute.xlu1 %673 }
  0xb6   : > { %9324 = vst [vmem:[#allocation79_spill] sm:$0xff] %v5563_v1  ;;  %9325 = vst [vmem:[#allocation80_spill] sm:$0xff] %v5565_v14  ;;  %v9381_v14 = vld [vmem:[#allocation43_spill] sm:$0xff]  ;;  %v9385_v1 = vld [vmem:[#allocation45_spill] sm:$0xff] }
  0xb7   : > { %851 = vrot.lane.b32.xlu0 %v4998_v46, %s4796_s26  ;;  %853 = vrot.lane.b32.xlu1 %v4982_v33, %s4796_s26 }
  0xb9   : > { %v5571_v4 = vpop.permute.xlu0 %675  ;;  %v5573_v36 = vpop.permute.xlu1 %677 }
  0xba   : > { %9326 = vst [vmem:[#allocation81_spill] sm:$0xff] %v5571_v4  ;;  %9327 = vst [vmem:[#allocation82_spill] sm:$0xff] %v5573_v36  ;;  %v9373_v36 = vld [vmem:[#allocation39_spill] sm:$0xff]  ;;  %v9377_v4 = vld [vmem:[#allocation41_spill] sm:$0xff] }
  0xbb   : > { %855 = vrot.lane.b32.xlu0 %v5011_v54, %s4796_s26  ;;  %857 = vrot.lane.b32.xlu1 %v4992_v42, %s4796_s26 }
  0xbd   : > { %v5579_v59 = vpop.permute.xlu0 %679  ;;  %v5581_v7 = vpop.permute.xlu1 %681 }
  0xbe   : > { %9328 = vst [vmem:[#allocation83_spill] sm:$0xff] %v5579_v59  ;;  %9329 = vst [vmem:[#allocation84_spill] sm:$0xff] %v5581_v7 }
  0xbf   : > { %859 = vrot.lane.b32.xlu0 %v5029_v63, %s4796_s26  ;;  %861 = vrot.lane.b32.xlu1 %v5031_v24, %s4796_s26 }
  0xc1   : > { %v5587_v33 = vpop.permute.xlu0 %683  ;;  %v5589_v46 = vpop.permute.xlu1 %685 }
  0xc2   : > { %9330 = vst [vmem:[#allocation85_spill] sm:$0xff] %v5587_v33  ;;  %9331 = vst [vmem:[#allocation86_spill] sm:$0xff] %v5589_v46 }
  0xc3   : > { %863 = vrot.lane.b32.xlu0 %v5057_v37, %s4796_s26  ;;  %865 = vrot.lane.b32.xlu1 %v5043_v29, %s4796_s26 }
  0xc5   : > { %v5595_v17 = vpop.permute.xlu0 %687  ;;  %v5597_v23 = vpop.permute.xlu1 %689 }
  0xc6   : > { %9332 = vst [vmem:[#allocation87_spill] sm:$0xff] %v5595_v17  ;;  %9333 = vst [vmem:[#allocation88_spill] sm:$0xff] %v5597_v23 }
  0xc7   : > { %867 = vrot.lane.b32.xlu0 %v5101_v39, %s4796_s26  ;;  %869 = vrot.lane.b32.xlu1 %v5066_v44, %s4796_s26 }
  0xc9   : > { %v5603_v7 = vpop.permute.xlu0 %691  ;;  %v5605_v33 = vpop.permute.xlu1 %693 }
  0xca   : > { %9334 = vst [vmem:[#allocation89_spill] sm:$0xff] %v5603_v7  ;;  %9335 = vst [vmem:[#allocation90_spill] sm:$0xff] %v5605_v33 }
  0xcb   : > { %871 = vrot.lane.b32.xlu0 %v5132_v38, %s4796_s26  ;;  %873 = vrot.lane.b32.xlu1 %v5129_v27, %s4796_s26 }
  0xcd   : > { %v5611_v46 = vpop.permute.xlu0 %695  ;;  %v5613_v17 = vpop.permute.xlu1 %697 }
  0xce   : > { %9336 = vst [vmem:[#allocation91_spill] sm:$0xff] %v5611_v46  ;;  %9337 = vst [vmem:[#allocation92_spill] sm:$0xff] %v5613_v17 }
  0xcf   : > { %875 = vrot.lane.b32.xlu0 %v5149_v56, %s4796_s26  ;;  %877 = vrot.lane.b32.xlu1 %v5151_v32, %s4796_s26 }
  0xd1   : > { %v5619_v23 = vpop.permute.xlu0 %699  ;;  %v5621_v7 = vpop.permute.xlu1 %701 }
  0xd2   : > { %9338 = vst [vmem:[#allocation93_spill] sm:$0xff] %v5619_v23  ;;  %9339 = vst [vmem:[#allocation94_spill] sm:$0xff] %v5621_v7 }
  0xd3   : > { %879 = vrot.lane.b32.xlu0 %v5172_v20, %s4796_s26  ;;  %881 = vrot.lane.b32.xlu1 %v5174_v19, %s4796_s26 }
  0xd5   : > { %v5627_v33 = vpop.permute.xlu0 %703  ;;  %v5629_v46 = vpop.permute.xlu1 %705 }
  0xd6   : > { %9340 = vst [vmem:[#allocation95_spill] sm:$0xff] %v5627_v33  ;;  %9341 = vst [vmem:[#allocation96_spill] sm:$0xff] %v5629_v46 }
  0xd7   : > { %883 = vrot.lane.b32.xlu0 %v5193_v15, %s4796_s26  ;;  %885 = vrot.lane.b32.xlu1 %v5191_v16, %s4796_s26 }
  0xd9   : > { %v5635_v17 = vpop.permute.xlu0 %707  ;;  %v5637_v23 = vpop.permute.xlu1 %709 }
  0xda   : > { %9342 = vst [vmem:[#allocation97_spill] sm:$0xff] %v5635_v17  ;;  %9343 = vst [vmem:[#allocation98_spill] sm:$0xff] %v5637_v23 }
  0xdb   : > { %887 = vrot.lane.b32.xlu0 %v5212_v10, %s4796_s26  ;;  %889 = vrot.lane.b32.xlu1 %v5210_v11, %s4796_s26 }
  0xdd   : > { %v5643_v7 = vpop.permute.xlu0 %711  ;;  %v5645_v33 = vpop.permute.xlu1 %713 }
  0xde   : > { %9344 = vst [vmem:[#allocation99_spill] sm:$0xff] %v5643_v7  ;;  %9345 = vst [vmem:[#allocation100_spill] sm:$0xff] %v5645_v33 }
  0xdf   : > { %891 = vrot.lane.b32.xlu0 %v5231_v5, %s4796_s26  ;;  %893 = vrot.lane.b32.xlu1 %v5229_v6, %s4796_s26 }
  0xe1   : > { %v5651_v46 = vpop.permute.xlu0 %715  ;;  %v5653_v17 = vpop.permute.xlu1 %717 }
  0xe2   : > { %9346 = vst [vmem:[#allocation101_spill] sm:$0xff] %v5651_v46  ;;  %9347 = vst [vmem:[#allocation102_spill] sm:$0xff] %v5653_v17 }
  0xe3   : > { %895 = vrot.lane.b32.xlu0 %v5250_v2, %s4796_s26  ;;  %897 = vrot.lane.b32.xlu1 %v5248_v3, %s4796_s26 }
  0xe5   : > { %v5659_v23 = vpop.permute.xlu0 %719  ;;  %v5661_v7 = vpop.permute.xlu1 %721 }
  0xe6   : > { %9348 = vst [vmem:[#allocation103_spill] sm:$0xff] %v5659_v23  ;;  %9349 = vst [vmem:[#allocation104_spill] sm:$0xff] %v5661_v7 }
  0xe7   : > { %899 = vrot.lane.b32.xlu0 %v5269_v43, %s4796_s26  ;;  %901 = vrot.lane.b32.xlu1 %v5267_v52, %s4796_s26  ;;  %v5683_v43 = vld [vmem:[#allocation2 + $0x180] sm:$0xff]  ;;  %v5685_v52 = vld [vmem:[#allocation2 + $0x188] sm:$0xff] }
  0xe8   : > { %9351 = vst [vmem:[#allocation106_spill] sm:$0xff] %v5683_v43  ;;  %9352 = vst [vmem:[#allocation107_spill] sm:$0xff] %v5685_v52 }
  0xe9   : > { %v5667_v5 = vpop.permute.xlu0 %755  ;;  %v5669_v6 = vpop.permute.xlu1 %757 }
  0xeb   : > { %903 = vrot.lane.b32.xlu0 %v5293_v53, %s4796_s26  ;;  %905 = vrot.lane.b32.xlu1 %v5291_v8, %s4796_s26 }
  0xed   : > { %v5675_v2 = vpop.permute.xlu0 %759  ;;  %v5677_v3 = vpop.permute.xlu1 %761 }
  0xee   : > { %9350 = vst [vmem:[#allocation105_spill] sm:$0xff] %v5677_v3 }
  0xef   : > { %907 = vrot.lane.b32.xlu0 %v5312_v48, %s4796_s26  ;;  %909 = vrot.lane.b32.xlu1 %v5310_v61, %s4796_s26 }
  0xf1   : > { %v5687_v7 = vpop.permute.xlu0 %763  ;;  %v5689_v53 = vpop.permute.xlu1 %765 }
  0xf2   : > { %9353 = vst [vmem:[#allocation108_spill] sm:$0xff] %v5687_v7  ;;  %9354 = vst [vmem:[#allocation109_spill] sm:$0xff] %v5689_v53 }
  0xf3   : > { %911 = vrot.lane.b32.xlu0 %v5683_v43, %s4796_s26  ;;  %913 = vrot.lane.b32.xlu1 %v5685_v52, %s4796_s26  ;;  %v9364_v52 = vld [vmem:[#allocation34_spill] sm:$0xff]  ;;  %v9365_v43 = vld [vmem:[#allocation35_spill] sm:$0xff] }
  0xf5   : > { %v5695_v8 = vpop.permute.xlu0 %767  ;;  %v5697_v48 = vpop.permute.xlu1 %769 }
  0xf6   : > { %9355 = vst [vmem:[#allocation110_spill] sm:$0xff] %v5695_v8  ;;  %9356 = vst [vmem:[#allocation111_spill] sm:$0xff] %v5697_v48 }
  0xf7   : > { %947 = vrot.lane.b32.xlu0 %v5017_v57, %s4797_s27  ;;  %949 = vrot.lane.b32.xlu1 %v5025_v60, %s4797_s27  ;;  %v9361_v57 = vld [vmem:[#allocation30_spill] sm:$0xff] }
  0xf9   : > { %v5703_v61 = vpop.permute.xlu0 %771  ;;  %v5705_v23 = vpop.permute.xlu1 %773 }
  0xfa   : > { %9357 = vst [vmem:[#allocation112_spill] sm:$0xff] %v5703_v61  ;;  %9358 = vst [vmem:[#allocation113_spill] sm:$0xff] %v5705_v23  ;;  %v9369_v23 = vld [vmem:[#allocation37_spill] sm:$0xff] }
  0xfb   : > { %951 = vrot.lane.b32.xlu0 %v5051_v34, %s4797_s27  ;;  %953 = vrot.lane.b32.xlu1 %v5054_v35, %s4797_s27 }
  0xfd   : > { %v5711_v17 = vpop.permute.xlu0 %775  ;;  %v5713_v46 = vpop.permute.xlu1 %777 }
  0xfe   : > { %9359 = vst [vmem:[#allocation114_spill] sm:$0xff] %v5711_v17  ;;  %9360 = vst [vmem:[#allocation115_spill] sm:$0xff] %v5713_v46  ;;  %v9368_v46 = vld [vmem:[#allocation36_spill] sm:$0xff] }
  0xff   : > { %955 = vrot.lane.b32.xlu0 %v5081_v58, %s4797_s27  ;;  %957 = vrot.lane.b32.xlu1 %v9361_v57, %s4797_s27 }
 0x101   : > { %v5719_v60 = vpop.permute.xlu0 %779  ;;  %v5721_v33 = vpop.permute.xlu1 %781 }
 0x102   : > { %9362 = vst [vmem:[#allocation30_spill] sm:$0xff] %v5719_v60  ;;  %9363 = vst [vmem:[#allocation116_spill] sm:$0xff] %v5721_v33  ;;  %v9372_v33 = vld [vmem:[#allocation38_spill] sm:$0xff] }
 0x103   : > { %959 = vrot.lane.b32.xlu0 %v9364_v52, %s4797_s27  ;;  %961 = vrot.lane.b32.xlu1 %v9365_v43, %s4797_s27 }
 0x105   : > { %v5727_v59 = vpop.permute.xlu0 %783  ;;  %v5729_v17 = vpop.permute.xlu1 %785 }
 0x106   : > { %9366 = vst [vmem:[#allocation34_spill] sm:$0xff] %v5727_v59  ;;  %9367 = vst [vmem:[#allocation35_spill] sm:$0xff] %v5729_v17  ;;  %v9376_v17 = vld [vmem:[#allocation40_spill] sm:$0xff] }
 0x107   : > { %963 = vrot.lane.b32.xlu0 %v9368_v46, %s4797_s27  ;;  %965 = vrot.lane.b32.xlu1 %v9369_v23, %s4797_s27 }
 0x109   : > { %v5735_v31 = vpop.permute.xlu0 %787  ;;  %v5737_v60 = vpop.permute.xlu1 %789 }
 0x10a   : > { %9370 = vst [vmem:[#allocation36_spill] sm:$0xff] %v5735_v31  ;;  %9371 = vst [vmem:[#allocation37_spill] sm:$0xff] %v5737_v60  ;;  %v9380_v60 = vld [vmem:[#allocation42_spill] sm:$0xff] }
 0x10b   : > { %967 = vrot.lane.b32.xlu0 %v9372_v33, %s4797_s27  ;;  %969 = vrot.lane.b32.xlu1 %v9373_v36, %s4797_s27 }
 0x10d   : > { %v5743_v61 = vpop.permute.xlu0 %791  ;;  %v5745_v59 = vpop.permute.xlu1 %793 }
 0x10e   : > { %9374 = vst [vmem:[#allocation38_spill] sm:$0xff] %v5743_v61  ;;  %9375 = vst [vmem:[#allocation39_spill] sm:$0xff] %v5745_v59  ;;  %v9384_v59 = vld [vmem:[#allocation44_spill] sm:$0xff] }
 0x10f   : > { %971 = vrot.lane.b32.xlu0 %v9376_v17, %s4797_s27  ;;  %973 = vrot.lane.b32.xlu1 %v9377_v4, %s4797_s27 }
 0x111   : > { %v5751_v48 = vpop.permute.xlu0 %795  ;;  %v5753_v31 = vpop.permute.xlu1 %797 }
 0x112   : > { %9378 = vst [vmem:[#allocation40_spill] sm:$0xff] %v5751_v48  ;;  %9379 = vst [vmem:[#allocation41_spill] sm:$0xff] %v5753_v31  ;;  %v9388_v31 = vld [vmem:[#allocation46_spill] sm:$0xff] }
 0x113   : > { %975 = vrot.lane.b32.xlu0 %v9380_v60, %s4797_s27  ;;  %977 = vrot.lane.b32.xlu1 %v9381_v14, %s4797_s27 }
 0x115   : > { %v5759_v8 = vpop.permute.xlu0 %799  ;;  %v5761_v61 = vpop.permute.xlu1 %801 }
 0x116   : > { %9382 = vst [vmem:[#allocation42_spill] sm:$0xff] %v5759_v8  ;;  %9383 = vst [vmem:[#allocation43_spill] sm:$0xff] %v5761_v61  ;;  %v1690_v61 = vld [vmem:[%s9052_s1] sm:$0xff] }
 0x117   : > { %979 = vrot.lane.b32.xlu0 %v9384_v59, %s4797_s27  ;;  %981 = vrot.lane.b32.xlu1 %v9385_v1, %s4797_s27 }
 0x119   : > { %v5767_v53 = vpop.permute.xlu0 %803  ;;  %v5769_v48 = vpop.permute.xlu1 %805 }
 0x11a   : > { %9386 = vst [vmem:[#allocation44_spill] sm:$0xff] %v5767_v53  ;;  %9387 = vst [vmem:[#allocation45_spill] sm:$0xff] %v5769_v48  ;;  %v1691_v53 = vld [vmem:[%s9052_s1 + $0x8] sm:$0xff]  ;;  %v9392_v48 = vld [vmem:[#allocation48_spill] sm:$0xff] }
 0x11b   : > { %983 = vrot.lane.b32.xlu0 %v9388_v31, %s4797_s27  ;;  %985 = vrot.lane.b32.xlu1 %v9389_v9, %s4797_s27  ;;  %v4688_v3 = vpack.c.bf16 %v1691_v53, %v1690_v61 }
 0x11d   : > { %v5775_v7 = vpop.permute.xlu0 %807  ;;  %v5777_v8 = vpop.permute.xlu1 %809  ;;  %4689 = vmatprep.subr.bf16.mxu0 %v4688_v3 }
 0x11e   : > { %9390 = vst [vmem:[#allocation46_spill] sm:$0xff] %v5775_v7  ;;  %9391 = vst [vmem:[#allocation117_spill] sm:$0xff] %v5777_v8  ;;  %4691 = vmatpush3.bf16.msra.mxu0 %v4688_v3  ;;  %v1692_v8 = vld [vmem:[%s9052_s1 + $0x10] sm:$0xff]  ;;  %v9400_v3 = vld [vmem:[#allocation53_spill] sm:$0xff] }
 0x11f   : > { %987 = vrot.lane.b32.xlu0 %v9392_v48, %s4797_s27  ;;  %989 = vrot.lane.b32.xlu1 %v9393_v45, %s4797_s27  ;;  %v9396_v48 = vld [vmem:[#allocation51_spill] sm:$0xff]  ;;  %v9397_v45 = vld [vmem:[#allocation52_spill] sm:$0xff]  ;;  %v4692_v53 = vpack.c.bf16 %v1693_v62, %v1692_v8 }
 0x121   : > { %v5789_v9 = vpop.permute.xlu0 %811  ;;  %v5791_v7 = vpop.permute.xlu1 %813  ;;  %4693 = vmatprep.subr.bf16.mxu0 %v4692_v53 }
 0x122   : > { %9394 = vst [vmem:[#allocation118_spill] sm:$0xff] %v5789_v9  ;;  %9395 = vst [vmem:[#allocation119_spill] sm:$0xff] %v5791_v7  ;;  %4695 = vmatpush3.bf16.msra.mxu0 %v4692_v53  ;;  %v1694_v9 = vld [vmem:[%s9052_s1 + $0x20] sm:$0xf] }
 0x123   : > { %991 = vrot.lane.b32.xlu0 %v9396_v48, %s4797_s27  ;;  %993 = vrot.lane.b32.xlu1 %v9397_v45, %s4797_s27 }
 0x124   : > { %4580 = vmatprep.subr.msk.mxu0 %vm1799_vm4, %v1694_v9 }
 0x125   : > { %v5803_v61 = vpop.permute.xlu0 %815  ;;  %v5805_v7 = vpop.permute.xlu1 %817 }
 0x126   : > { %9398 = vst [vmem:[#allocation51_spill] sm:$0xff] %v5803_v61  ;;  %9399 = vst [vmem:[#allocation120_spill] sm:$0xff] %v5805_v7  ;;  %4581 = vmatpush3.msk.msra.mxu0 %vm1799_vm4, %v1694_v9 }
 0x127   : > { %995 = vrot.lane.b32.xlu0 %v9400_v3, %s4797_s27  ;;  %1043 = vrot.lane.b32.xlu1 %v5361_v50, %s4798_s11 }
 0x129   : > { %v5814_v45 = vpop.permute.xlu0 %851  ;;  %v5816_v62 = vpop.permute.xlu1 %853 }
 0x12b   : > { %1045 = vrot.lane.b32.xlu0 %v5364_v49, %s4798_s11  ;;  %1139 = vrot.lane.b32.xlu1 %v5011_v54, %s4799_s14 }
 0x12d   : > { %v5824_v50 = vpop.permute.xlu0 %855  ;;  %v5826_v8 = vpop.permute.xlu1 %857 }
 0x12f   : > { %1141 = vrot.lane.b32.xlu0 %v4992_v42, %s4799_s14  ;;  %1235 = vrot.lane.b32.xlu1 %v5051_v34, %s4800_s15 }
 0x131   : > { %v5832_v53 = vpop.permute.xlu0 %859  ;;  %v5834_v9 = vpop.permute.xlu1 %861 }
 0x133   : > { %1237 = vrot.lane.b32.xlu0 %v5054_v35, %s4800_s15  ;;  %1331 = vrot.lane.b32.xlu1 %v5375_v0, %s4801_s16 }
 0x135   : > { %v5840_v54 = vpop.permute.xlu0 %863  ;;  %v5842_v49 = vpop.permute.xlu1 %865 }
 0x137   : > { %1047 = vrot.lane.b32.xlu0 %v5375_v0, %s4798_s11  ;;  %1333 = vrot.lane.b32.xlu1 %v5378_v30, %s4801_s16 }
 0x139   : > { %v5848_v42 = vpop.permute.xlu0 %867  ;;  %v5850_v34 = vpop.permute.xlu1 %869 }
 0x13b   : > { %1049 = vrot.lane.b32.xlu0 %v5378_v30, %s4798_s11  ;;  %1143 = vrot.lane.b32.xlu1 %v5029_v63, %s4799_s14 }
 0x13d   : > { %v5856_v35 = vpop.permute.xlu0 %871  ;;  %v5858_v7 = vpop.permute.xlu1 %873 }
 0x13f   : > { %1145 = vrot.lane.b32.xlu0 %v5031_v24, %s4799_s14  ;;  %1239 = vrot.lane.b32.xlu1 %v5081_v58, %s4800_s15 }
 0x141   : > { %v5864_v0 = vpop.permute.xlu0 %875  ;;  %v5866_v61 = vpop.permute.xlu1 %877 }
 0x143   : > { %1241 = vrot.lane.b32.xlu0 %v9361_v57, %s4800_s15  ;;  %1335 = vrot.lane.b32.xlu1 %v5386_v55, %s4801_s16 }
 0x145   : > { %v5872_v63 = vpop.permute.xlu0 %879  ;;  %v5874_v30 = vpop.permute.xlu1 %881 }
 0x146   : > { %9401 = vst [vmem:[#allocation53_spill] sm:$0xff] %v5872_v63 }
 0x147   : > { %1051 = vrot.lane.b32.xlu0 %v5386_v55, %s4798_s11  ;;  %1337 = vrot.lane.b32.xlu1 %v5389_v41, %s4801_s16 }
 0x149   : > { %v5880_v24 = vpop.permute.xlu0 %883  ;;  %v5882_v58 = vpop.permute.xlu1 %885 }
 0x14a   : > { %9402 = vst [vmem:[#allocation121_spill] sm:$0xff] %v5880_v24 }
 0x14b   : > { %1053 = vrot.lane.b32.xlu0 %v5389_v41, %s4798_s11  ;;  %1147 = vrot.lane.b32.xlu1 %v5057_v37, %s4799_s14 }
 0x14d   : > { %v5888_v57 = vpop.permute.xlu0 %887  ;;  %v5890_v63 = vpop.permute.xlu1 %889 }
 0x14f   : > { %1149 = vrot.lane.b32.xlu0 %v5043_v29, %s4799_s14  ;;  %1243 = vrot.lane.b32.xlu1 %v9364_v52, %s4800_s15 }
 0x151   : > { %v5896_v55 = vpop.permute.xlu0 %891  ;;  %v5898_v24 = vpop.permute.xlu1 %893 }
 0x152   : > { %9403 = vst [vmem:[#allocation122_spill] sm:$0xff] %v5896_v55  ;;  %9404 = vst [vmem:[#allocation123_spill] sm:$0xff] %v5898_v24 }
 0x153   : > { %1245 = vrot.lane.b32.xlu0 %v9365_v43, %s4800_s15  ;;  %1339 = vrot.lane.b32.xlu1 %v5400_v47, %s4801_s16 }
 0x155   : > { %v5904_v37 = vpop.permute.xlu0 %895  ;;  %v5906_v41 = vpop.permute.xlu1 %897 }
 0x156   : > { %9405 = vst [vmem:[#allocation124_spill] sm:$0xff] %v5904_v37  ;;  %9406 = vst [vmem:[#allocation125_spill] sm:$0xff] %v5906_v41 }
 0x157   : > { %1055 = vrot.lane.b32.xlu0 %v5400_v47, %s4798_s11  ;;  %1341 = vrot.lane.b32.xlu1 %v5403_v51, %s4801_s16 }
 0x159   : > { %v5912_v29 = vpop.permute.xlu0 %899  ;;  %v5914_v52 = vpop.permute.xlu1 %901 }
 0x15a   : > { %9407 = vst [vmem:[#allocation126_spill] sm:$0xff] %v5912_v29  ;;  %9408 = vst [vmem:[#allocation127_spill] sm:$0xff] %v5914_v52 }
 0x15b   : > { %1057 = vrot.lane.b32.xlu0 %v5403_v51, %s4798_s11  ;;  %1151 = vrot.lane.b32.xlu1 %v5101_v39, %s4799_s14 }
 0x15d   : > { %v5920_v43 = vpop.permute.xlu0 %903  ;;  %v5922_v37 = vpop.permute.xlu1 %905 }
 0x15e   : > { %9409 = vst [vmem:[#allocation128_spill] sm:$0xff] %v5920_v43  ;;  %9410 = vst [vmem:[#allocation129_spill] sm:$0xff] %v5922_v37 }
 0x15f   : > { %1153 = vrot.lane.b32.xlu0 %v5066_v44, %s4799_s14  ;;  %1247 = vrot.lane.b32.xlu1 %v9368_v46, %s4800_s15 }
 0x161   : > { %v5928_v47 = vpop.permute.xlu0 %907  ;;  %v5930_v29 = vpop.permute.xlu1 %909 }
 0x162   : > { %9411 = vst [vmem:[#allocation130_spill] sm:$0xff] %v5928_v47  ;;  %9412 = vst [vmem:[#allocation131_spill] sm:$0xff] %v5930_v29 }
 0x163   : > { %1249 = vrot.lane.b32.xlu0 %v9369_v23, %s4800_s15  ;;  %1343 = vrot.lane.b32.xlu1 %v5413_v13, %s4801_s16 }
 0x165   : > { %v5936_v39 = vpop.permute.xlu0 %911  ;;  %v5938_v51 = vpop.permute.xlu1 %913 }
 0x166   : > { %9413 = vst [vmem:[#allocation132_spill] sm:$0xff] %v5936_v39  ;;  %9414 = vst [vmem:[#allocation133_spill] sm:$0xff] %v5938_v51 }
 0x167   : > { %1059 = vrot.lane.b32.xlu0 %v5413_v13, %s4798_s11  ;;  %1345 = vrot.lane.b32.xlu1 %v5416_v26, %s4801_s16 }
 0x169   : > { %v5944_v44 = vpop.permute.xlu0 %947  ;;  %v5946_v46 = vpop.permute.xlu1 %949 }
 0x16b   : > { %1061 = vrot.lane.b32.xlu0 %v5416_v26, %s4798_s11  ;;  %1155 = vrot.lane.b32.xlu1 %v5132_v38, %s4799_s14 }
 0x16d   : > { %v5952_v23 = vpop.permute.xlu0 %951  ;;  %v5954_v39 = vpop.permute.xlu1 %953 }
 0x16f   : > { %1157 = vrot.lane.b32.xlu0 %v5129_v27, %s4799_s14  ;;  %1251 = vrot.lane.b32.xlu1 %v9372_v33, %s4800_s15  ;;  %v9415_v27 = vld [vmem:[#allocation60_spill] sm:$0xff] }
 0x171   : > { %v5960_v13 = vpop.permute.xlu0 %955  ;;  %v5962_v51 = vpop.permute.xlu1 %957 }
 0x173   : > { %1253 = vrot.lane.b32.xlu0 %v9373_v36, %s4800_s15  ;;  %1347 = vrot.lane.b32.xlu1 %v5426_v22, %s4801_s16 }
 0x175   : > { %v5968_v38 = vpop.permute.xlu0 %959  ;;  %v5970_v26 = vpop.permute.xlu1 %961 }
 0x177   : > { %1063 = vrot.lane.b32.xlu0 %v5426_v22, %s4798_s11  ;;  %1349 = vrot.lane.b32.xlu1 %v9415_v27, %s4801_s16 }
 0x179   : > { %v5976_v33 = vpop.permute.xlu0 %963  ;;  %v5978_v29 = vpop.permute.xlu1 %965 }
 0x17b   : > { %1065 = vrot.lane.b32.xlu0 %v9415_v27, %s4798_s11  ;;  %1159 = vrot.lane.b32.xlu1 %v5149_v56, %s4799_s14  ;;  %v9416_v27 = vld [vmem:[#allocation61_spill] sm:$0xff] }
 0x17d   : > { %v5984_v36 = vpop.permute.xlu0 %967  ;;  %v5986_v47 = vpop.permute.xlu1 %969 }
 0x17f   : > { %1161 = vrot.lane.b32.xlu0 %v5151_v32, %s4799_s14  ;;  %1255 = vrot.lane.b32.xlu1 %v9376_v17, %s4800_s15  ;;  %v9417_v32 = vld [vmem:[#allocation62_spill] sm:$0xff] }
 0x181   : > { %v5992_v22 = vpop.permute.xlu0 %971  ;;  %v5994_v37 = vpop.permute.xlu1 %973 }
 0x183   : > { %1257 = vrot.lane.b32.xlu0 %v9377_v4, %s4800_s15  ;;  %1351 = vrot.lane.b32.xlu1 %v9416_v27, %s4801_s16 }
 0x185   : > { %v6000_v56 = vpop.permute.xlu0 %975  ;;  %v6002_v43 = vpop.permute.xlu1 %977 }
 0x187   : > { %1067 = vrot.lane.b32.xlu0 %v9416_v27, %s4798_s11  ;;  %1353 = vrot.lane.b32.xlu1 %v9417_v32, %s4801_s16 }
 0x189   : > { %v6008_v17 = vpop.permute.xlu0 %979  ;;  %v6010_v52 = vpop.permute.xlu1 %981 }
 0x18b   : > { %1069 = vrot.lane.b32.xlu0 %v9417_v32, %s4798_s11  ;;  %1163 = vrot.lane.b32.xlu1 %v5172_v20, %s4799_s14  ;;  %v349_v20 = vld [vmem:[#allocation2 + $0x18f] sm:$0x1] }
 0x18c   : > { %367 = vst.msk [vmem:[#allocation2 + $0x191] sm:$0x1] %vm314_vm1, %v349_v20  ;;  %v4724_v20 = vld [vmem:[#allocation2] sm:$0xff] }
 0x18d   : > { %v6016_v4 = vpop.permute.xlu0 %983  ;;  %v6018_v41 = vpop.permute.xlu1 %985 }
 0x18f   : > { %1165 = vrot.lane.b32.xlu0 %v5174_v19, %s4799_s14  ;;  %1259 = vrot.lane.b32.xlu1 %v9380_v60, %s4800_s15 }
 0x191   : > { %v6024_v27 = vpop.permute.xlu0 %987  ;;  %v6026_v24 = vpop.permute.xlu1 %989 }
 0x193   : > { %1261 = vrot.lane.b32.xlu0 %v9381_v14, %s4800_s15  ;;  %1355 = vrot.lane.b32.xlu1 %v5453_v28, %s4801_s16 }
 0x195   : > { %v6032_v32 = vpop.permute.xlu0 %991  ;;  %v6034_v55 = vpop.permute.xlu1 %993 }
 0x196   : > { %9418 = vst [vmem:[#allocation60_spill] sm:$0xff] %v6032_v32  ;;  %9419 = vst [vmem:[#allocation61_spill] sm:$0xff] %v6034_v55 }
 0x197   : > { %1071 = vrot.lane.b32.xlu0 %v5453_v28, %s4798_s11  ;;  %1357 = vrot.lane.b32.xlu1 %v5456_v21, %s4801_s16  ;;  %v1427_v28 = vsel %vm258_vm0, %v4724_v20, %v5524_v40  ;;  %v4725_v20 = vld [vmem:[#allocation2 + $0x8] sm:$0xff] }
 0x199   : > { %v6041_v19 = vpop.permute.xlu0 %995  ;;  %v1044_v60 = vpop.permute.xlu1 %1043 }
 0x19a   : > { %9420 = vst [vmem:[#allocation62_spill] sm:$0xff] %v6041_v19 }
 0x19b   : > { %1073 = vrot.lane.b32.xlu0 %v5456_v21, %s4798_s11  ;;  %1167 = vrot.lane.b32.xlu1 %v5193_v15, %s4799_s14  ;;  %v1460_v21 = vsel %vm1459_vm5, %v1427_v28, %v5667_v5  ;;  %v350_v28 = vld [vmem:[#allocation2 + $0x1a7] sm:$0x1] }
 0x19c   : > { %v1493_v15 = vsel %vm1492_vm6, %v1460_v21, %v5814_v45  ;;  %v313_v45 = vld [vmem:[#allocation2 + $0x19a] sm:$0x1]  ;;  %368 = vst.msk [vmem:[#allocation2 + $0x1a9] sm:$0x1] %vm314_vm1, %v350_v28 }
 0x19d   : > { %v1046_v14 = vpop.permute.xlu0 %1045  ;;  %v1140_v55 = vpop.permute.xlu1 %1139  ;;  %v1526_v40 = vsel %vm1525_vm7, %v1493_v15, %v5944_v44  ;;  %332 = vst.msk [vmem:[#allocation2 + $0x198] sm:$0x1] %vm314_vm1, %v313_v45 }
 0x19f   : > { %1169 = vrot.lane.b32.xlu0 %v5191_v16, %s4799_s14  ;;  %1263 = vrot.lane.b32.xlu1 %v9384_v59, %s4800_s15  ;;  %v1428_v16 = vsel %vm258_vm0, %v4725_v20, %v5541_v25  ;;  %v1559_v59 = vsel %vm1558_vm8, %v1526_v40, %v1044_v60  ;;  %v9421_v40 = vld [vmem:[#allocation63_spill] sm:$0xff] }
 0x1a0   : > { %v1461_v5 = vsel %vm1459_vm5, %v1428_v16, %v5669_v6  ;;  %v1592_v44 = vsel %vm1591_vm9, %v1559_v59, %v1140_v55  ;;  %v4726_v59 = vld [vmem:[#allocation2 + $0x18] sm:$0xff] }
 0x1a1   : > { %v1142_v19 = vpop.permute.xlu0 %1141  ;;  %v1236_v32 = vpop.permute.xlu1 %1235  ;;  %v1494_v25 = vsel %vm1492_vm6, %v1461_v5, %v5816_v62 }
 0x1a2   : > { %v1625_v60 = vsel %vm1624_vm10, %v1592_v44, %v1236_v32  ;;  %v1527_v15 = vsel %vm1525_vm7, %v1494_v25, %v5946_v46  ;;  %v4727_v25 = vld [vmem:[#allocation2 + $0x20] sm:$0xff] }
 0x1a3   : > { %1265 = vrot.lane.b32.xlu0 %v9385_v1, %s4800_s15  ;;  %1359 = vrot.lane.b32.xlu1 %v5464_v18, %s4801_s16  ;;  %v1560_v55 = vsel %vm1558_vm8, %v1527_v15, %v1046_v14 }
 0x1a4   : > { %v1593_v62 = vsel %vm1591_vm9, %v1560_v55, %v1142_v19  ;;  %v1429_v19 = vsel %vm258_vm0, %v4726_v59, %v5526_v12 }
 0x1a5   : > { %v1238_v21 = vpop.permute.xlu0 %1237  ;;  %v1332_v1 = vpop.permute.xlu1 %1331  ;;  %v1462_v45 = vsel %vm1459_vm5, %v1429_v19, %v5675_v2  ;;  %v9425_v2 = vld [vmem:[#allocation105_spill] sm:$0xff] }
 0x1a6   : > { %v1658_v6 = vsel %vm1657_vm11, %v1625_v60, %v1332_v1  ;;  %v1626_v32 = vsel %vm1624_vm10, %v1593_v62, %v1238_v21  ;;  %v9422_v60 = vld [vmem:[#allocation74_spill] sm:$0xff]  ;;  %v9423_v21 = vld [vmem:[#allocation47_spill] sm:$0xff] }
 0x1a7   : > { %1075 = vrot.lane.b32.xlu0 %v5464_v18, %s4798_s11  ;;  %1361 = vrot.lane.b32.xlu1 %v9421_v40, %s4801_s16  ;;  %v1430_v12 = vsel %vm258_vm0, %v4727_v25, %v9422_v60  ;;  %v9429_v25 = vld [vmem:[#allocation108_spill] sm:$0xff] }
 0x1a8   : > { %4582 = vmatprep.mubr.msk.f32.mxu0 %vm1702_vm12, %v1658_v6 }
 0x1a9   : > { %v1048_v20 = vpop.permute.xlu0 %1047  ;;  %v1334_v16 = vpop.permute.xlu1 %1333 }
 0x1aa   : > { %v1659_v46 = vsel %vm1657_vm11, %v1626_v32, %v1334_v16 }
 0x1ab   : > { %1077 = vrot.lane.b32.xlu0 %v9421_v40, %s4798_s11  ;;  %1171 = vrot.lane.b32.xlu1 %v5212_v10, %s4799_s14  ;;  %v1495_v10 = vsel %vm1492_vm6, %v1462_v45, %v5824_v50  ;;  %v1463_v50 = vsel %vm1459_vm5, %v1430_v12, %v9425_v2  ;;  %v4729_v45 = vld [vmem:[#allocation2 + $0x30] sm:$0xff]  ;;  %v4731_v2 = vld [vmem:[#allocation2 + $0x38] sm:$0xff] }
 0x1ac   : > { %4583 = vmatmul.mubr.msk.f32.vlgmr.msra.gmra.mrb[0].mxu0 %vm1702_vm12, %v1659_v46  ;;  %v1528_v28 = vsel %vm1525_vm7, %v1495_v10, %v5952_v23  ;;  %v1496_v23 = vsel %vm1492_vm6, %v1463_v50, %v5826_v8  ;;  %v9427_v10 = vld [vmem:[#allocation77_spill] sm:$0xff]  ;;  %v9430_v50 = vld [vmem:[#allocation78_spill] sm:$0xff] }
 0x1ad   : > { %v1050_v18 = vpop.permute.xlu0 %1049  ;;  %v1144_v14 = vpop.permute.xlu1 %1143  ;;  %v1529_v40 = vsel %vm1525_vm7, %v1496_v23, %v5954_v39 }
 0x1ae   : > { %v1562_v32 = vsel %vm1558_vm8, %v1529_v40, %v1050_v18  ;;  %v6130_v18 = vld [vmem:[#allocation2 + $0x108] sm:$0xff] }
 0x1af   : > { %1173 = vrot.lane.b32.xlu0 %v5210_v11, %s4799_s14  ;;  %1267 = vrot.lane.b32.xlu1 %v9388_v31, %s4800_s15  ;;  %v1561_v11 = vsel %vm1558_vm8, %v1528_v28, %v1048_v20  ;;  %v9424_v31 = vld [vmem:[#allocation64_spill] sm:$0xff]  ;;  %v9426_v20 = vld [vmem:[#allocation65_spill] sm:$0xff] }
 0x1b0   : > { %v1594_v1 = vsel %vm1591_vm9, %v1561_v11, %v1144_v14  ;;  %v9428_v28 = vld [vmem:[#allocation48_spill] sm:$0xff] }
 0x1b1   : > { %v1146_v5 = vpop.permute.xlu0 %1145  ;;  %v1240_v44 = vpop.permute.xlu1 %1239 }
 0x1b2   : > { %v1627_v15 = vsel %vm1624_vm10, %v1594_v1, %v1240_v44  ;;  %v1595_v16 = vsel %vm1591_vm9, %v1562_v32, %v1146_v5  ;;  %v1431_v5 = vsel %vm258_vm0, %v4729_v45, %v9427_v10  ;;  %v6137_v44 = vld [vmem:[#allocation2 + $0x110] sm:$0xff]  ;;  %v1432_v1 = vsel %vm258_vm0, %v4731_v2, %v9430_v50 }
 0x1b3   : > { %1269 = vrot.lane.b32.xlu0 %v9423_v21, %s4800_s15  ;;  %1363 = vrot.lane.b32.xlu1 %v9424_v31, %s4801_s16  ;;  %v1464_v60 = vsel %vm1459_vm5, %v1431_v5, %v9429_v25  ;;  %v9435_v25 = vld [vmem:[#allocation79_spill] sm:$0xff] }
 0x1b4   : > { %v1497_v12 = vsel %vm1492_vm6, %v1464_v60, %v5832_v53 }
 0x1b5   : > { %v1242_v6 = vpop.permute.xlu0 %1241  ;;  %v1336_v55 = vpop.permute.xlu1 %1335 }
 0x1b6   : > { %v1660_v62 = vsel %vm1657_vm11, %v1627_v15, %v1336_v55  ;;  %v1628_v8 = vsel %vm1624_vm10, %v1595_v16, %v1242_v6  ;;  %v9431_v15 = vld [vmem:[#allocation49_spill] sm:$0xff]  ;;  %v9432_v6 = vld [vmem:[#allocation66_spill] sm:$0xff] }
 0x1b7   : > { %1079 = vrot.lane.b32.xlu0 %v9424_v31, %s4798_s11  ;;  %1365 = vrot.lane.b32.xlu1 %v9426_v20, %s4801_s16  ;;  %v1530_v31 = vsel %vm1525_vm7, %v1497_v12, %v5960_v13  ;;  %v9433_v55 = vld [vmem:[#allocation109_spill] sm:$0xff]  ;;  %v6183_v12 = vld [vmem:[#allocation2 + $0x128] sm:$0xff] }
 0x1b8   : > { %4585 = vmatprep.mubr.msk.f32.mxu0 %vm1702_vm12, %v1660_v62  ;;  %v1465_v53 = vsel %vm1459_vm5, %v1432_v1, %v9433_v55 }
 0x1b9   : > { %v1052_v46 = vpop.permute.xlu0 %1051  ;;  %v1338_v14 = vpop.permute.xlu1 %1337  ;;  %v1498_v13 = vsel %vm1492_vm6, %v1465_v53, %v5834_v9  ;;  %v9438_v53 = vld [vmem:[#allocation52_spill] sm:$0xff] }
 0x1ba   : > { %v1661_v39 = vsel %vm1657_vm11, %v1628_v8, %v1338_v14  ;;  %v1563_v23 = vsel %vm1558_vm8, %v1530_v31, %v1052_v46  ;;  %v1531_v16 = vsel %vm1525_vm7, %v1498_v13, %v5962_v51  ;;  %v9434_v14 = vld [vmem:[#allocation67_spill] sm:$0xff] }
 0x1bb   : > { %1081 = vrot.lane.b32.xlu0 %v9426_v20, %s4798_s11  ;;  %1175 = vrot.lane.b32.xlu1 %v6130_v18, %s4799_s14 }
 0x1bc   : > { %4586 = vmatmul.mubr.msk.f32.gmra.mrb[2].mxu0 %vm1702_vm12, %v1661_v39 }
 0x1bd   : > { %v1054_v59 = vpop.permute.xlu0 %1053  ;;  %v1148_v19 = vpop.permute.xlu1 %1147 }
 0x1be   : > { %v1596_v40 = vsel %vm1591_vm9, %v1563_v23, %v1148_v19  ;;  %v1564_v46 = vsel %vm1558_vm8, %v1531_v16, %v1054_v59  ;;  %v6176_v59 = vld [vmem:[#allocation2 + $0x120] sm:$0xff]  ;;  %v4735_v23 = vld [vmem:[#allocation2 + $0x50] sm:$0xff] }
 0x1bf   : > { %1177 = vrot.lane.b32.xlu0 %v6137_v44, %s4799_s14  ;;  %1271 = vrot.lane.b32.xlu1 %v9428_v28, %s4800_s15  ;;  %v4733_v28 = vld [vmem:[#allocation2 + $0x48] sm:$0xff] }
 0x1c0   : > { %v1433_v60 = vsel %vm258_vm0, %v4733_v28, %v9435_v25  ;;  %v9442_v28 = vld [vmem:[#allocation81_spill] sm:$0xff] }
 0x1c1   : > { %v1150_v11 = vpop.permute.xlu0 %1149  ;;  %v1244_v21 = vpop.permute.xlu1 %1243 }
 0x1c2   : > { %v1629_v62 = vsel %vm1624_vm10, %v1596_v40, %v1244_v21  ;;  %v1597_v39 = vsel %vm1591_vm9, %v1564_v46, %v1150_v11  ;;  %v9436_v11 = vld [vmem:[#allocation110_spill] sm:$0xff]  ;;  %v9440_v40 = vld [vmem:[#allocation111_spill] sm:$0xff] }
 0x1c3   : > { %1273 = vrot.lane.b32.xlu0 %v9431_v15, %s4800_s15  ;;  %1367 = vrot.lane.b32.xlu1 %v9432_v6, %s4801_s16  ;;  %v1466_v21 = vsel %vm1459_vm5, %v1433_v60, %v9436_v11  ;;  %v9437_v15 = vld [vmem:[#allocation80_spill] sm:$0xff]  ;;  %v6229_v60 = vld [vmem:[#allocation2 + $0x140] sm:$0xff] }
 0x1c4   : > { %v1499_v31 = vsel %vm1492_vm6, %v1466_v21, %v5840_v54  ;;  %v9443_v11 = vld [vmem:[#allocation112_spill] sm:$0xff] }
 0x1c5   : > { %v1246_v32 = vpop.permute.xlu0 %1245  ;;  %v1340_v20 = vpop.permute.xlu1 %1339  ;;  %v1532_v1 = vsel %vm1525_vm7, %v1499_v31, %v5968_v38 }
 0x1c6   : > { %v1662_v8 = vsel %vm1657_vm11, %v1629_v62, %v1340_v20  ;;  %v1630_v9 = vsel %vm1624_vm10, %v1597_v39, %v1246_v32 }
 0x1c7   : > { %1083 = vrot.lane.b32.xlu0 %v9432_v6, %s4798_s11  ;;  %1369 = vrot.lane.b32.xlu1 %v9434_v14, %s4801_s16  ;;  %v1434_v6 = vsel %vm258_vm0, %v4735_v23, %v9437_v15  ;;  %v4739_v23 = vld [vmem:[#allocation2 + $0x68] sm:$0xff] }
 0x1c8   : > { %4588 = vmatprep.mubr.msk.f32.mxu0 %vm1702_vm12, %v1662_v8  ;;  %v1467_v54 = vsel %vm1459_vm5, %v1434_v6, %v9440_v40  ;;  %v9444_v15 = vld [vmem:[#allocation82_spill] sm:$0xff] }
 0x1c9   : > { %v1056_v19 = vpop.permute.xlu0 %1055  ;;  %v1342_v45 = vpop.permute.xlu1 %1341  ;;  %v1500_v38 = vsel %vm1492_vm6, %v1467_v54, %v5842_v49  ;;  %v1436_v6 = vsel %vm258_vm0, %v4739_v23, %v9444_v15  ;;  %v9452_v15 = vld [vmem:[#allocation56_spill] sm:$0xff] }
 0x1ca   : > { %v1663_v51 = vsel %vm1657_vm11, %v1630_v9, %v1342_v45  ;;  %v1565_v55 = vsel %vm1558_vm8, %v1532_v1, %v1056_v19  ;;  %v1533_v16 = vsel %vm1525_vm7, %v1500_v38, %v5970_v26  ;;  %v6222_v45 = vld [vmem:[#allocation2 + $0x138] sm:$0xff] }
 0x1cb   : > { %1085 = vrot.lane.b32.xlu0 %v9434_v14, %s4798_s11  ;;  %1179 = vrot.lane.b32.xlu1 %v6176_v59, %s4799_s14  ;;  %v9441_v14 = vld [vmem:[#allocation69_spill] sm:$0xff] }
 0x1cc   : > { %4589 = vmatmul.mubr.msk.f32.gmra.mrb[4].mxu0 %vm1702_vm12, %v1663_v51 }
 0x1cd   : > { %v1058_v10 = vpop.permute.xlu0 %1057  ;;  %v1152_v5 = vpop.permute.xlu1 %1151 }
 0x1ce   : > { %v1598_v13 = vsel %vm1591_vm9, %v1565_v55, %v1152_v5  ;;  %v1566_v46 = vsel %vm1558_vm8, %v1533_v16, %v1058_v10  ;;  %v4737_v5 = vld [vmem:[#allocation2 + $0x60] sm:$0xff] }
 0x1cf   : > { %1181 = vrot.lane.b32.xlu0 %v6183_v12, %s4799_s14  ;;  %1275 = vrot.lane.b32.xlu1 %v9396_v48, %s4800_s15  ;;  %v9439_v48 = vld [vmem:[#allocation68_spill] sm:$0xff]  ;;  %v1435_v25 = vsel %vm258_vm0, %v4737_v5, %v9442_v28  ;;  %v9450_v5 = vld [vmem:[#allocation114_spill] sm:$0xff] }
 0x1d0   : > { %v1468_v21 = vsel %vm1459_vm5, %v1435_v25, %v9443_v11 }
 0x1d1   : > { %v1154_v2 = vpop.permute.xlu0 %1153  ;;  %v1248_v50 = vpop.permute.xlu1 %1247  ;;  %v1501_v31 = vsel %vm1492_vm6, %v1468_v21, %v5848_v42 }
 0x1d2   : > { %v1631_v62 = vsel %vm1624_vm10, %v1598_v13, %v1248_v50  ;;  %v1599_v39 = vsel %vm1591_vm9, %v1566_v46, %v1154_v2  ;;  %v1534_v1 = vsel %vm1525_vm7, %v1501_v31, %v5976_v33 }
 0x1d3   : > { %1277 = vrot.lane.b32.xlu0 %v9438_v53, %s4800_s15  ;;  %1371 = vrot.lane.b32.xlu1 %v9439_v48, %s4801_s16  ;;  %v9445_v53 = vld [vmem:[#allocation54_spill] sm:$0xff] }
 0x1d5   : > { %v1250_v32 = vpop.permute.xlu0 %1249  ;;  %v1344_v20 = vpop.permute.xlu1 %1343 }
 0x1d6   : > { %v1664_v8 = vsel %vm1657_vm11, %v1631_v62, %v1344_v20  ;;  %v1632_v49 = vsel %vm1624_vm10, %v1599_v39, %v1250_v32 }
 0x1d7   : > { %1087 = vrot.lane.b32.xlu0 %v9439_v48, %s4798_s11  ;;  %1373 = vrot.lane.b32.xlu1 %v9441_v14, %s4801_s16  ;;  %v9447_v48 = vld [vmem:[#allocation113_spill] sm:$0xff] }
 0x1d8   : > { %4591 = vmatprep.mubr.msk.f32.mxu0 %vm1702_vm12, %v1664_v8  ;;  %v1469_v42 = vsel %vm1459_vm5, %v1436_v6, %v9447_v48  ;;  %v9453_v6 = vld [vmem:[#allocation115_spill] sm:$0xff] }
 0x1d9   : > { %v1060_v9 = vpop.permute.xlu0 %1059  ;;  %v1346_v19 = vpop.permute.xlu1 %1345  ;;  %v1502_v33 = vsel %vm1492_vm6, %v1469_v42, %v5850_v34 }
 0x1da   : > { %v1665_v26 = vsel %vm1657_vm11, %v1632_v49, %v1346_v19  ;;  %v1567_v55 = vsel %vm1558_vm8, %v1534_v1, %v1060_v9  ;;  %v1535_v62 = vsel %vm1525_vm7, %v1502_v33, %v5978_v29  ;;  %v4740_v9 = vld [vmem:[#allocation2 + $0x78] sm:$0xff]  ;;  %v9449_v19 = vld [vmem:[#allocation83_spill] sm:$0xff] }
 0x1db   : > { %1089 = vrot.lane.b32.xlu0 %v9441_v14, %s4798_s11  ;;  %1183 = vrot.lane.b32.xlu1 %v6222_v45, %s4799_s14  ;;  %v9448_v14 = vld [vmem:[#allocation71_spill] sm:$0xff] }
 0x1dc   : > { %4592 = vmatmul.mubr.msk.f32.gmra.mrb[6].mxu0 %vm1702_vm12, %v1665_v26  ;;  %v1437_v26 = vsel %vm258_vm0, %v4740_v9, %v9449_v19 }
 0x1dd   : > { %v1062_v51 = vpop.permute.xlu0 %1061  ;;  %v1156_v10 = vpop.permute.xlu1 %1155  ;;  %v1470_v28 = vsel %vm1459_vm5, %v1437_v26, %v9450_v5  ;;  %v4745_v5 = vld [vmem:[#allocation2 + $0x98] sm:$0xff] }
 0x1de   : > { %v1600_v40 = vsel %vm1591_vm9, %v1567_v55, %v1156_v10  ;;  %v1568_v20 = vsel %vm1558_vm8, %v1535_v62, %v1062_v51  ;;  %v6273_v51 = vld [vmem:[#allocation2 + $0x150] sm:$0xff]  ;;  %v6277_v10 = vld [vmem:[#allocation2 + $0x158] sm:$0xff]  ;;  %v1503_v25 = vsel %vm1492_vm6, %v1470_v28, %v5856_v35  ;;  %v9459_v28 = vld [vmem:[#allocation86_spill] sm:$0xff] }
 0x1df   : > { %1185 = vrot.lane.b32.xlu0 %v6229_v60, %s4799_s14  ;;  %1279 = vrot.lane.b32.xlu1 %v9400_v3, %s4800_s15  ;;  %v9446_v3 = vld [vmem:[#allocation70_spill] sm:$0xff]  ;;  %v1536_v31 = vsel %vm1525_vm7, %v1503_v25, %v5984_v36  ;;  %v1440_v25 = vsel %vm258_vm0, %v4745_v5, %v9459_v28  ;;  %v9471_v28 = vld [vmem:[#allocation35_spill] sm:$0xff] }
 0x1e1   : > { %v1158_v2 = vpop.permute.xlu0 %1157  ;;  %v1252_v50 = vpop.permute.xlu1 %1251 }
 0x1e2   : > { %v1633_v54 = vsel %vm1624_vm10, %v1600_v40, %v1252_v50  ;;  %v1601_v16 = vsel %vm1591_vm9, %v1568_v20, %v1158_v2  ;;  %v4743_v2 = vld [vmem:[#allocation2 + $0x80] sm:$0xff]  ;;  %v9451_v50 = vld [vmem:[#allocation84_spill] sm:$0xff] }
 0x1e3   : > { %1281 = vrot.lane.b32.xlu0 %v9445_v53, %s4800_s15  ;;  %1375 = vrot.lane.b32.xlu1 %v9446_v3, %s4801_s16  ;;  %v1438_v1 = vsel %vm258_vm0, %v4743_v2, %v9451_v50 }
 0x1e4   : > { %v1471_v35 = vsel %vm1459_vm5, %v1438_v1, %v9453_v6 }
 0x1e5   : > { %v1254_v13 = vpop.permute.xlu0 %1253  ;;  %v1348_v38 = vpop.permute.xlu1 %1347  ;;  %v1504_v36 = vsel %vm1492_vm6, %v1471_v35, %v5858_v7 }
 0x1e6   : > { %v1666_v32 = vsel %vm1657_vm11, %v1633_v54, %v1348_v38  ;;  %v1634_v34 = vsel %vm1624_vm10, %v1601_v16, %v1254_v13  ;;  %v1537_v42 = vsel %vm1525_vm7, %v1504_v36, %v5986_v47  ;;  %v9454_v54 = vld [vmem:[#allocation57_spill] sm:$0xff]  ;;  %v9455_v13 = vld [vmem:[#allocation72_spill] sm:$0xff]  ;;  %v9461_v36 = vld [vmem:[#allocation58_spill] sm:$0xff] }
 0x1e7   : > { %997 = vrot.lane.b32.xlu0 %v9445_v53, %s4797_s27  ;;  %1091 = vrot.lane.b32.xlu1 %v9446_v3, %s4798_s11 }
 0x1e8   : > { %4594 = vmatprep.mubr.msk.f32.mxu0 %vm1702_vm12, %v1666_v32 }
 0x1e9   : > { %v1064_v8 = vpop.permute.xlu0 %1063  ;;  %v1350_v46 = vpop.permute.xlu1 %1349 }
 0x1ea   : > { %v1667_v29 = vsel %vm1657_vm11, %v1634_v34, %v1350_v46  ;;  %v1569_v23 = vsel %vm1558_vm8, %v1536_v31, %v1064_v8  ;;  %v4744_v34 = vld [vmem:[#allocation2 + $0x90] sm:$0xff]  ;;  %v9456_v8 = vld [vmem:[#allocation85_spill] sm:$0xff] }
 0x1eb   : > { %1377 = vrot.lane.b32.xlu0 %v9448_v14, %s4801_s16  ;;  %1093 = vrot.lane.b32.xlu1 %v9448_v14, %s4798_s11  ;;  %v1439_v46 = vsel %vm258_vm0, %v4744_v34, %v9456_v8  ;;  %v9458_v14 = vld [vmem:[#allocation30_spill] sm:$0xff]  ;;  %v6336_v31 = vld [vmem:[#allocation2 + $0x170] sm:$0xff] }
 0x1ec   : > { %4595 = vmatmul.mubr.msk.f32.gmra.mrb[8].mxu0 %vm1702_vm12, %v1667_v29  ;;  %v9457_v29 = vld [vmem:[#allocation73_spill] sm:$0xff] }
 0x1ed   : > { %v1066_v39 = vpop.permute.xlu0 %1065  ;;  %v1160_v49 = vpop.permute.xlu1 %1159 }
 0x1ee   : > { %v1602_v55 = vsel %vm1591_vm9, %v1569_v23, %v1160_v49  ;;  %v1570_v33 = vsel %vm1558_vm8, %v1537_v42, %v1066_v39  ;;  %v1472_v39 = vsel %vm1459_vm5, %v1439_v46, %v9458_v14  ;;  %v9462_v42 = vld [vmem:[#allocation59_spill] sm:$0xff] }
 0x1ef   : > { %1187 = vrot.lane.b32.xlu0 %v6273_v51, %s4799_s14  ;;  %1189 = vrot.lane.b32.xlu1 %v6277_v10, %s4799_s14  ;;  %v1505_v49 = vsel %vm1492_vm6, %v1472_v39, %v5864_v0  ;;  %v9460_v0 = vld [vmem:[#allocation116_spill] sm:$0xff]  ;;  %v4749_v46 = vld [vmem:[#allocation2 + $0xb0] sm:$0xff] }
 0x1f0   : > { %v1538_v26 = vsel %vm1525_vm7, %v1505_v49, %v5992_v22  ;;  %v1473_v2 = vsel %vm1459_vm5, %v1440_v25, %v9460_v0  ;;  %v9468_v49 = vld [vmem:[#allocation76_spill] sm:$0xff] }
 0x1f1   : > { %v1162_v11 = vpop.permute.xlu0 %1161  ;;  %v1256_v21 = vpop.permute.xlu1 %1255  ;;  %v1506_v50 = vsel %vm1492_vm6, %v1473_v2, %v5866_v61 }
 0x1f2   : > { %v1635_v53 = vsel %vm1624_vm10, %v1602_v55, %v1256_v21  ;;  %v1603_v38 = vsel %vm1591_vm9, %v1570_v33, %v1162_v11  ;;  %v6332_v21 = vld [vmem:[#allocation2 + $0x168] sm:$0xff]  ;;  %v1539_v6 = vsel %vm1525_vm7, %v1506_v50, %v5994_v37  ;;  %v419_v50 = vld [vmem:[#allocation2 + $0x190] sm:$0x3] }
 0x1f3   : > { %1283 = vrot.lane.b32.xlu0 %v9452_v15, %s4800_s15  ;;  %999 = vrot.lane.b32.xlu1 %v9452_v15, %s4797_s27 }
 0x1f5   : > { %v1258_v3 = vpop.permute.xlu0 %1257  ;;  %v1352_v48 = vpop.permute.xlu1 %1351 }
 0x1f6   : > { %v1668_v40 = vsel %vm1657_vm11, %v1635_v53, %v1352_v48  ;;  %v1636_v7 = vsel %vm1624_vm10, %v1603_v38, %v1258_v3  ;;  %v9464_v38 = vld [vmem:[#allocation87_spill] sm:$0xff] }
 0x1f7   : > { %1285 = vrot.lane.b32.xlu0 %v9454_v54, %s4800_s15  ;;  %1379 = vrot.lane.b32.xlu1 %v9455_v13, %s4801_s16 }
 0x1f8   : > { %4597 = vmatprep.mubr.msk.f32.mxu0 %vm1702_vm12, %v1668_v40  ;;  %v9463_v40 = vld [vmem:[#allocation75_spill] sm:$0xff] }
 0x1f9   : > { %v1068_v62 = vpop.permute.xlu0 %1067  ;;  %v1354_v32 = vpop.permute.xlu1 %1353 }
 0x1fa   : > { %v1669_v47 = vsel %vm1657_vm11, %v1636_v7, %v1354_v32  ;;  %v1571_v11 = vsel %vm1558_vm8, %v1538_v26, %v1068_v62  ;;  %v9465_v62 = vld [vmem:[#allocation34_spill] sm:$0xff]  ;;  %v9470_v26 = vld [vmem:[#allocation107_spill] sm:$0xff] }
 0x1fb   : > { %1001 = vrot.lane.b32.xlu0 %v9454_v54, %s4797_s27  ;;  %1095 = vrot.lane.b32.xlu1 %v9455_v13, %s4798_s11  ;;  %v4748_v13 = vld [vmem:[#allocation2 + $0xa8] sm:$0xff]  ;;  %v637_v5 = vrot.slane %v9470_v26, 1 }
 0x1fc   : > { %4598 = vmatmul.mubr.msk.f32.gmra.mrb[10].mxu0 %vm1702_vm12, %v1669_v47  ;;  %v1441_v7 = vsel %vm258_vm0, %v4748_v13, %v9464_v38  ;;  %v9466_v47 = vld [vmem:[#allocation53_spill] sm:$0xff]  ;;  %v9473_v38 = vld [vmem:[#allocation36_spill] sm:$0xff] }
 0x1fd   : > { %v1070_v20 = vpop.permute.xlu0 %1069  ;;  %v1164_v16 = vpop.permute.xlu1 %1163  ;;  %v1474_v32 = vsel %vm1459_vm5, %v1441_v7, %v9465_v62  ;;  %v644_v62 = vrot.slane %v419_v50, 2 }
 0x1fe   : > { %v1604_v22 = vsel %vm1591_vm9, %v1571_v11, %v1164_v16  ;;  %v1572_v55 = vsel %vm1558_vm8, %v1539_v6, %v1070_v20  ;;  %v1507_v20 = vsel %vm1492_vm6, %v1474_v32, %v9466_v47  ;;  %v9474_v32 = vld [vmem:[#allocation121_spill] sm:$0xff] }
 0x1ff   : > { %1381 = vrot.lane.b32.xlu0 %v9457_v29, %s4801_s16  ;;  %1097 = vrot.lane.b32.xlu1 %v9457_v29, %s4798_s11  ;;  %v1540_v8 = vsel %vm1525_vm7, %v1507_v20, %v6000_v56  ;;  %v9467_v29 = vld [vmem:[#allocation88_spill] sm:$0xff] }
 0x200   : > { %v1442_v14 = vsel %vm258_vm0, %v4749_v46, %v9467_v29  ;;  %v9475_v46 = vld [vmem:[#allocation90_spill] sm:$0xff] }
 0x201   : > { %v1166_v9 = vpop.permute.xlu0 %1165  ;;  %v1260_v19 = vpop.permute.xlu1 %1259  ;;  %v1475_v25 = vsel %vm1459_vm5, %v1442_v14, %v9471_v28 }
 0x202   : > { %v1637_v1 = vsel %vm1624_vm10, %v1604_v22, %v1260_v19  ;;  %v1605_v53 = vsel %vm1591_vm9, %v1572_v55, %v1166_v9  ;;  %v9469_v9 = vld [vmem:[#allocation106_spill] sm:$0xff]  ;;  %v1508_v11 = vsel %vm1492_vm6, %v1475_v25, %v5874_v30 }
 0x203   : > { %1191 = vrot.lane.b32.xlu0 %v6332_v21, %s4799_s14  ;;  %1193 = vrot.lane.b32.xlu1 %v6336_v31, %s4799_s14  ;;  %v636_v19 = vrot.slane %v9469_v9, 1  ;;  %v641_v55 = vrot.slane %v9469_v9, 2 }
 0x205   : > { %v1262_v23 = vpop.permute.xlu0 %1261  ;;  %v1356_v15 = vpop.permute.xlu1 %1355  ;;  %v638_v30 = vsel %vm471_vm2, %v636_v19, %v637_v5 }
 0x206   : > { %v1670_v35 = vsel %vm1657_vm11, %v1637_v1, %v1356_v15  ;;  %v1638_v61 = vsel %vm1624_vm10, %v1605_v53, %v1262_v23  ;;  %v1541_v1 = vsel %vm1525_vm7, %v1508_v11, %v6002_v43  ;;  %v642_v43 = vrot.slane %v9470_v26, 2  ;;  %v422_v11 = vld [vmem:[#allocation2 + $0x1a8] sm:$0x3] }
 0x207   : > { %1287 = vrot.lane.b32.xlu0 %v9461_v36, %s4800_s15  ;;  %1003 = vrot.lane.b32.xlu1 %v9461_v36, %s4797_s27 }
 0x208   : > { %4600 = vmatprep.mubr.msk.f32.mxu0 %vm1702_vm12, %v1670_v35  ;;  %v639_v35 = vrot.slane %v419_v50, 1  ;;  %v645_v19 = vsel %vm552_vm3, %v642_v43, %v644_v62 }
 0x209   : > { %v1072_v3 = vpop.permute.xlu0 %1071  ;;  %v1358_v48 = vpop.permute.xlu1 %1357 }
 0x20a   : > { %v1671_v37 = vsel %vm1657_vm11, %v1638_v61, %v1358_v48  ;;  %v1573_v39 = vsel %vm1558_vm8, %v1540_v8, %v1072_v3  ;;  %v640_v48 = vsel %vm471_vm2, %v637_v5, %v639_v35  ;;  %v4751_v8 = vld [vmem:[#allocation2 + $0xc8] sm:$0xff]  ;;  %v421_v5 = vld [vmem:[#allocation2 + $0x1a0] sm:$0xff] }
 0x20b   : > { %1289 = vrot.lane.b32.xlu0 %v9462_v42, %s4800_s15  ;;  %1383 = vrot.lane.b32.xlu1 %v9463_v40, %s4801_s16  ;;  %v1444_v29 = vsel %vm258_vm0, %v4751_v8, %v9475_v46  ;;  %v9480_v8 = vld [vmem:[#allocation39_spill] sm:$0xff] }
 0x20c   : > { %4601 = vmatmul.mubr.msk.f32.gmra.mrb[12].mxu0 %vm1702_vm12, %v1671_v37  ;;  %v643_v37 = vsel %vm552_vm3, %v641_v55, %v642_v43 }
 0x20d   : > { %v1074_v33 = vpop.permute.xlu0 %1073  ;;  %v1168_v54 = vpop.permute.xlu1 %1167 }
 0x20e   : > { %v1606_v56 = vsel %vm1591_vm9, %v1573_v39, %v1168_v54  ;;  %v1574_v15 = vsel %vm1558_vm8, %v1541_v1, %v1074_v33  ;;  %v4750_v33 = vld [vmem:[#allocation2 + $0xc0] sm:$0xff]  ;;  %v650_v1 = vrot.slane %v421_v5, 1 }
 0x20f   : > { %1005 = vrot.lane.b32.xlu0 %v9462_v42, %s4797_s27  ;;  %1099 = vrot.lane.b32.xlu1 %v9463_v40, %s4798_s11  ;;  %v9472_v54 = vld [vmem:[#allocation89_spill] sm:$0xff] }
 0x210   : > { %v1443_v13 = vsel %vm258_vm0, %v4750_v33, %v9472_v54  ;;  %v9476_v39 = vld [vmem:[#allocation37_spill] sm:$0xff] }
 0x211   : > { %v1170_v16 = vpop.permute.xlu0 %1169  ;;  %v1264_v34 = vpop.permute.xlu1 %1263  ;;  %v1476_v7 = vsel %vm1459_vm5, %v1443_v13, %v9473_v38 }
 0x212   : > { %v1639_v0 = vsel %vm1624_vm10, %v1606_v56, %v1264_v34  ;;  %v1607_v6 = vsel %vm1591_vm9, %v1574_v15, %v1170_v16  ;;  %v1509_v47 = vsel %vm1492_vm6, %v1476_v7, %v9474_v32 }
 0x213   : > { %1385 = vrot.lane.b32.xlu0 %v9468_v49, %s4801_s16  ;;  %1101 = vrot.lane.b32.xlu1 %v9468_v49, %s4798_s11  ;;  %v1542_v34 = vsel %vm1525_vm7, %v1509_v47, %v6008_v17  ;;  %v1477_v49 = vsel %vm1459_vm5, %v1444_v29, %v9476_v39  ;;  %v4753_v47 = vld [vmem:[#allocation2 + $0xe0] sm:$0xff] }
 0x214   : > { %v1510_v17 = vsel %vm1492_vm6, %v1477_v49, %v5882_v58 }
 0x215   : > { %v1266_v2 = vpop.permute.xlu0 %1265  ;;  %v1360_v22 = vpop.permute.xlu1 %1359 }
 0x216   : > { %v1672_v23 = vsel %vm1657_vm11, %v1639_v0, %v1360_v22  ;;  %v1640_v36 = vsel %vm1624_vm10, %v1607_v6, %v1266_v2  ;;  %v1543_v0 = vsel %vm1525_vm7, %v1510_v17, %v6010_v52 }
 0x217   : > { %1195 = vrot.lane.b32.xlu0 %v9469_v9, %s4799_s14  ;;  %1197 = vrot.lane.b32.xlu1 %v9470_v26, %s4799_s14  ;;  %v420_v26 = vld [vmem:[#allocation2 + $0x198] sm:$0xff] }
 0x218   : > { %4603 = vmatprep.mubr.msk.f32.mxu0 %vm1702_vm12, %v1672_v23  ;;  %v649_v50 = vrot.slane %v420_v26, 1  ;;  %v652_v23 = vrot.slane %v422_v11, 1  ;;  %v654_v43 = vrot.slane %v420_v26, 2 }
 0x219   : > { %v1076_v53 = vpop.permute.xlu0 %1075  ;;  %v1362_v61 = vpop.permute.xlu1 %1361 }
 0x21a   : > { %v1673_v3 = vsel %vm1657_vm11, %v1640_v36, %v1362_v61  ;;  %v1575_v14 = vsel %vm1558_vm8, %v1542_v34, %v1076_v53  ;;  %v651_v35 = vsel %vm471_vm2, %v649_v50, %v650_v1  ;;  %v653_v55 = vsel %vm471_vm2, %v650_v1, %v652_v23  ;;  %v9483_v50 = vld [vmem:[#allocation122_spill] sm:$0xff] }
 0x21b   : > { %1291 = vrot.lane.b32.xlu0 %v638_v30, %s4800_s15  ;;  %1007 = vrot.lane.b32.xlu1 %v638_v30, %s4797_s27  ;;  %v655_v36 = vrot.slane %v421_v5, 2  ;;  %v657_v53 = vrot.slane %v422_v11, 2  ;;  %v4754_v11 = vld [vmem:[#allocation2 + $0xf0] sm:$0xff] }
 0x21c   : > { %4604 = vmatmul.mubr.msk.f32.gmra.mrb[14].mxu0 %vm1702_vm12, %v1673_v3 }
 0x21d   : > { %v1078_v42 = vpop.permute.xlu0 %1077  ;;  %v1172_v40 = vpop.permute.xlu1 %1171  ;;  %v656_v54 = vsel %vm552_vm3, %v654_v43, %v655_v36  ;;  %v658_v13 = vsel %vm552_vm3, %v655_v36, %v657_v53  ;;  %v9486_v53 = vld [vmem:[#allocation123_spill] sm:$0xff] }
 0x21e   : > { %v1608_v9 = vsel %vm1591_vm9, %v1575_v14, %v1172_v40  ;;  %v1576_v22 = vsel %vm1558_vm8, %v1543_v0, %v1078_v42  ;;  %v9478_v40 = vld [vmem:[#allocation38_spill] sm:$0xff] }
 0x21f   : > { %1293 = vrot.lane.b32.xlu0 %v640_v48, %s4800_s15  ;;  %1387 = vrot.lane.b32.xlu1 %v643_v37, %s4801_s16 }
 0x221   : > { %v1174_v20 = vpop.permute.xlu0 %1173  ;;  %v1268_v16 = vpop.permute.xlu1 %1267 }
 0x222   : > { %v1641_v28 = vsel %vm1624_vm10, %v1608_v9, %v1268_v16  ;;  %v1609_v58 = vsel %vm1591_vm9, %v1576_v22, %v1174_v20  ;;  %v9479_v20 = vld [vmem:[#allocation92_spill] sm:$0xff] }
 0x223   : > { %1009 = vrot.lane.b32.xlu0 %v640_v48, %s4797_s27  ;;  %1103 = vrot.lane.b32.xlu1 %v643_v37, %s4798_s11  ;;  %v4752_v48 = vld [vmem:[#allocation2 + $0xd8] sm:$0xff]  ;;  %v9477_v37 = vld [vmem:[#allocation91_spill] sm:$0xff]  ;;  %v1446_v16 = vsel %vm258_vm0, %v4753_v47, %v9479_v20  ;;  %v9488_v20 = vld [vmem:[#allocation42_spill] sm:$0xff] }
 0x224   : > { %v1445_v42 = vsel %vm258_vm0, %v4752_v48, %v9477_v37  ;;  %v1479_v46 = vsel %vm1459_vm5, %v1446_v16, %v9480_v8  ;;  %v9487_v47 = vld [vmem:[#allocation95_spill] sm:$0xff] }
 0x225   : > { %v1270_v25 = vpop.permute.xlu0 %1269  ;;  %v1364_v56 = vpop.permute.xlu1 %1363  ;;  %v1478_v33 = vsel %vm1459_vm5, %v1445_v42, %v9478_v40  ;;  %v1512_v29 = vsel %vm1492_vm6, %v1479_v46, %v5890_v63 }
 0x226   : > { %v1674_v2 = vsel %vm1657_vm11, %v1641_v28, %v1364_v56  ;;  %v1642_v15 = vsel %vm1624_vm10, %v1609_v58, %v1270_v25  ;;  %v1511_v38 = vsel %vm1492_vm6, %v1478_v33, %v5888_v57  ;;  %v1545_v49 = vsel %vm1525_vm7, %v1512_v29, %v6018_v41  ;;  %v9481_v41 = vld [vmem:[#allocation93_spill] sm:$0xff]  ;;  %v9490_v29 = vld [vmem:[#allocation60_spill] sm:$0xff] }
 0x227   : > { %1389 = vrot.lane.b32.xlu0 %v645_v19, %s4801_s16  ;;  %1105 = vrot.lane.b32.xlu1 %v645_v19, %s4798_s11  ;;  %v1544_v32 = vsel %vm1525_vm7, %v1511_v38, %v6016_v4  ;;  %v1447_v0 = vsel %vm258_vm0, %v4754_v11, %v9481_v41  ;;  %v9494_v41 = vld [vmem:[#allocation61_spill] sm:$0xff] }
 0x228   : > { %4606 = vmatprep.mubr.msk.f32.mxu0 %vm1702_vm12, %v1674_v2  ;;  %v9482_v2 = vld [vmem:[#allocation40_spill] sm:$0xff] }
 0x229   : > { %v1080_v30 = vpop.permute.xlu0 %1079  ;;  %v1366_v6 = vpop.permute.xlu1 %1365  ;;  %v1480_v22 = vsel %vm1459_vm5, %v1447_v0, %v9482_v2 }
 0x22a   : > { %v1675_v52 = vsel %vm1657_vm11, %v1642_v15, %v1366_v6  ;;  %v1577_v34 = vsel %vm1558_vm8, %v1544_v32, %v1080_v30  ;;  %v1513_v1 = vsel %vm1492_vm6, %v1480_v22, %v9483_v50  ;;  %v4755_v30 = vld [vmem:[#allocation2 + $0xf8] sm:$0xff]  ;;  %v9484_v6 = vld [vmem:[#allocation94_spill] sm:$0xff] }
 0x22b   : > { %1199 = vrot.lane.b32.xlu0 %v420_v26, %s4799_s14  ;;  %1201 = vrot.lane.b32.xlu1 %v421_v5, %s4799_s14  ;;  %v1546_v15 = vsel %vm1525_vm7, %v1513_v1, %v6024_v27 }
 0x22c   : > { %4607 = vmatmul.mubr.msk.f32.gmra.mrb[16].mxu0 %vm1702_vm12, %v1675_v52  ;;  %v1448_v52 = vsel %vm258_vm0, %v4755_v30, %v9484_v6  ;;  %v9495_v30 = vld [vmem:[#allocation97_spill] sm:$0xff] }
 0x22d   : > { %v1082_v61 = vpop.permute.xlu0 %1081  ;;  %v1176_v3 = vpop.permute.xlu1 %1175  ;;  %v1451_v6 = vsel %vm258_vm0, %v6176_v59, %v9495_v30 }
 0x22e   : > { %v1610_v57 = vsel %vm1591_vm9, %v1577_v34, %v1176_v3  ;;  %v1578_v19 = vsel %vm1558_vm8, %v1545_v49, %v1082_v61  ;;  %v9489_v34 = vld [vmem:[#allocation124_spill] sm:$0xff] }
 0x22f   : > { %1295 = vrot.lane.b32.xlu0 %v651_v35, %s4800_s15  ;;  %1297 = vrot.lane.b32.xlu1 %v653_v55, %s4800_s15  ;;  %v9485_v55 = vld [vmem:[#allocation41_spill] sm:$0xff] }
 0x230   : > { %v1481_v43 = vsel %vm1459_vm5, %v1448_v52, %v9485_v55  ;;  %v9496_v52 = vld [vmem:[#allocation44_spill] sm:$0xff]  ;;  %v9497_v55 = vld [vmem:[#allocation126_spill] sm:$0xff] }
 0x231   : > { %v1178_v7 = vpop.permute.xlu0 %1177  ;;  %v1272_v62 = vpop.permute.xlu1 %1271  ;;  %v1514_v61 = vsel %vm1492_vm6, %v1481_v43, %v9486_v53 }
 0x232   : > { %v1643_v4 = vsel %vm1624_vm10, %v1610_v57, %v1272_v62  ;;  %v1611_v26 = vsel %vm1591_vm9, %v1578_v19, %v1178_v7  ;;  %v1547_v27 = vsel %vm1525_vm7, %v1514_v61, %v6026_v24  ;;  %v1449_v24 = vsel %vm258_vm0, %v6130_v18, %v9487_v47  ;;  %v9498_v61 = vld [vmem:[#allocation62_spill] sm:$0xff] }
 0x233   : > { %1391 = vrot.lane.b32.xlu0 %v656_v54, %s4801_s16  ;;  %1393 = vrot.lane.b32.xlu1 %v658_v13, %s4801_s16  ;;  %v1482_v16 = vsel %vm1459_vm5, %v1449_v24, %v9488_v20 }
 0x234   : > { %v1515_v8 = vsel %vm1492_vm6, %v1482_v16, %v9489_v34 }
 0x235   : > { %v1274_v14 = vpop.permute.xlu0 %1273  ;;  %v1368_v39 = vpop.permute.xlu1 %1367 }
 0x236   : > { %v1676_v9 = vsel %vm1657_vm11, %v1643_v4, %v1368_v39  ;;  %v1644_v5 = vsel %vm1624_vm10, %v1611_v26, %v1274_v14  ;;  %v1548_v4 = vsel %vm1525_vm7, %v1515_v8, %v9490_v29  ;;  %v9491_v26 = vld [vmem:[#allocation96_spill] sm:$0xff] }
 0x237   : > { %4609 = vmatprep.mubr.msk.f32.mxu0 %vm1702_vm12, %v1676_v9 }
 0x239   : > { %v1084_v17 = vpop.permute.xlu0 %1083  ;;  %v1370_v28 = vpop.permute.xlu1 %1369 }
 0x23a   : > { %v1677_v63 = vsel %vm1657_vm11, %v1644_v5, %v1370_v28  ;;  %v1579_v35 = vsel %vm1558_vm8, %v1546_v15, %v1084_v17  ;;  %v1450_v5 = vsel %vm258_vm0, %v6137_v44, %v9491_v26  ;;  %v9492_v17 = vld [vmem:[#allocation43_spill] sm:$0xff] }
 0x23b   : > { %4610 = vmatmul.mubr.msk.f32.gmra.mrb[18].mxu0 %vm1702_vm12, %v1677_v63  ;;  %v1483_v28 = vsel %vm1459_vm5, %v1450_v5, %v9492_v17  ;;  %v9493_v63 = vld [vmem:[#allocation125_spill] sm:$0xff] }
 0x23d   : > { %v1086_v25 = vpop.permute.xlu0 %1085  ;;  %v1180_v56 = vpop.permute.xlu1 %1179 }
 0x23e   : > { %v1612_v36 = vsel %vm1591_vm9, %v1579_v35, %v1180_v56  ;;  %v1580_v40 = vsel %vm1558_vm8, %v1547_v27, %v1086_v25  ;;  %v1516_v25 = vsel %vm1492_vm6, %v1483_v28, %v9493_v63  ;;  %v1484_v35 = vsel %vm1459_vm5, %v1451_v6, %v9496_v52 }
 0x23f   : > { %v1549_v0 = vsel %vm1525_vm7, %v1516_v25, %v9494_v41  ;;  %v1517_v43 = vsel %vm1492_vm6, %v1484_v35, %v9497_v55 }
 0x241   : > { %v1182_v58 = vpop.permute.xlu0 %1181  ;;  %v1276_v23 = vpop.permute.xlu1 %1275 }
 0x242   : > { %v1645_v3 = vsel %vm1624_vm10, %v1612_v36, %v1276_v23  ;;  %v1613_v33 = vsel %vm1591_vm9, %v1580_v40, %v1182_v58 }
 0x245   : > { %v1278_v48 = vpop.permute.xlu0 %1277  ;;  %v1372_v37 = vpop.permute.xlu1 %1371 }
 0x246   : > { %v1678_v42 = vsel %vm1657_vm11, %v1645_v3, %v1372_v37  ;;  %v1646_v54 = vsel %vm1624_vm10, %v1613_v33, %v1278_v48  ;;  %v1550_v3 = vsel %vm1525_vm7, %v1517_v43, %v9498_v61  ;;  %v9499_v33 = vld [vmem:[#allocation98_spill] sm:$0xff] }
 0x247   : > { %4612 = vmatprep.mubr.msk.f32.mxu0 %vm1702_vm12, %v1678_v42 }
 0x249   : > { %v1088_v13 = vpop.permute.xlu0 %1087  ;;  %v1374_v38 = vpop.permute.xlu1 %1373 }
 0x24a   : > { %v1679_v7 = vsel %vm1657_vm11, %v1646_v54, %v1374_v38  ;;  %v1581_v14 = vsel %vm1558_vm8, %v1548_v4, %v1088_v13  ;;  %v1452_v54 = vsel %vm258_vm0, %v6183_v12, %v9499_v33  ;;  %v9500_v13 = vld [vmem:[#allocation45_spill] sm:$0xff]  ;;  %v9502_v4 = vld [vmem:[#allocation99_spill] sm:$0xff] }
 0x24b   : > { %4613 = vmatmul.mubr.msk.f32.gmra.mrb[20].mxu0 %vm1702_vm12, %v1679_v7  ;;  %v1485_v38 = vsel %vm1459_vm5, %v1452_v54, %v9500_v13  ;;  %v9501_v7 = vld [vmem:[#allocation127_spill] sm:$0xff] }
 0x24d   : > { %v1090_v62 = vpop.permute.xlu0 %1089  ;;  %v1184_v32 = vpop.permute.xlu1 %1183 }
 0x24e   : > { %v1614_v39 = vsel %vm1591_vm9, %v1581_v14, %v1184_v32  ;;  %v1582_v2 = vsel %vm1558_vm8, %v1549_v0, %v1090_v62  ;;  %v1518_v62 = vsel %vm1492_vm6, %v1485_v38, %v9501_v7  ;;  %v1453_v14 = vsel %vm258_vm0, %v6222_v45, %v9502_v4 }
 0x251   : > { %v1186_v46 = vpop.permute.xlu0 %1185  ;;  %v1280_v57 = vpop.permute.xlu1 %1279 }
 0x252   : > { %v1647_v49 = vsel %vm1624_vm10, %v1614_v39, %v1280_v57  ;;  %v1615_v22 = vsel %vm1591_vm9, %v1582_v2, %v1186_v46  ;;  %v9503_v39 = vld [vmem:[#allocation46_spill] sm:$0xff]  ;;  %v9506_v2 = vld [vmem:[#allocation117_spill] sm:$0xff] }
 0x255   : > { %v1282_v9 = vpop.permute.xlu0 %1281  ;;  %v1376_v19 = vpop.permute.xlu1 %1375 }
 0x256   : > { %v1680_v18 = vsel %vm1657_vm11, %v1647_v49, %v1376_v19  ;;  %v1648_v50 = vsel %vm1624_vm10, %v1615_v22, %v1282_v9  ;;  %v1486_v49 = vsel %vm1459_vm5, %v1453_v14, %v9503_v39  ;;  %v9504_v9 = vld [vmem:[#allocation128_spill] sm:$0xff] }
 0x257   : > { %4615 = vmatprep.mubr.msk.f32.mxu0 %vm1702_vm12, %v1680_v18  ;;  %v1519_v19 = vsel %vm1492_vm6, %v1486_v49, %v9504_v9 }
 0x259   : > { %v998_v56 = vpop.permute.xlu0 %997  ;;  %v1092_v11 = vpop.permute.xlu1 %1091 }
 0x25a   : > { %v1583_v48 = vsel %vm1558_vm8, %v1550_v3, %v1092_v11  ;;  %v1551_v24 = vsel %vm1525_vm7, %v1518_v62, %v998_v56  ;;  %v9505_v11 = vld [vmem:[#allocation100_spill] sm:$0xff]  ;;  %v9509_v3 = vld [vmem:[#allocation118_spill] sm:$0xff] }
 0x25b   : > { %v1454_v41 = vsel %vm258_vm0, %v6229_v60, %v9505_v11 }
 0x25c   : > { %v1487_v22 = vsel %vm1459_vm5, %v1454_v41, %v9506_v2  ;;  %v9518_v41 = vld [vmem:[#allocation132_spill] sm:$0xff] }
 0x25d   : > { %v1378_v44 = vpop.permute.xlu0 %1377  ;;  %v1094_v1 = vpop.permute.xlu1 %1093 }
 0x25e   : > { %v1681_v58 = vsel %vm1657_vm11, %v1648_v50, %v1378_v44  ;;  %v1584_v20 = vsel %vm1558_vm8, %v1551_v24, %v1094_v1  ;;  %v9507_v44 = vld [vmem:[#allocation129_spill] sm:$0xff] }
 0x25f   : > { %4616 = vmatmul.mubr.msk.f32.gmra.mrb[22].mxu0 %vm1702_vm12, %v1681_v58  ;;  %v1520_v1 = vsel %vm1492_vm6, %v1487_v22, %v9507_v44  ;;  %v9519_v22 = vld [vmem:[#allocation133_spill] sm:$0xff] }
 0x261   : > { %v1188_v23 = vpop.permute.xlu0 %1187  ;;  %v1190_v15 = vpop.permute.xlu1 %1189 }
 0x262   : > { %v1616_v37 = vsel %vm1591_vm9, %v1583_v48, %v1188_v23  ;;  %v1617_v16 = vsel %vm1591_vm9, %v1584_v20, %v1190_v15  ;;  %v9512_v20 = vld [vmem:[#allocation119_spill] sm:$0xff] }
 0x265   : > { %v1284_v36 = vpop.permute.xlu0 %1283  ;;  %v1000_v53 = vpop.permute.xlu1 %999 }
 0x266   : > { %v1649_v27 = vsel %vm1624_vm10, %v1616_v37, %v1284_v36  ;;  %v1552_v5 = vsel %vm1525_vm7, %v1519_v19, %v1000_v53  ;;  %v9508_v53 = vld [vmem:[#allocation101_spill] sm:$0xff]  ;;  %v9510_v37 = vld [vmem:[#allocation130_spill] sm:$0xff] }
 0x267   : > { %v1455_v61 = vsel %vm258_vm0, %v6273_v51, %v9508_v53 }
 0x268   : > { %v1488_v48 = vsel %vm1459_vm5, %v1455_v61, %v9509_v3 }
 0x269   : > { %v1286_v42 = vpop.permute.xlu0 %1285  ;;  %v1380_v40 = vpop.permute.xlu1 %1379 }
 0x26a   : > { %v1682_v59 = vsel %vm1657_vm11, %v1649_v27, %v1380_v40  ;;  %v1650_v34 = vsel %vm1624_vm10, %v1617_v16, %v1286_v42  ;;  %v1521_v27 = vsel %vm1492_vm6, %v1488_v48, %v9510_v37 }
 0x26b   : > { %4618 = vmatprep.mubr.msk.f32.mxu0 %vm1702_vm12, %v1682_v59 }
 0x26d   : > { %v1002_v32 = vpop.permute.xlu0 %1001  ;;  %v1096_v47 = vpop.permute.xlu1 %1095 }
 0x26e   : > { %v1585_v17 = vsel %vm1558_vm8, %v1552_v5, %v1096_v47  ;;  %v1553_v15 = vsel %vm1525_vm7, %v1520_v1, %v1002_v32  ;;  %v9511_v47 = vld [vmem:[#allocation102_spill] sm:$0xff]  ;;  %v9515_v5 = vld [vmem:[#allocation104_spill] sm:$0xff] }
 0x26f   : > { %v1456_v24 = vsel %vm258_vm0, %v6277_v10, %v9511_v47 }
 0x270   : > { %v1489_v16 = vsel %vm1459_vm5, %v1456_v24, %v9512_v20 }
 0x271   : > { %v1382_v8 = vpop.permute.xlu0 %1381  ;;  %v1098_v12 = vpop.permute.xlu1 %1097 }
 0x272   : > { %v1683_v46 = vsel %vm1657_vm11, %v1650_v34, %v1382_v8  ;;  %v1586_v30 = vsel %vm1558_vm8, %v1553_v15, %v1098_v12  ;;  %v9513_v34 = vld [vmem:[#allocation131_spill] sm:$0xff] }
 0x273   : > { %4619 = vmatmul.mubr.msk.f32.gmra.mrb[24].mxu0 %vm1702_vm12, %v1683_v46  ;;  %v1522_v8 = vsel %vm1492_vm6, %v1489_v16, %v9513_v34 }
 0x275   : > { %v1192_v57 = vpop.permute.xlu0 %1191  ;;  %v1194_v29 = vpop.permute.xlu1 %1193 }
 0x276   : > { %v1618_v28 = vsel %vm1591_vm9, %v1585_v17, %v1192_v57  ;;  %v1619_v60 = vsel %vm1591_vm9, %v1586_v30, %v1194_v29  ;;  %v1458_v17 = vsel %vm258_vm0, %v6336_v31, %v9515_v5 }
 0x279   : > { %v1288_v18 = vpop.permute.xlu0 %1287  ;;  %v1004_v26 = vpop.permute.xlu1 %1003 }
 0x27a   : > { %v1651_v63 = vsel %vm1624_vm10, %v1618_v28, %v1288_v18  ;;  %v1554_v59 = vsel %vm1525_vm7, %v1521_v27, %v1004_v26  ;;  %v9514_v18 = vld [vmem:[#allocation103_spill] sm:$0xff] }
 0x27b   : > { %v1457_v26 = vsel %vm258_vm0, %v6332_v21, %v9514_v18 }
 0x27d   : > { %v1290_v25 = vpop.permute.xlu0 %1289  ;;  %v1384_v56 = vpop.permute.xlu1 %1383 }
 0x27e   : > { %v1684_v45 = vsel %vm1657_vm11, %v1651_v63, %v1384_v56  ;;  %v1652_v6 = vsel %vm1624_vm10, %v1619_v60, %v1290_v25  ;;  %v9516_v63 = vld [vmem:[#allocation51_spill] sm:$0xff]  ;;  %v9517_v56 = vld [vmem:[#allocation120_spill] sm:$0xff] }
 0x27f   : > { %v6575_v0 = vpop.f32.mrb[0].mxu0  ;;  %4621 = vmatprep.mubr.msk.f32.mxu0 %vm1702_vm12, %v1684_v45  ;;  %v1490_v25 = vsel %vm1459_vm5, %v1457_v26, %v9516_v63  ;;  %v1491_v45 = vsel %vm1459_vm5, %v1458_v17, %v9517_v56 }
 0x280   : > { %v6580_v50 = vpop.f32.mrb[1].mxu0  ;;  %v1523_v2 = vsel %vm1492_vm6, %v1490_v25, %v9518_v41  ;;  %v1524_v44 = vsel %vm1492_vm6, %v1491_v45, %v9519_v22 }
 0x281   : > { %v1006_v58 = vpop.permute.xlu0 %1005  ;;  %v1100_v23 = vpop.permute.xlu1 %1099 }
 0x282   : > { %v1587_v33 = vsel %vm1558_vm8, %v1554_v59, %v1100_v23  ;;  %v1555_v57 = vsel %vm1525_vm7, %v1522_v8, %v1006_v58  ;;  %v6653_v59 = vld [vmem:[%s9053_s2] ss:$0 sm:$0xff] }
 0x285   : > { %v1386_v52 = vpop.permute.xlu0 %1385  ;;  %v1102_v35 = vpop.permute.xlu1 %1101 }
 0x286   : > { %v1685_v55 = vsel %vm1657_vm11, %v1652_v6, %v1386_v52  ;;  %v1588_v29 = vsel %vm1558_vm8, %v1555_v57, %v1102_v35 }
 0x287   : > { %4622 = vmatmul.mubr.msk.f32.gmra.mrb[26].mxu0 %vm1702_vm12, %v1685_v55 }
 0x289   : > { %v1196_v43 = vpop.permute.xlu0 %1195  ;;  %v1198_v36 = vpop.permute.xlu1 %1197 }
 0x28a   : > { %v1620_v13 = vsel %vm1591_vm9, %v1587_v33, %v1196_v43  ;;  %v1621_v4 = vsel %vm1591_vm9, %v1588_v29, %v1198_v36  ;;  %v6657_v33 = vadd.f32 %v6575_v0, %v6653_v59 }
 0x28c   : > { %v2029_v0 = vsel %vm258_vm0, %v6657_v33, 0.0 }
 0x28d   : > { %v1292_v42 = vpop.permute.xlu0 %1291  ;;  %v1008_v40 = vpop.permute.xlu1 %1007 }
 0x28e   : > { %v1653_v7 = vsel %vm1624_vm10, %v1620_v13, %v1292_v42  ;;  %v1556_v58 = vsel %vm1525_vm7, %v1523_v2, %v1008_v40 }
 0x28f   : > { %v6599_v54 = vpop.f32.mrb[2].mxu0 }
 0x290   : > { %v1879_v38 = vpop.f32.mrb[3].mxu0  ;;  %v6684_v16 = vadd.f32 %v6599_v54, %v6653_v59 }
 0x291   : > { %v1294_v51 = vpop.permute.xlu0 %1293  ;;  %v1388_v62 = vpop.permute.xlu1 %1387 }
 0x292   : > { %v1686_v32 = vsel %vm1657_vm11, %v1653_v7, %v1388_v62  ;;  %v1654_v14 = vsel %vm1624_vm10, %v1621_v4, %v1294_v51  ;;  %v6663_v7 = vadd.f32 %v6653_v59, %v6580_v50  ;;  %v6668_v62 = vadd.f32 %v6653_v59, %v1879_v38 }
 0x293   : > { %4624 = vmatprep.mubr.msk.f32.mxu0 %vm1702_vm12, %v1686_v32  ;;  %v2098_v32 = vmul.f32 %v6657_v33, %v6657_v33  ;;  %v2100_v4 = vmul.f32 %v6684_v16, %v6684_v16  ;;  %v2033_v54 = vsel %vm258_vm0, %v6684_v16, 0.0 }
 0x294   : > { %v2097_v47 = vmul.f32 %v6663_v7, %v6663_v7  ;;  %v2028_v24 = vsel %vm258_vm0, %v6663_v7, 0.0  ;;  %v2099_v50 = vmul.f32 %v6668_v62, %v6668_v62  ;;  %v2031_v34 = vsel %vm258_vm0, %v6668_v62, 0.0 }
 0x295   : > { %v1010_v12 = vpop.permute.xlu0 %1009  ;;  %v1104_v46 = vpop.permute.xlu1 %1103  ;;  %v2130_v20 = vsel %vm258_vm0, %v2098_v32, 0.0  ;;  %v2134_v26 = vsel %vm258_vm0, %v2100_v4, 0.0 }
 0x296   : > { %v1557_v31 = vsel %vm1525_vm7, %v1524_v44, %v1010_v12  ;;  %v1589_v23 = vsel %vm1558_vm8, %v1556_v58, %v1104_v46  ;;  %v2129_v38 = vsel %vm258_vm0, %v2097_v47, 0.0  ;;  %v2030_v12 = vadd.f32 %v2029_v0, %v2028_v24 }
 0x297   : > { %v2132_v46 = vsel %vm258_vm0, %v2099_v50, 0.0  ;;  %v2131_v57 = vadd.f32 %v2130_v20, %v2129_v38 }
 0x298   : > { %v2032_v29 = vadd.f32 %v2031_v34, %v2030_v12 }
 0x299   : > { %v1390_v39 = vpop.permute.xlu0 %1389  ;;  %v1106_v10 = vpop.permute.xlu1 %1105 }
 0x29a   : > { %v1687_v49 = vsel %vm1657_vm11, %v1654_v14, %v1390_v39  ;;  %v1590_v15 = vsel %vm1558_vm8, %v1557_v31, %v1106_v10  ;;  %v2133_v39 = vadd.f32 %v2132_v46, %v2131_v57 }
 0x29b   : > { %4625 = vmatmul.mubr.msk.f32.gmra.mrb[28].mxu0 %vm1702_vm12, %v1687_v49 }
 0x29c   : > { %v2135_v25 = vadd.f32 %v2134_v26, %v2133_v39 }
 0x29d   : > { %v1200_v9 = vpop.permute.xlu0 %1199  ;;  %v1202_v19 = vpop.permute.xlu1 %1201 }
 0x29e   : > { %v1622_v30 = vsel %vm1591_vm9, %v1589_v23, %v1200_v9  ;;  %v1623_v60 = vsel %vm1591_vm9, %v1590_v15, %v1202_v19  ;;  %v2034_v19 = vadd.f32 %v2033_v54, %v2032_v29 }
 0x29f   : > { %v4590_v28 = vpop.f32.mrb[4].mxu0 }
 0x2a0   : > { %v1889_v11 = vpop.f32.mrb[5].mxu0  ;;  %v6699_v10 = vadd.f32 %v4590_v28, %v6653_v59 }
 0x2a1   : > { %v1296_v1 = vpop.permute.xlu0 %1295  ;;  %v1298_v21 = vpop.permute.xlu1 %1297  ;;  %v6689_v8 = vadd.f32 %v6653_v59, %v1889_v11 }
 0x2a2   : > { %v1655_v6 = vsel %vm1624_vm10, %v1622_v30, %v1296_v1  ;;  %v1656_v52 = vsel %vm1624_vm10, %v1623_v60, %v1298_v21  ;;  %v2102_v28 = vmul.f32 %v6699_v10, %v6699_v10  ;;  %v2037_v11 = vsel %vm258_vm0, %v6699_v10, 0.0 }
 0x2a3   : > { %v2101_v14 = vmul.f32 %v6689_v8, %v6689_v8  ;;  %v2035_v49 = vsel %vm258_vm0, %v6689_v8, 0.0 }
 0x2a4   : > { %v2036_v63 = vadd.f32 %v2035_v49, %v2034_v19  ;;  %v2138_v1 = vsel %vm258_vm0, %v2102_v28, 0.0 }
 0x2a5   : > { %v1392_v35 = vpop.permute.xlu0 %1391  ;;  %v1394_v55 = vpop.permute.xlu1 %1393  ;;  %v2136_v5 = vsel %vm258_vm0, %v2101_v14, 0.0 }
 0x2a6   : > { %v1688_v43 = vsel %vm1657_vm11, %v1655_v6, %v1392_v35  ;;  %v1689_v36 = vsel %vm1657_vm11, %v1656_v52, %v1394_v55  ;;  %v2137_v45 = vadd.f32 %v2136_v5, %v2135_v25  ;;  %v2038_v44 = vadd.f32 %v2037_v11, %v2036_v63 }
 0x2a7   : > { %4627 = vmatprep.mubr.msk.f32.mxu0 %vm1702_vm12, %v1688_v43 }
 0x2a8   : > { %4628 = vmatmul.mubr.msk.f32.gmra.mrb[30].mxu0 %vm1702_vm12, %v1689_v36  ;;  %v2139_v31 = vadd.f32 %v2138_v1, %v2137_v45 }
 0x2af   : > { %v4593_v53 = vpop.f32.mrb[6].mxu0 }
 0x2b0   : > { %v1899_v61 = vpop.f32.mrb[7].mxu0  ;;  %v6717_v41 = vadd.f32 %v4593_v53, %v6653_v59 }
 0x2b1   : > { %v6704_v9 = vadd.f32 %v6653_v59, %v1899_v61 }
 0x2b2   : > { %v2104_v23 = vmul.f32 %v6717_v41, %v6717_v41  ;;  %v2041_v60 = vsel %vm258_vm0, %v6717_v41, 0.0 }
 0x2b3   : > { %v2103_v56 = vmul.f32 %v6704_v9, %v6704_v9  ;;  %v2039_v2 = vsel %vm258_vm0, %v6704_v9, 0.0 }
 0x2b4   : > { %v2040_v58 = vadd.f32 %v2039_v2, %v2038_v44  ;;  %v2142_v43 = vsel %vm258_vm0, %v2104_v23, 0.0 }
 0x2b5   : > { %v2140_v21 = vsel %vm258_vm0, %v2103_v56, 0.0 }
 0x2b6   : > { %v2141_v30 = vadd.f32 %v2140_v21, %v2139_v31  ;;  %v2042_v55 = vadd.f32 %v2041_v60, %v2040_v58 }
 0x2b8   : > { %v2143_v61 = vadd.f32 %v2142_v43, %v2141_v30 }
 0x2bf   : > { %v4596_v3 = vpop.f32.mrb[8].mxu0 }
 0x2c0   : > { %v1909_v48 = vpop.f32.mrb[9].mxu0  ;;  %v6733_v6 = vadd.f32 %v4596_v3, %v6653_v59 }
 0x2c1   : > { %v6722_v22 = vadd.f32 %v6653_v59, %v1909_v48 }
 0x2c2   : > { %v2106_v48 = vmul.f32 %v6733_v6, %v6733_v6 }
 0x2c3   : > { %v2105_v15 = vmul.f32 %v6722_v22, %v6722_v22  ;;  %v2043_v52 = vsel %vm258_vm0, %v6722_v22, 0.0 }
 0x2c4   : > { %v2044_v53 = vadd.f32 %v2043_v52, %v2042_v55  ;;  %v2146_v34 = vsel %vm258_vm0, %v2106_v48, 0.0 }
 0x2c5   : > { %v2144_v36 = vsel %vm258_vm0, %v2105_v15, 0.0 }
 0x2c6   : > { %v2145_v47 = vadd.f32 %v2144_v36, %v2143_v61 }
 0x2c8   : > { %v2147_v57 = vadd.f32 %v2146_v34, %v2145_v47 }
 0x2cf   : > { %v6644_v37 = vpop.f32.mrb[10].mxu0 }
 0x2d0   : > { %v1919_v27 = vpop.f32.mrb[11].mxu0  ;;  %v6750_v24 = vadd.f32 %v6644_v37, %v6653_v59 }
 0x2d1   : > { %v6738_v35 = vadd.f32 %v6653_v59, %v1919_v27  ;;  %v2045_v27 = vsel %vm258_vm0, %v6733_v6, 0.0 }
 0x2d2   : > { %v2046_v38 = vadd.f32 %v2045_v27, %v2044_v53  ;;  %v2108_v29 = vmul.f32 %v6750_v24, %v6750_v24  ;;  %v2049_v14 = vsel %vm258_vm0, %v6750_v24, 0.0 }
 0x2d3   : > { %v2107_v3 = vmul.f32 %v6738_v35, %v6738_v35  ;;  %v2047_v50 = vsel %vm258_vm0, %v6738_v35, 0.0 }
 0x2d4   : > { %v2048_v46 = vadd.f32 %v2047_v50, %v2046_v38  ;;  %v2150_v19 = vsel %vm258_vm0, %v2108_v29, 0.0 }
 0x2d5   : > { %v2148_v12 = vsel %vm258_vm0, %v2107_v3, 0.0 }
 0x2d6   : > { %v2149_v4 = vadd.f32 %v2148_v12, %v2147_v57  ;;  %v2050_v49 = vadd.f32 %v2049_v14, %v2048_v46 }
 0x2d8   : > { %v2151_v63 = vadd.f32 %v2150_v19, %v2149_v4 }
 0x2df   : > { %v6646_v42 = vpop.f32.mrb[12].mxu0 }
 0x2e0   : > { %v6648_v40 = vpop.f32.mrb[13].mxu0 }
 0x2e1   : > { %v6756_v20 = vadd.f32 %v6653_v59, %v6648_v40  ;;  %v6768_v40 = vadd.f32 %v6646_v42, %v6653_v59 }
 0x2e3   : > { %v2109_v37 = vmul.f32 %v6756_v20, %v6756_v20  ;;  %v2051_v39 = vsel %vm258_vm0, %v6756_v20, 0.0  ;;  %v2110_v25 = vmul.f32 %v6768_v40, %v6768_v40  ;;  %v2053_v56 = vsel %vm258_vm0, %v6768_v40, 0.0 }
 0x2e4   : > { %v2052_v5 = vadd.f32 %v2051_v39, %v2050_v49 }
 0x2e5   : > { %v2152_v26 = vsel %vm258_vm0, %v2109_v37, 0.0  ;;  %v2154_v44 = vsel %vm258_vm0, %v2110_v25, 0.0 }
 0x2e6   : > { %v2153_v28 = vadd.f32 %v2152_v26, %v2151_v63  ;;  %v2054_v2 = vadd.f32 %v2053_v56, %v2052_v5 }
 0x2e8   : > { %v2155_v31 = vadd.f32 %v2154_v44, %v2153_v28 }
 0x2ef   : > { %v6659_v13 = vpop.f32.mrb[14].mxu0 }
 0x2f0   : > { %v6665_v51 = vpop.f32.mrb[15].mxu0 }
 0x2f1   : > { %v6774_v54 = vadd.f32 %v6653_v59, %v6665_v51  ;;  %v6786_v51 = vadd.f32 %v6659_v13, %v6653_v59 }
 0x2f3   : > { %v2111_v42 = vmul.f32 %v6774_v54, %v6774_v54  ;;  %v2055_v45 = vsel %vm258_vm0, %v6774_v54, 0.0  ;;  %v2112_v15 = vmul.f32 %v6786_v51, %v6786_v51 }
 0x2f4   : > { %v2056_v58 = vadd.f32 %v2055_v45, %v2054_v2 }
 0x2f5   : > { %v2156_v1 = vsel %vm258_vm0, %v2111_v42, 0.0  ;;  %v2158_v36 = vsel %vm258_vm0, %v2112_v15, 0.0 }
 0x2f6   : > { %v2157_v30 = vadd.f32 %v2156_v1, %v2155_v31 }
 0x2f8   : > { %v2159_v48 = vadd.f32 %v2158_v36, %v2157_v30 }
 0x2ff   : > { %v6706_v18 = vpop.f32.mrb[16].mxu0 }
 0x300   : > { %v1949_v17 = vpop.f32.mrb[17].mxu0  ;;  %v6803_v60 = vadd.f32 %v6706_v18, %v6653_v59 }
 0x301   : > { %v6791_v11 = vadd.f32 %v6653_v59, %v1949_v17  ;;  %v2057_v17 = vsel %vm258_vm0, %v6786_v51, 0.0 }
 0x302   : > { %v2058_v43 = vadd.f32 %v2057_v17, %v2056_v58  ;;  %v2114_v3 = vmul.f32 %v6803_v60, %v6803_v60  ;;  %v2061_v27 = vsel %vm258_vm0, %v6803_v60, 0.0 }
 0x303   : > { %v2113_v13 = vmul.f32 %v6791_v11, %v6791_v11  ;;  %v2059_v52 = vsel %vm258_vm0, %v6791_v11, 0.0 }
 0x304   : > { %v2060_v61 = vadd.f32 %v2059_v52, %v2058_v43  ;;  %v2162_v12 = vsel %vm258_vm0, %v2114_v3, 0.0 }
 0x305   : > { %v2160_v53 = vsel %vm258_vm0, %v2113_v13, 0.0 }
 0x306   : > { %v2161_v47 = vadd.f32 %v2160_v53, %v2159_v48  ;;  %v2062_v34 = vadd.f32 %v2061_v27, %v2060_v61 }
 0x308   : > { %v2163_v29 = vadd.f32 %v2162_v12, %v2161_v47 }
 0x30e   : > { %v4611_v32 = vpop.f32.mrb[18].mxu0 }
 0x30f   : > { %v1959_v0 = vpop.f32.mrb[19].mxu0 }
 0x310   : > { %v6808_v55 = vadd.f32 %v6653_v59, %v1959_v0  ;;  %v6819_v0 = vadd.f32 %v4611_v32, %v6653_v59 }
 0x312   : > { %v2115_v18 = vmul.f32 %v6808_v55, %v6808_v55  ;;  %v2063_v50 = vsel %vm258_vm0, %v6808_v55, 0.0  ;;  %v2116_v37 = vmul.f32 %v6819_v0, %v6819_v0  ;;  %v2065_v14 = vsel %vm258_vm0, %v6819_v0, 0.0 }
 0x313   : > { %v2064_v57 = vadd.f32 %v2063_v50, %v2062_v34 }
 0x314   : > { %v2164_v46 = vsel %vm258_vm0, %v2115_v18, 0.0  ;;  %v2166_v26 = vsel %vm258_vm0, %v2116_v37, 0.0 }
 0x315   : > { %v2165_v4 = vadd.f32 %v2164_v46, %v2163_v29  ;;  %v2066_v19 = vadd.f32 %v2065_v14, %v2064_v57 }
 0x317   : > { %v2167_v25 = vadd.f32 %v2166_v26, %v2165_v4 }
 0x31e   : > { %v4614_v21 = vpop.f32.mrb[20].mxu0 }
 0x31f   : > { %v1969_v23 = vpop.f32.mrb[21].mxu0  ;;  %v6835_v39 = vadd.f32 %v4614_v21, %v6653_v59 }
 0x320   : > { %v6824_v38 = vadd.f32 %v6653_v59, %v1969_v23 }
 0x321   : > { %v2118_v42 = vmul.f32 %v6835_v39, %v6835_v39  ;;  %v2069_v44 = vsel %vm258_vm0, %v6835_v39, 0.0 }
 0x322   : > { %v2117_v32 = vmul.f32 %v6824_v38, %v6824_v38  ;;  %v2067_v49 = vsel %vm258_vm0, %v6824_v38, 0.0 }
 0x323   : > { %v2068_v63 = vadd.f32 %v2067_v49, %v2066_v19  ;;  %v2170_v58 = vsel %vm258_vm0, %v2118_v42, 0.0 }
 0x324   : > { %v2168_v5 = vsel %vm258_vm0, %v2117_v32, 0.0 }
 0x325   : > { %v2169_v56 = vadd.f32 %v2168_v5, %v2167_v25  ;;  %v2070_v21 = vadd.f32 %v2069_v44, %v2068_v63 }
 0x327   : > { %v2171_v30 = vadd.f32 %v2170_v58, %v2169_v56 }
 0x332   : > { %v4617_v28 = vpop.f32.mrb[22].mxu0 }
 0x333   : > { %v6844_v45 = vadd.f32 %v4617_v28, %v6653_v59  ;;  %v1979_v2 = vpop.f32.mrb[23].mxu0 }
 0x334   : > { %v6849_v1 = vadd.f32 %v6653_v59, %v1979_v2 }
 0x335   : > { %v2120_v31 = vmul.f32 %v6844_v45, %v6844_v45  ;;  %v2073_v17 = vsel %vm258_vm0, %v6844_v45, 0.0 }
 0x336   : > { %v2071_v23 = vsel %vm258_vm0, %v6849_v1, 0.0  ;;  %v2119_v15 = vmul.f32 %v6849_v1, %v6849_v1 }
 0x337   : > { %v2072_v13 = vadd.f32 %v2071_v23, %v2070_v21  ;;  %v2174_v53 = vsel %vm258_vm0, %v2120_v31, 0.0 }
 0x338   : > { %v2172_v52 = vsel %vm258_vm0, %v2119_v15, 0.0 }
 0x339   : > { %v2173_v43 = vadd.f32 %v2172_v52, %v2171_v30  ;;  %v2074_v36 = vadd.f32 %v2073_v17, %v2072_v13 }
 0x33b   : > { %v2175_v61 = vadd.f32 %v2174_v53, %v2173_v43 }
 0x346   : > { %v4620_v48 = vpop.f32.mrb[24].mxu0 }
 0x347   : > { %v6863_v3 = vadd.f32 %v4620_v48, %v6653_v59  ;;  %v1989_v18 = vpop.f32.mrb[25].mxu0 }
 0x348   : > { %v6866_v47 = vadd.f32 %v6653_v59, %v1989_v18 }
 0x349   : > { %v2122_v27 = vmul.f32 %v6863_v3, %v6863_v3  ;;  %v2077_v46 = vsel %vm258_vm0, %v6863_v3, 0.0 }
 0x34a   : > { %v2075_v50 = vsel %vm258_vm0, %v6866_v47, 0.0  ;;  %v2121_v34 = vmul.f32 %v6866_v47, %v6866_v47 }
 0x34b   : > { %v2076_v12 = vadd.f32 %v2075_v50, %v2074_v36  ;;  %v2178_v32 = vsel %vm258_vm0, %v2122_v27, 0.0 }
 0x34c   : > { %v2176_v57 = vsel %vm258_vm0, %v2121_v34, 0.0 }
 0x34d   : > { %v2177_v29 = vadd.f32 %v2176_v57, %v2175_v61  ;;  %v2078_v37 = vadd.f32 %v2077_v46, %v2076_v12 }
 0x34f   : > { %v2179_v4 = vadd.f32 %v2178_v32, %v2177_v29 }
 0x35a   : > { %v4623_v14 = vpop.f32.mrb[26].mxu0 }
 0x35b   : > { %v6879_v49 = vadd.f32 %v4623_v14, %v6653_v59  ;;  %v1999_v19 = vpop.f32.mrb[27].mxu0 }
 0x35c   : > { %v6882_v26 = vadd.f32 %v6653_v59, %v1999_v19 }
 0x35d   : > { %v2124_v5 = vmul.f32 %v6879_v49, %v6879_v49  ;;  %v2081_v28 = vsel %vm258_vm0, %v6879_v49, 0.0 }
 0x35e   : > { %v2079_v63 = vsel %vm258_vm0, %v6882_v26, 0.0  ;;  %v2123_v25 = vmul.f32 %v6882_v26, %v6882_v26 }
 0x35f   : > { %v2080_v42 = vadd.f32 %v2079_v63, %v2078_v37  ;;  %v2182_v21 = vsel %vm258_vm0, %v2124_v5, 0.0 }
 0x360   : > { %v2180_v56 = vsel %vm258_vm0, %v2123_v25, 0.0 }
 0x361   : > { %v2181_v2 = vadd.f32 %v2180_v56, %v2179_v4  ;;  %v2082_v44 = vadd.f32 %v2081_v28, %v2080_v42 }
 0x363   : > { %v2183_v58 = vadd.f32 %v2182_v21, %v2181_v2 }
 0x36e   : > { %v4626_v31 = vpop.f32.mrb[28].mxu0 }
 0x36f   : > { %v6895_v23 = vadd.f32 %v4626_v31, %v6653_v59  ;;  %v2009_v15 = vpop.f32.mrb[29].mxu0 }
 0x370   : > { %v6898_v13 = vadd.f32 %v6653_v59, %v2009_v15 }
 0x371   : > { %v2126_v30 = vmul.f32 %v6895_v23, %v6895_v23  ;;  %v2085_v36 = vsel %vm258_vm0, %v6895_v23, 0.0 }
 0x372   : > { %v2083_v17 = vsel %vm258_vm0, %v6898_v13, 0.0  ;;  %v2125_v52 = vmul.f32 %v6898_v13, %v6898_v13 }
 0x373   : > { %v2084_v43 = vadd.f32 %v2083_v17, %v2082_v44  ;;  %v2186_v18 = vsel %vm258_vm0, %v2126_v30, 0.0 }
 0x374   : > { %v2184_v53 = vsel %vm258_vm0, %v2125_v52, 0.0 }
 0x375   : > { %v2185_v61 = vadd.f32 %v2184_v53, %v2183_v58  ;;  %v2086_v48 = vadd.f32 %v2085_v36, %v2084_v43 }
 0x377   : > { %v2187_v27 = vadd.f32 %v2186_v18, %v2185_v61 }
 0x37b   : > { %v4629_v50 = vpop.f32.mrb[30].mxu0 }
 0x37c   : > { %v6911_v34 = vadd.f32 %v4629_v50, %v6653_v59  ;;  %v2019_v12 = vpop.f32.mrb[31].mxu0 }
 0x37d   : > { %v6914_v46 = vadd.f32 %v6653_v59, %v2019_v12 }
 0x37e   : > { %v2128_v57 = vmul.f32 %v6911_v34, %v6911_v34  ;;  %v2089_v4 = vsel %vm258_vm0, %v6911_v34, 0.0 }
 0x37f   : > { %v2087_v29 = vsel %vm258_vm0, %v6914_v46, 0.0  ;;  %v2127_v37 = vmul.f32 %v6914_v46, %v6914_v46 }
 0x380   : > { %v2088_v32 = vadd.f32 %v2087_v29, %v2086_v48  ;;  %v2190_v59 = vsel %vm258_vm0, %v2128_v57, 0.0 }
 0x381   : > { %v2188_v14 = vsel %vm258_vm0, %v2127_v37, 0.0 }
 0x382   : > { %v2090_v19 = vadd.f32 %v2089_v4, %v2088_v32  ;;  %v2189_v5 = vadd.f32 %v2188_v14, %v2187_v27 }
 0x384   : > { %v2091_v63 = vrot.slane %v2090_v19, 4  ;;  %v2191_v25 = vadd.f32 %v2190_v59, %v2189_v5 }
 0x386   : > { %v2092_v42 = vadd.f32 %v2091_v63, %v2090_v19  ;;  %v2192_v28 = vrot.slane %v2191_v25, 4 }
 0x388   : > { %v2093_v56 = vrot.slane %v2092_v42, 2  ;;  %v2193_v2 = vadd.f32 %v2192_v28, %v2191_v25 }
 0x38a   : > { %v2094_v44 = vadd.f32 %v2093_v56, %v2092_v42  ;;  %v2194_v21 = vrot.slane %v2193_v2, 2 }
 0x38c   : > { %v2095_v58 = vrot.slane %v2094_v44, 1  ;;  %v2195_v31 = vadd.f32 %v2194_v21, %v2193_v2 }
 0x38e   : > { %v2096_v15 = vadd.f32 %v2095_v58, %v2094_v44  ;;  %v2196_v30 = vrot.slane %v2195_v31, 1 }
 0x390   : > { %v2197_v17 = vadd.f32 %v2196_v30, %v2195_v31  ;;  %v6926_v52 = vmul.f32 0.00390625, %v2096_v15 }
 0x392   : > { %v2199_v43 = vmul.f32 0.00390625, %v2197_v17  ;;  %v2200_v36 = vmul.f32 %v6926_v52, %v6926_v52  ;;  %v2235_v53 = vsub.f32 %v6914_v46, %v6926_v52  ;;  %v2227_v27 = vsub.f32 %v6849_v1, %v6926_v52 }
 0x393   : > { %v2228_v50 = vsub.f32 %v6844_v45, %v6926_v52  ;;  %v2229_v12 = vsub.f32 %v6866_v47, %v6926_v52  ;;  %v2230_v57 = vsub.f32 %v6863_v3, %v6926_v52  ;;  %v2231_v29 = vsub.f32 %v6882_v26, %v6926_v52 }
 0x394   : > { %v2201_v61 = vsub.f32 %v2199_v43, %v2200_v36  ;;  %v2232_v46 = vsub.f32 %v6879_v49, %v6926_v52  ;;  %v2233_v37 = vsub.f32 %v6898_v13, %v6926_v52  ;;  %v2234_v32 = vsub.f32 %v6895_v23, %v6926_v52 }
 0x395   : > { %v2236_v4 = vsub.f32 %v6911_v34, %v6926_v52  ;;  %v2205_v14 = vsub.f32 %v6663_v7, %v6926_v52  ;;  %v2206_v19 = vsub.f32 %v6657_v33, %v6926_v52  ;;  %v2207_v5 = vsub.f32 %v6668_v62, %v6926_v52 }
 0x396   : > { %v2202_v48 = vmax.f32 %v2201_v61, 0.0  ;;  %v2208_v59 = vsub.f32 %v6684_v16, %v6926_v52  ;;  %v2209_v63 = vsub.f32 %v6689_v8, %v6926_v52  ;;  %v2210_v25 = vsub.f32 %v6699_v10, %v6926_v52 }
 0x397   : > { %v2211_v42 = vsub.f32 %v6704_v9, %v6926_v52  ;;  %v2212_v7 = vsub.f32 %v6717_v41, %v6926_v52  ;;  %v2213_v33 = vsub.f32 %v6722_v22, %v6926_v52  ;;  %v2214_v62 = vsub.f32 %v6733_v6, %v6926_v52 }
 0x398   : > { %v2203_v18 = vadd.f32 1e-05, %v2202_v48  ;;  %v2215_v16 = vsub.f32 %v6738_v35, %v6926_v52  ;;  %v2216_v8 = vsub.f32 %v6750_v24, %v6926_v52  ;;  %v2217_v10 = vsub.f32 %v6756_v20, %v6926_v52 }
 0x399   : > { %v2218_v9 = vsub.f32 %v6768_v40, %v6926_v52  ;;  %v2219_v41 = vsub.f32 %v6774_v54, %v6926_v52  ;;  %v2220_v22 = vsub.f32 %v6786_v51, %v6926_v52  ;;  %v2221_v6 = vsub.f32 %v6791_v11, %v6926_v52 }
 0x39a   : > { %4720 = vrsqrt.f32 %v2203_v18  ;;  %v2222_v35 = vsub.f32 %v6803_v60, %v6926_v52  ;;  %v2223_v24 = vsub.f32 %v6808_v55, %v6926_v52  ;;  %v2224_v20 = vsub.f32 %v6819_v0, %v6926_v52 }
 0x39b   : > { %v2225_v40 = vsub.f32 %v6824_v38, %v6926_v52  ;;  %v2226_v54 = vsub.f32 %v6835_v39, %v6926_v52 }
 0x3a4   : > { %v4721_v28 = vpop.eup %4720 }
 0x3a5   : > { %v2267_v51 = vmul.f32 %v4721_v28, %v2235_v53  ;;  %v2239_v56 = vmul.f32 %v4721_v28, %v2207_v5  ;;  %v2240_v2 = vmul.f32 %v4721_v28, %v2208_v59  ;;  %v2237_v11 = vmul.f32 %v4721_v28, %v2205_v14 }
 0x3a6   : > { %v2238_v44 = vmul.f32 %v4721_v28, %v2206_v19  ;;  %v2241_v21 = vmul.f32 %v4721_v28, %v2209_v63  ;;  %v2242_v60 = vmul.f32 %v4721_v28, %v2210_v25  ;;  %v2243_v58 = vmul.f32 %v4721_v28, %v2211_v42 }
 0x3a7   : > { %v2299_v31 = vmax.f32 %v2267_v51, 0.0  ;;  %v2271_v15 = vmax.f32 %v2239_v56, 0.0  ;;  %v2272_v55 = vmax.f32 %v2240_v2, 0.0  ;;  %v2244_v30 = vmul.f32 %v4721_v28, %v2212_v7 }
 0x3a8   : > { %v2245_v17 = vmul.f32 %v4721_v28, %v2213_v33  ;;  %v2246_v0 = vmul.f32 %v4721_v28, %v2214_v62  ;;  %v2247_v43 = vmul.f32 %v4721_v28, %v2215_v16  ;;  %v2248_v36 = vmul.f32 %v4721_v28, %v2216_v8 }
 0x3a9   : > { %2331 = vst.msk [vmem:[#allocation2 + $0x181] sm:$0xff] %vm258_vm0, %v2299_v31  ;;  %2333 = vst.msk [vmem:[#allocation2 + $0x1] sm:$0xff] %vm258_vm0, %v2271_v15  ;;  %v2249_v38 = vmul.f32 %v4721_v28, %v2217_v10  ;;  %v2250_v39 = vmul.f32 %v4721_v28, %v2218_v9  ;;  %v2251_v53 = vmul.f32 %v4721_v28, %v2219_v41  ;;  %v2273_v49 = vmax.f32 %v2241_v21, 0.0 }
 0x3aa   : > { %2334 = vst.msk [vmem:[#allocation2 + $0x9] sm:$0xff] %vm258_vm0, %v2272_v55  ;;  %v6997_v61 = vmul.f32 %v4721_v28, %v2220_v22  ;;  %2303 = vst.msk [vmem:[#allocation2 + $0x31] sm:$0xff] %vm258_vm0, %v2271_v15  ;;  %v2253_v48 = vmul.f32 %v4721_v28, %v2221_v6  ;;  %v2254_v18 = vmul.f32 %v4721_v28, %v2222_v35  ;;  %v2278_v13 = vmax.f32 %v2246_v0, 0.0 }
 0x3ab   : > { %2304 = vst.msk [vmem:[#allocation2 + $0x39] sm:$0xff] %vm258_vm0, %v2272_v55  ;;  %v2255_v14 = vmul.f32 %v4721_v28, %v2223_v24  ;;  %v7001_v19 = vmul.f32 %v4721_v28, %v2224_v20  ;;  %v7003_v5 = vmul.f32 %v4721_v28, %v2225_v40  ;;  %v7005_v59 = vmul.f32 %v4721_v28, %v2226_v54 }
 0x3ac   : > { %v7010_v63 = vmul.f32 %v4721_v28, %v2227_v27  ;;  %v7015_v25 = vmul.f32 %v4721_v28, %v2228_v50  ;;  %v7020_v42 = vmul.f32 %v4721_v28, %v2229_v12  ;;  %v7025_v7 = vmul.f32 %v4721_v28, %v2230_v57  ;;  %2305 = vst.msk [vmem:[#allocation2 + $0x49] sm:$0xff] %vm258_vm0, %v2273_v49 }
 0x3ad   : > { %v7030_v1 = vmul.f32 %v4721_v28, %v2231_v29  ;;  %v7035_v45 = vmul.f32 %v4721_v28, %v2232_v46  ;;  %v7040_v47 = vmul.f32 %v4721_v28, %v2233_v37  ;;  %v7045_v3 = vmul.f32 %v4721_v28, %v2234_v32  ;;  %2310 = vst.msk [vmem:[#allocation2 + $0x81] sm:$0xff] %vm258_vm0, %v2278_v13 }
 0x3ae   : > { %v7050_v26 = vmul.f32 %v4721_v28, %v2236_v4  ;;  %v2269_v27 = vmax.f32 %v2237_v11, 0.0  ;;  %v2270_v50 = vmax.f32 %v2238_v44, 0.0  ;;  %v2274_v12 = vmax.f32 %v2242_v60, 0.0 }
 0x3af   : > { %v2275_v57 = vmax.f32 %v2243_v58, 0.0  ;;  %v2276_v29 = vmax.f32 %v2244_v30, 0.0  ;;  %v2277_v46 = vmax.f32 %v2245_v17, 0.0  ;;  %v2279_v37 = vmax.f32 %v2247_v43, 0.0 }
 0x3b0   : > { %2301 = vst.msk [vmem:[#allocation2 + $0x19] sm:$0xff] %vm258_vm0, %v2269_v27  ;;  %v2337_v23 = vld [vmem:[#allocation2 + $0x2] sm:$0x1]  ;;  %v2280_v32 = vmax.f32 %v2248_v36, 0.0  ;;  %2302 = vst.msk [vmem:[#allocation2 + $0x21] sm:$0xff] %vm258_vm0, %v2270_v50  ;;  %v2281_v34 = vmax.f32 %v2249_v38, 0.0 }
 0x3b1   : > { %v2373_v33 = vld [vmem:[#allocation2 + $0xf] sm:$0x1]  ;;  %2306 = vst.msk [vmem:[#allocation2 + $0x51] sm:$0xff] %vm258_vm0, %v2274_v12  ;;  %2307 = vst.msk [vmem:[#allocation2 + $0x61] sm:$0xff] %vm258_vm0, %v2275_v57  ;;  %v2282_v52 = vmax.f32 %v2250_v39, 0.0  ;;  %v2283_v4 = vmax.f32 %v2251_v53, 0.0 }
 0x3b2   : > { %2391 = vst.msk [vmem:[#allocation2 + $0x11] sm:$0x1] %vm314_vm1, %v2373_v33  ;;  %2355 = vst.msk [vmem:[#allocation2] sm:$0x1] %vm314_vm1, %v2337_v23  ;;  %v2375_v62 = vld [vmem:[#allocation2 + $0x3f] sm:$0x1] }
 0x3b3   : > { %2308 = vst.msk [vmem:[#allocation2 + $0x69] sm:$0xff] %vm258_vm0, %v2276_v29  ;;  %2309 = vst.msk [vmem:[#allocation2 + $0x79] sm:$0xff] %vm258_vm0, %v2277_v46  ;;  %v2284_v16 = vmax.f32 %v6997_v61, 0.0  ;;  %v2285_v8 = vmax.f32 %v2253_v48, 0.0  ;;  %v2286_v10 = vmax.f32 %v2254_v18, 0.0  ;;  %v2287_v9 = vmax.f32 %v2255_v14, 0.0 }
 0x3b4   : > { %2311 = vst.msk [vmem:[#allocation2 + $0x91] sm:$0xff] %vm258_vm0, %v2279_v37  ;;  %2312 = vst.msk [vmem:[#allocation2 + $0x99] sm:$0xff] %vm258_vm0, %v2280_v32  ;;  %v2288_v41 = vmax.f32 %v7001_v19, 0.0  ;;  %v2289_v22 = vmax.f32 %v7003_v5, 0.0  ;;  %v2290_v6 = vmax.f32 %v7005_v59, 0.0  ;;  %v2291_v35 = vmax.f32 %v7010_v63, 0.0 }
 0x3b5   : > { %2393 = vst.msk [vmem:[#allocation2 + $0x41] sm:$0x1] %vm314_vm1, %v2375_v62  ;;  %v2339_v28 = vld [vmem:[#allocation2 + $0x32] sm:$0x1]  ;;  %v2292_v24 = vmax.f32 %v7015_v25, 0.0  ;;  %v2293_v20 = vmax.f32 %v7020_v42, 0.0 }
 0x3b6   : > { %2313 = vst.msk [vmem:[#allocation2 + $0xa9] sm:$0xff] %vm258_vm0, %v2281_v34  ;;  %2314 = vst.msk [vmem:[#allocation2 + $0xb1] sm:$0xff] %vm258_vm0, %v2282_v52  ;;  %v2294_v40 = vmax.f32 %v7025_v7, 0.0  ;;  %v2295_v54 = vmax.f32 %v7030_v1, 0.0  ;;  %v2353_v51 = vld [vmem:[#allocation2 + $0x182] sm:$0x1] }
 0x3b7   : > { %2315 = vst.msk [vmem:[#allocation2 + $0xc1] sm:$0xff] %vm258_vm0, %v2283_v4  ;;  %2316 = vst.msk [vmem:[#allocation2 + $0xc9] sm:$0xff] %vm258_vm0, %v2284_v16  ;;  %v2296_v56 = vmax.f32 %v7035_v45, 0.0  ;;  %v2297_v2 = vmax.f32 %v7040_v47, 0.0  ;;  %v2298_v11 = vmax.f32 %v7045_v3, 0.0  ;;  %v2300_v44 = vmax.f32 %v7050_v26, 0.0 }
 0x3b8   : > { %2317 = vst.msk [vmem:[#allocation2 + $0xd9] sm:$0xff] %vm258_vm0, %v2285_v8  ;;  %2318 = vst.msk [vmem:[#allocation2 + $0xe1] sm:$0xff] %vm258_vm0, %v2286_v10  ;;  %v7091_v21 = vld [vmem:[#allocation2 + $0x8] sm:$0xff]  ;;  %v2338_v60 = vld [vmem:[#allocation2 + $0x1a] sm:$0x1] }
 0x3b9   : > { %2319 = vst.msk [vmem:[#allocation2 + $0xf1] sm:$0xff] %vm258_vm0, %v2287_v9  ;;  %2320 = vst.msk [vmem:[#allocation2 + $0xf9] sm:$0xff] %vm258_vm0, %v2288_v41  ;;  %v2374_v58 = vld [vmem:[#allocation2 + $0x27] sm:$0x1]  ;;  %v2376_v31 = vld [vmem:[#allocation2 + $0x57] sm:$0x1] }
 0x3ba   : > { %2357 = vst.msk [vmem:[#allocation2 + $0x30] sm:$0x1] %vm314_vm1, %v2339_v28  ;;  %2371 = vst.msk [vmem:[#allocation2 + $0x180] sm:$0x1] %vm314_vm1, %v2353_v51  ;;  %v7104_v15 = vld [vmem:[#allocation2 + $0x10] sm:$0x3] }
 0x3bb   : > { %2321 = vst.msk [vmem:[#allocation2 + $0x109] sm:$0xff] %vm258_vm0, %v2289_v22  ;;  %2322 = vst.msk [vmem:[#allocation2 + $0x111] sm:$0xff] %vm258_vm0, %v2290_v6  ;;  %v7106_v55 = vld [vmem:[#allocation2] sm:$0xff]  ;;  %v2512_v30 = vrot.slane %v7091_v21, 1  ;;  %v2514_v17 = vrot.slane %v7104_v15, 1  ;;  %v7139_v3 = vld [vmem:[#allocation2 + $0x38] sm:$0xff] }
 0x3bc   : > { %2323 = vst.msk [vmem:[#allocation2 + $0x121] sm:$0xff] %vm258_vm0, %v2291_v35  ;;  %2324 = vst.msk [vmem:[#allocation2 + $0x129] sm:$0xff] %vm258_vm0, %v2292_v24  ;;  %v2511_v0 = vrot.slane %v7106_v55, 1  ;;  %v2340_v43 = vld [vmem:[#allocation2 + $0x4a] sm:$0x1]  ;;  %v7119_v48 = vld [vmem:[#allocation2 + $0x20] sm:$0xff] }
 0x3bd   : > { %2325 = vst.msk [vmem:[#allocation2 + $0x139] sm:$0xff] %vm258_vm0, %v2293_v20  ;;  %2326 = vst.msk [vmem:[#allocation2 + $0x141] sm:$0xff] %vm258_vm0, %v2294_v40  ;;  %v2377_v36 = vld [vmem:[#allocation2 + $0x6f] sm:$0x1]  ;;  %v2515_v38 = vsel %vm471_vm2, %v2512_v30, %v2514_v17  ;;  %v2341_v53 = vld [vmem:[#allocation2 + $0x62] sm:$0x1] }
 0x3be   : > { %2327 = vst.msk [vmem:[#allocation2 + $0x151] sm:$0xff] %vm258_vm0, %v2295_v54  ;;  %2328 = vst.msk [vmem:[#allocation2 + $0x159] sm:$0xff] %vm258_vm0, %v2296_v56  ;;  %v2513_v39 = vsel %vm471_vm2, %v2511_v0, %v2512_v30  ;;  %v2378_v61 = vld [vmem:[#allocation2 + $0x87] sm:$0x1]  ;;  %2699 = vrot.lane.b32.xlu1 %v2515_v38, %s4794_s24  ;;  %v2342_v18 = vld [vmem:[#allocation2 + $0x7a] sm:$0x1] }
 0x3bf   : > { %2329 = vst.msk [vmem:[#allocation2 + $0x169] sm:$0xff] %vm258_vm0, %v2297_v2  ;;  %2330 = vst.msk [vmem:[#allocation2 + $0x171] sm:$0xff] %vm258_vm0, %v2298_v11  ;;  %2697 = vrot.lane.b32.xlu0 %v2513_v39, %s4794_s24  ;;  %v2379_v14 = vld [vmem:[#allocation2 + $0x9f] sm:$0x1]  ;;  %v2343_v19 = vld [vmem:[#allocation2 + $0x92] sm:$0x1] }
 0x3c0   : > { %2332 = vst.msk [vmem:[#allocation2 + $0x189] sm:$0xff] %vm258_vm0, %v2300_v44  ;;  %2335 = vst.msk [vmem:[#allocation2 + $0x199] sm:$0xff] %vm258_vm0, %v2297_v2  ;;  %v2380_v5 = vld [vmem:[#allocation2 + $0xb7] sm:$0x1]  ;;  %v2344_v25 = vld [vmem:[#allocation2 + $0xaa] sm:$0x1] }
 0x3c1   : > { %2336 = vst.msk [vmem:[#allocation2 + $0x1a1] sm:$0xff] %vm258_vm0, %v2298_v11  ;;  %9520 = vst [vmem:[#allocation63_spill] sm:$0xff] %v7106_v55  ;;  %v7127_v63 = vld [vmem:[#allocation2 + $0x30] sm:$0xff]  ;;  %v2517_v7 = vrot.slane %v7119_v48, 1  ;;  %v7135_v45 = vld [vmem:[#allocation2 + $0x40] sm:$0x3] }
 0x3c2   : > { %2356 = vst.msk [vmem:[#allocation2 + $0x18] sm:$0x1] %vm314_vm1, %v2338_v60  ;;  %2392 = vst.msk [vmem:[#allocation2 + $0x29] sm:$0x1] %vm314_vm1, %v2374_v58  ;;  %v2381_v26 = vld [vmem:[#allocation2 + $0xcf] sm:$0x1] }
 0x3c3   : > { %2394 = vst.msk [vmem:[#allocation2 + $0x59] sm:$0x1] %vm314_vm1, %v2376_v31  ;;  %2358 = vst.msk [vmem:[#allocation2 + $0x48] sm:$0x1] %vm314_vm1, %v2340_v43  ;;  %v2521_v50 = vrot.slane %v7127_v63, 1  ;;  %v2524_v29 = vrot.slane %v7135_v45, 1 }
 0x3c4   : > { %2395 = vst.msk [vmem:[#allocation2 + $0x71] sm:$0x1] %vm314_vm1, %v2377_v36  ;;  %2359 = vst.msk [vmem:[#allocation2 + $0x60] sm:$0x1] %vm314_vm1, %v2341_v53  ;;  %v2345_v49 = vld [vmem:[#allocation2 + $0xc2] sm:$0x1] }
 0x3c5   : > { %2396 = vst.msk [vmem:[#allocation2 + $0x89] sm:$0x1] %vm314_vm1, %v2378_v61  ;;  %2360 = vst.msk [vmem:[#allocation2 + $0x78] sm:$0x1] %vm314_vm1, %v2342_v18  ;;  %v2382_v12 = vld [vmem:[#allocation2 + $0xe7] sm:$0x1] }
 0x3c6   : > { %2397 = vst.msk [vmem:[#allocation2 + $0xa1] sm:$0x1] %vm314_vm1, %v2379_v14  ;;  %2361 = vst.msk [vmem:[#allocation2 + $0x90] sm:$0x1] %vm314_vm1, %v2343_v19  ;;  %v2346_v13 = vld [vmem:[#allocation2 + $0xda] sm:$0x1] }
 0x3c7   : > { %2398 = vst.msk [vmem:[#allocation2 + $0xb9] sm:$0x1] %vm314_vm1, %v2380_v5  ;;  %2362 = vst.msk [vmem:[#allocation2 + $0xa8] sm:$0x1] %vm314_vm1, %v2344_v25  ;;  %v2522_v37 = vrot.slane %v7139_v3, 1  ;;  %v7159_v33 = vld [vmem:[#allocation2 + $0x50] sm:$0xff] }
 0x3c8   : > { %2399 = vst.msk [vmem:[#allocation2 + $0xd1] sm:$0x1] %vm314_vm1, %v2381_v26  ;;  %2363 = vst.msk [vmem:[#allocation2 + $0xc0] sm:$0x1] %vm314_vm1, %v2345_v49  ;;  %v2527_v4 = vrot.slane %v7159_v33, 1  ;;  %v7175_v16 = vld [vmem:[#allocation2 + $0x68] sm:$0xff] }
 0x3c9   : > { %v7125_v59 = vld [vmem:[#allocation2 + $0x18] sm:$0xff]  ;;  %v7131_v42 = vld [vmem:[#allocation2 + $0x28] sm:$0x3]  ;;  %2400 = vst.msk [vmem:[#allocation2 + $0xe9] sm:$0x1] %vm314_vm1, %v2382_v12  ;;  %v7165_v32 = vsel %vm471_vm2, %v2521_v50, %v2522_v37  ;;  %v7169_v52 = vsel %vm471_vm2, %v2522_v37, %v2524_v29  ;;  %v2532_v40 = vrot.slane %v7175_v16, 1 }
 0x3ca   : > { %v2516_v1 = vrot.slane %v7125_v59, 1  ;;  %v2519_v47 = vrot.slane %v7131_v42, 1  ;;  %v7152_v46 = vld [vmem:[#allocation2 + $0x48] sm:$0xff]  ;;  %v7161_v23 = vld [vmem:[#allocation2 + $0x58] sm:$0x3]  ;;  %v7206_v60 = vld [vmem:[#allocation2 + $0x80] sm:$0xff] }
 0x3cb   : > { %2364 = vst.msk [vmem:[#allocation2 + $0xd8] sm:$0x1] %vm314_vm1, %v2346_v13  ;;  %v2526_v34 = vrot.slane %v7152_v46, 1  ;;  %v2529_v62 = vrot.slane %v7161_v23, 1  ;;  %v7177_v8 = vld [vmem:[#allocation2 + $0x60] sm:$0xff]  ;;  %v2537_v53 = vrot.slane %v7206_v60, 1 }
 0x3cc   : > { %v7142_v27 = vsel %vm471_vm2, %v2516_v1, %v2517_v7  ;;  %v7147_v57 = vsel %vm471_vm2, %v2517_v7, %v2519_v47  ;;  %v2383_v10 = vld [vmem:[#allocation2 + $0xff] sm:$0x1]  ;;  %v7181_v9 = vld [vmem:[#allocation2 + $0x70] sm:$0x3]  ;;  %v2347_v41 = vld [vmem:[#allocation2 + $0xf2] sm:$0x1] }
 0x3cd   : > { %2701 = vrot.lane.b32.xlu0 %v7142_v27, %s4794_s24  ;;  %2703 = vrot.lane.b32.xlu1 %v7147_v57, %s4794_s24  ;;  %2401 = vst.msk [vmem:[#allocation2 + $0x101] sm:$0x1] %vm314_vm1, %v2383_v10  ;;  %v2384_v22 = vld [vmem:[#allocation2 + $0x117] sm:$0x1]  ;;  %2365 = vst.msk [vmem:[#allocation2 + $0xf0] sm:$0x1] %vm314_vm1, %v2347_v41  ;;  %v7187_v28 = vsel %vm471_vm2, %v2526_v34, %v2527_v4  ;;  %v7193_v20 = vsel %vm471_vm2, %v2527_v4, %v2529_v62 }
 0x3ce   : > { %2402 = vst.msk [vmem:[#allocation2 + $0x119] sm:$0x1] %vm314_vm1, %v2384_v22  ;;  %v2348_v6 = vld [vmem:[#allocation2 + $0x10a] sm:$0x1]  ;;  %v2385_v35 = vld [vmem:[#allocation2 + $0x12f] sm:$0x1] }
 0x3cf   : > { %v2531_v24 = vrot.slane %v7177_v8, 1  ;;  %2366 = vst.msk [vmem:[#allocation2 + $0x108] sm:$0x1] %vm314_vm1, %v2348_v6  ;;  %2403 = vst.msk [vmem:[#allocation2 + $0x131] sm:$0x1] %vm314_vm1, %v2385_v35  ;;  %v2534_v54 = vrot.slane %v7181_v9, 1 }
 0x3d0   : > { %v7199_v51 = vld [vmem:[#allocation2 + $0x78] sm:$0xff]  ;;  %v2349_v56 = vld [vmem:[#allocation2 + $0x122] sm:$0x1]  ;;  %v7203_v2 = vld [vmem:[#allocation2 + $0x88] sm:$0x3] }
 0x3d1   : > { %2705 = vrot.lane.b32.xlu0 %v7165_v32, %s4794_s24  ;;  %2707 = vrot.lane.b32.xlu1 %v7169_v52, %s4794_s24  ;;  %2367 = vst.msk [vmem:[#allocation2 + $0x120] sm:$0x1] %vm314_vm1, %v2349_v56  ;;  %v2386_v11 = vld [vmem:[#allocation2 + $0x147] sm:$0x1]  ;;  %v2350_v44 = vld [vmem:[#allocation2 + $0x13a] sm:$0x1]  ;;  %v7211_v30 = vsel %vm471_vm2, %v2531_v24, %v2532_v40  ;;  %v7217_v36 = vsel %vm471_vm2, %v2532_v40, %v2534_v54 }
 0x3d2   : > { %2404 = vst.msk [vmem:[#allocation2 + $0x149] sm:$0x1] %vm314_vm1, %v2386_v11  ;;  %2368 = vst.msk [vmem:[#allocation2 + $0x138] sm:$0x1] %vm314_vm1, %v2350_v44  ;;  %v2387_v58 = vld [vmem:[#allocation2 + $0x15f] sm:$0x1] }
 0x3d3   : > { %v2351_v31 = vld [vmem:[#allocation2 + $0x152] sm:$0x1]  ;;  %9521 = vst [vmem:[#allocation74_spill] sm:$0xff] %v7211_v30  ;;  %v2536_v17 = vrot.slane %v7199_v51, 1  ;;  %2405 = vst.msk [vmem:[#allocation2 + $0x161] sm:$0x1] %vm314_vm1, %v2387_v58 }
 0x3d4   : > { %2369 = vst.msk [vmem:[#allocation2 + $0x150] sm:$0x1] %vm314_vm1, %v2351_v31  ;;  %v2388_v0 = vld [vmem:[#allocation2 + $0x177] sm:$0x1]  ;;  %v2352_v43 = vld [vmem:[#allocation2 + $0x16a] sm:$0x1] }
 0x3d5   : > { %2709 = vrot.lane.b32.xlu0 %v7187_v28, %s4794_s24  ;;  %2711 = vrot.lane.b32.xlu1 %v7193_v20, %s4794_s24  ;;  %9522 = vst [vmem:[#allocation47_spill] sm:$0xff] %v7217_v36  ;;  %v2539_v38 = vrot.slane %v7203_v2, 1  ;;  %v7222_v39 = vld [vmem:[#allocation2 + $0x90] sm:$0xff]  ;;  %2406 = vst.msk [vmem:[#allocation2 + $0x179] sm:$0x1] %vm314_vm1, %v2388_v0  ;;  %v7231_v18 = vld [vmem:[#allocation2 + $0x98] sm:$0xff]  ;;  %v7234_v14 = vsel %vm471_vm2, %v2536_v17, %v2537_v53 }
 0x3d6   : > { %2370 = vst.msk [vmem:[#allocation2 + $0x168] sm:$0x1] %vm314_vm1, %v2352_v43  ;;  %v7229_v61 = vld [vmem:[#allocation2 + $0xa0] sm:$0x3]  ;;  %9523 = vst [vmem:[#allocation64_spill] sm:$0xff] %v7234_v14  ;;  %v2541_v19 = vrot.slane %v7222_v39, 1 }
 0x3d7   : > { %v2389_v5 = vld [vmem:[#allocation2 + $0x18f] sm:$0x1]  ;;  %v7238_v25 = vsel %vm471_vm2, %v2537_v53, %v2539_v38  ;;  %v2544_v7 = vrot.slane %v7229_v61, 1  ;;  %v2354_v47 = vld [vmem:[#allocation2 + $0x19a] sm:$0x1]  ;;  %v2542_v50 = vrot.slane %v7231_v18, 1 }
 0x3d8   : > { %9524 = vst [vmem:[#allocation105_spill] sm:$0xff] %v7238_v25  ;;  %v7243_v1 = vld [vmem:[#allocation2 + $0xa8] sm:$0xff]  ;;  %2407 = vst.msk [vmem:[#allocation2 + $0x191] sm:$0x1] %vm314_vm1, %v2389_v5  ;;  %v2390_v26 = vld [vmem:[#allocation2 + $0x1a7] sm:$0x1] }
 0x3d9   : > { %2713 = vrot.lane.b32.xlu0 %v7211_v30, %s4794_s24  ;;  %2715 = vrot.lane.b32.xlu1 %v7217_v36, %s4794_s24  ;;  %9525 = vst [vmem:[#allocation65_spill] sm:$0xff] %v7243_v1  ;;  %v7249_v49 = vld [vmem:[#allocation2 + $0xb8] sm:$0x3]  ;;  %2372 = vst.msk [vmem:[#allocation2 + $0x198] sm:$0x1] %vm314_vm1, %v2354_v47  ;;  %v7253_v12 = vld [vmem:[#allocation2 + $0xb0] sm:$0xff]  ;;  %v7256_v29 = vsel %vm471_vm2, %v2541_v19, %v2542_v50  ;;  %v7260_v37 = vsel %vm471_vm2, %v2542_v50, %v2544_v7 }
 0x3da   : > { %2408 = vst.msk [vmem:[#allocation2 + $0x1a9] sm:$0x1] %vm314_vm1, %v2390_v26  ;;  %9526 = vst [vmem:[#allocation77_spill] sm:$0xff] %v7256_v29  ;;  %v2546_v13 = vrot.slane %v7243_v1, 1  ;;  %v2549_v34 = vrot.slane %v7249_v49, 1  ;;  %v7265_v4 = vld [vmem:[#allocation2 + $0xc0] sm:$0xff] }
 0x3db   : > { %9527 = vst [vmem:[#allocation48_spill] sm:$0xff] %v7260_v37  ;;  %9528 = vst [vmem:[#allocation108_spill] sm:$0xff] %v7265_v4  ;;  %v2547_v62 = vrot.slane %v7253_v12, 1  ;;  %v7270_v10 = vld [vmem:[#allocation2 + $0xd0] sm:$0x3]  ;;  %v7272_v41 = vld [vmem:[#allocation2 + $0xc8] sm:$0xff] }
 0x3dc   : > { %v2551_v6 = vrot.slane %v7265_v4, 1  ;;  %v2554_v24 = vrot.slane %v7270_v10, 1  ;;  %v7284_v40 = vld [vmem:[#allocation2 + $0xd8] sm:$0xff]  ;;  %v2552_v54 = vrot.slane %v7272_v41, 1  ;;  %v7289_v56 = vld [vmem:[#allocation2 + $0xe8] sm:$0x3] }
 0x3dd   : > { %2717 = vrot.lane.b32.xlu0 %v7234_v14, %s4794_s24  ;;  %2719 = vrot.lane.b32.xlu1 %v7238_v25, %s4794_s24  ;;  %v7275_v22 = vsel %vm471_vm2, %v2546_v13, %v2547_v62  ;;  %v7279_v35 = vsel %vm471_vm2, %v2547_v62, %v2549_v34  ;;  %9531 = vst [vmem:[#allocation66_spill] sm:$0xff] %v7284_v40  ;;  %v7291_v11 = vld [vmem:[#allocation2 + $0xe0] sm:$0xff]  ;;  %v2556_v58 = vrot.slane %v7284_v40, 1  ;;  %v2559_v17 = vrot.slane %v7289_v56, 1  ;;  %v7303_v0 = vld [vmem:[#allocation2 + $0xf0] sm:$0xff]  ;;  %v7310_v53 = vld [vmem:[#allocation2 + $0xf8] sm:$0xff] }
 0x3de   : > { %9529 = vst [vmem:[#allocation78_spill] sm:$0xff] %v7275_v22  ;;  %9530 = vst [vmem:[#allocation49_spill] sm:$0xff] %v7279_v35  ;;  %v7294_v44 = vsel %vm471_vm2, %v2551_v6, %v2552_v54  ;;  %v7298_v31 = vsel %vm471_vm2, %v2552_v54, %v2554_v24  ;;  %v2557_v43 = vrot.slane %v7291_v11, 1  ;;  %v7308_v38 = vld [vmem:[#allocation2 + $0x100] sm:$0x3]  ;;  %v2561_v5 = vrot.slane %v7303_v0, 1 }
 0x3df   : > { %9532 = vst [vmem:[#allocation109_spill] sm:$0xff] %v7294_v44  ;;  %9533 = vst [vmem:[#allocation67_spill] sm:$0xff] %v7298_v31  ;;  %v2564_v47 = vrot.slane %v7308_v38, 1  ;;  %v7322_v26 = vld [vmem:[#allocation2 + $0x108] sm:$0xff]  ;;  %v2562_v50 = vrot.slane %v7310_v53, 1  ;;  %v7329_v34 = vld [vmem:[#allocation2 + $0x110] sm:$0xff] }
 0x3e0   : > { %9534 = vst [vmem:[#allocation79_spill] sm:$0xff] %v7303_v0  ;;  %v7313_v19 = vsel %vm471_vm2, %v2556_v58, %v2557_v43  ;;  %v7317_v7 = vsel %vm471_vm2, %v2557_v43, %v2559_v17  ;;  %9537 = vst [vmem:[#allocation52_spill] sm:$0xff] %v7322_v26  ;;  %v7327_v13 = vld [vmem:[#allocation2 + $0x118] sm:$0x3]  ;;  %v2566_v6 = vrot.slane %v7322_v26, 1  ;;  %v7341_v58 = vld [vmem:[#allocation2 + $0x120] sm:$0xff] }
 0x3e1   : > { %2721 = vrot.lane.b32.xlu0 %v7256_v29, %s4794_s24  ;;  %2723 = vrot.lane.b32.xlu1 %v7260_v37, %s4794_s24  ;;  %9535 = vst [vmem:[#allocation110_spill] sm:$0xff] %v7313_v19  ;;  %9536 = vst [vmem:[#allocation80_spill] sm:$0xff] %v7317_v7  ;;  %v7332_v62 = vsel %vm471_vm2, %v2561_v5, %v2562_v50  ;;  %v7336_v24 = vsel %vm471_vm2, %v2562_v50, %v2564_v47  ;;  %v2569_v54 = vrot.slane %v7327_v13, 1  ;;  %v7346_v43 = vld [vmem:[#allocation2 + $0x130] sm:$0x3]  ;;  %v7348_v5 = vld [vmem:[#allocation2 + $0x128] sm:$0xff] }
 0x3e2   : > { %9538 = vst [vmem:[#allocation68_spill] sm:$0xff] %v7332_v62  ;;  %9539 = vst [vmem:[#allocation111_spill] sm:$0xff] %v7336_v24  ;;  %v2567_v17 = vrot.slane %v7329_v34, 1  ;;  %v2571_v47 = vrot.slane %v7341_v58, 1  ;;  %v7403_v25 = vld [vmem:[#allocation2 + $0x178] sm:$0x3] }
 0x3e4   : > { %v7355_v50 = vsel %vm471_vm2, %v2567_v17, %v2569_v54 }
 0x3e5   : > { %2725 = vrot.lane.b32.xlu0 %v7275_v22, %s4794_s24  ;;  %2727 = vrot.lane.b32.xlu1 %v7279_v35, %s4794_s24  ;;  %9541 = vst [vmem:[#allocation81_spill] sm:$0xff] %v7355_v50  ;;  %v7384_v22 = vld [vmem:[#allocation2 + $0x160] sm:$0x3] }
 0x3e9   : > { %2729 = vrot.lane.b32.xlu0 %v7294_v44, %s4794_s24  ;;  %2731 = vrot.lane.b32.xlu1 %v7298_v31, %s4794_s24  ;;  %v7365_v31 = vld [vmem:[#allocation2 + $0x148] sm:$0x3] }
 0x3ed   : > { %2733 = vrot.lane.b32.xlu0 %v7313_v19, %s4794_s24  ;;  %2735 = vrot.lane.b32.xlu1 %v7317_v7, %s4794_s24  ;;  %v7351_v7 = vsel %vm471_vm2, %v2566_v6, %v2567_v17  ;;  %v2572_v19 = vrot.slane %v7348_v5, 1  ;;  %v7367_v6 = vld [vmem:[#allocation2 + $0x140] sm:$0xff] }
 0x3ee   : > { %9540 = vst [vmem:[#allocation69_spill] sm:$0xff] %v7351_v7  ;;  %v2577_v35 = vrot.slane %v7367_v6, 1 }
 0x3ef   : > { %v7370_v44 = vsel %vm471_vm2, %v2571_v47, %v2572_v19  ;;  %v7386_v47 = vld [vmem:[#allocation2 + $0x158] sm:$0xff] }
 0x3f0   : > { %9542 = vst [vmem:[#allocation112_spill] sm:$0xff] %v7370_v44  ;;  %v2582_v29 = vrot.slane %v7386_v47, 1 }
 0x3f1   : > { %2737 = vrot.lane.b32.xlu0 %v7332_v62, %s4794_s24  ;;  %2739 = vrot.lane.b32.xlu1 %v7336_v24, %s4794_s24  ;;  %v2574_v62 = vrot.slane %v7346_v43, 1  ;;  %v7360_v24 = vld [vmem:[#allocation2 + $0x138] sm:$0xff] }
 0x3f2   : > { %v2576_v54 = vrot.slane %v7360_v24, 1 }
 0x3f3   : > { %v7374_v17 = vsel %vm471_vm2, %v2572_v19, %v2574_v62 }
 0x3f4   : > { %9543 = vst [vmem:[#allocation82_spill] sm:$0xff] %v7374_v17  ;;  %v7389_v37 = vsel %vm471_vm2, %v2576_v54, %v2577_v35  ;;  %v7405_v54 = vld [vmem:[#allocation2 + $0x170] sm:$0xff] }
 0x3f5   : > { %2741 = vrot.lane.b32.xlu0 %v7351_v7, %s4794_s24  ;;  %2743 = vrot.lane.b32.xlu1 %v7355_v50, %s4794_s24  ;;  %v2579_v7 = vrot.slane %v7365_v31, 1  ;;  %v7379_v50 = vld [vmem:[#allocation2 + $0x150] sm:$0xff]  ;;  %9544 = vst [vmem:[#allocation54_spill] sm:$0xff] %v7389_v37 }
 0x3f6   : > { %v2581_v19 = vrot.slane %v7379_v50, 1 }
 0x3f7   : > { %v7393_v62 = vsel %vm471_vm2, %v2577_v35, %v2579_v7 }
 0x3f8   : > { %9545 = vst [vmem:[#allocation70_spill] sm:$0xff] %v7393_v62  ;;  %v7408_v14 = vsel %vm471_vm2, %v2581_v19, %v2582_v29  ;;  %v2591_v19 = vrot.slane %v7106_v55, 2 }
 0x3f9   : > { %2745 = vrot.lane.b32.xlu0 %v7370_v44, %s4794_s24  ;;  %2747 = vrot.lane.b32.xlu1 %v7374_v17, %s4794_s24  ;;  %v2584_v44 = vrot.slane %v7384_v22, 1  ;;  %v7398_v17 = vld [vmem:[#allocation2 + $0x168] sm:$0xff]  ;;  %9546 = vst [vmem:[#allocation113_spill] sm:$0xff] %v7408_v14 }
 0x3fa   : > { %v2586_v35 = vrot.slane %v7398_v17, 1 }
 0x3fb   : > { %v7412_v7 = vsel %vm471_vm2, %v2582_v29, %v2584_v44  ;;  %v2594_v29 = vrot.slane %v7104_v15, 2  ;;  %v2592_v44 = vrot.slane %v7091_v21, 2 }
 0x3fc   : > { %9547 = vst [vmem:[#allocation71_spill] sm:$0xff] %v7412_v7 }
 0x3fd   : > { %2749 = vrot.lane.b32.xlu0 %v7389_v37, %s4794_s24  ;;  %2751 = vrot.lane.b32.xlu1 %v7393_v62, %s4794_s24  ;;  %v2589_v37 = vrot.slane %v7403_v25, 1  ;;  %v2587_v62 = vrot.slane %v7405_v54, 1 }
 0x3ff   : > { %v7421_v36 = vsel %vm471_vm2, %v2586_v35, %v2587_v62  ;;  %v7425_v30 = vsel %vm471_vm2, %v2587_v62, %v2589_v37  ;;  %v2596_v35 = vrot.slane %v7125_v59, 2  ;;  %v2599_v37 = vrot.slane %v7131_v42, 2 }
 0x400   : > { %9548 = vst [vmem:[#allocation83_spill] sm:$0xff] %v7421_v36  ;;  %9549 = vst [vmem:[#allocation114_spill] sm:$0xff] %v7425_v30  ;;  %v2597_v62 = vrot.slane %v7119_v48, 2  ;;  %v2602_v42 = vrot.slane %v7139_v3, 2 }
 0x401   : > { %2753 = vrot.lane.b32.xlu0 %v7408_v14, %s4794_s24  ;;  %2755 = vrot.lane.b32.xlu1 %v7412_v7, %s4794_s24  ;;  %v2593_v7 = vsel %vm552_vm3, %v2591_v19, %v2592_v44  ;;  %v2595_v14 = vsel %vm552_vm3, %v2592_v44, %v2594_v29  ;;  %v2604_v19 = vrot.slane %v7135_v45, 2  ;;  %v2609_v44 = vrot.slane %v7161_v23, 2 }
 0x402   : > { %v7441_v15 = vsel %vm552_vm3, %v2596_v35, %v2597_v62  ;;  %v7445_v21 = vsel %vm552_vm3, %v2597_v62, %v2599_v37  ;;  %v2607_v45 = vrot.slane %v7159_v33, 2  ;;  %v2614_v62 = vrot.slane %v7181_v9, 2 }
 0x403   : > { %v7458_v29 = vsel %vm552_vm3, %v2602_v42, %v2604_v19  ;;  %v2612_v23 = vrot.slane %v7175_v16, 2  ;;  %v2617_v9 = vrot.slane %v7206_v60, 2 }
 0x404   : > { %v7471_v37 = vsel %vm552_vm3, %v2607_v45, %v2609_v44  ;;  %v2619_v44 = vrot.slane %v7203_v2, 2  ;;  %v2622_v2 = vrot.slane %v7231_v18, 2 }
 0x405   : > { %2757 = vrot.lane.b32.xlu0 %v7421_v36, %s4794_s24  ;;  %2759 = vrot.lane.b32.xlu1 %v7425_v30, %s4794_s24  ;;  %v2601_v30 = vrot.slane %v7127_v63, 2 }
 0x406   : > { %v7497_v36 = vsel %vm552_vm3, %v2617_v9, %v2619_v44  ;;  %v2629_v44 = vrot.slane %v7249_v49, 2  ;;  %v2632_v49 = vrot.slane %v7272_v41, 2 }
 0x409   : > { %2793 = vrot.lane.b32.xlu0 %v2593_v7, %s4795_s25  ;;  %2795 = vrot.lane.b32.xlu1 %v2595_v14, %s4795_s25  ;;  %v7454_v14 = vsel %vm552_vm3, %v2601_v30, %v2602_v42  ;;  %v2606_v7 = vrot.slane %v7152_v46, 2  ;;  %v2611_v30 = vrot.slane %v7177_v8, 2  ;;  %v2616_v42 = vrot.slane %v7199_v51, 2 }
 0x40b   : > { %v7467_v35 = vsel %vm552_vm3, %v2606_v7, %v2607_v45  ;;  %v7480_v19 = vsel %vm552_vm3, %v2611_v30, %v2612_v23  ;;  %v7484_v7 = vsel %vm552_vm3, %v2612_v23, %v2614_v62  ;;  %v7493_v45 = vsel %vm552_vm3, %v2616_v42, %v2617_v9 }
 0x40c   : > { %v2621_v30 = vrot.slane %v7222_v39, 2  ;;  %v2624_v62 = vrot.slane %v7229_v61, 2  ;;  %v2626_v42 = vrot.slane %v7243_v1, 2  ;;  %v2627_v61 = vrot.slane %v7253_v12, 2 }
 0x40d   : > { %2797 = vrot.lane.b32.xlu0 %v7441_v15, %s4795_s25  ;;  %2799 = vrot.lane.b32.xlu1 %v7445_v21, %s4795_s25 }
 0x40e   : > { %v7506_v23 = vsel %vm552_vm3, %v2621_v30, %v2622_v2  ;;  %v7510_v55 = vsel %vm552_vm3, %v2622_v2, %v2624_v62  ;;  %v7519_v9 = vsel %vm552_vm3, %v2626_v42, %v2627_v61  ;;  %v2631_v30 = vrot.slane %v7265_v4, 2 }
 0x40f   : > { %v7523_v1 = vsel %vm552_vm3, %v2627_v61, %v2629_v44  ;;  %v2634_v62 = vrot.slane %v7270_v10, 2  ;;  %v2636_v42 = vrot.slane %v7284_v40, 2  ;;  %v2639_v44 = vrot.slane %v7289_v56, 2 }
 0x410   : > { %v7532_v2 = vsel %vm552_vm3, %v2631_v30, %v2632_v49  ;;  %v2637_v10 = vrot.slane %v7291_v11, 2  ;;  %v2641_v30 = vrot.slane %v7303_v0, 2  ;;  %v2642_v56 = vrot.slane %v7310_v53, 2 }
 0x411   : > { %2801 = vrot.lane.b32.xlu0 %v7454_v14, %s4795_s25  ;;  %2803 = vrot.lane.b32.xlu1 %v7458_v29, %s4795_s25  ;;  %v7536_v4 = vsel %vm552_vm3, %v2632_v49, %v2634_v62  ;;  %v2644_v62 = vrot.slane %v7308_v38, 2  ;;  %v2647_v38 = vrot.slane %v7329_v34, 2 }
 0x412   : > { %v7545_v61 = vsel %vm552_vm3, %v2636_v42, %v2637_v10  ;;  %v7549_v40 = vsel %vm552_vm3, %v2637_v10, %v2639_v44  ;;  %v7558_v49 = vsel %vm552_vm3, %v2641_v30, %v2642_v56  ;;  %v2646_v42 = vrot.slane %v7322_v26, 2 }
 0x413   : > { %v7562_v0 = vsel %vm552_vm3, %v2642_v56, %v2644_v62  ;;  %v2649_v44 = vrot.slane %v7327_v13, 2  ;;  %v2651_v30 = vrot.slane %v7341_v58, 2  ;;  %v2654_v62 = vrot.slane %v7346_v43, 2 }
 0x414   : > { %v7571_v10 = vsel %vm552_vm3, %v2646_v42, %v2647_v38  ;;  %v2652_v13 = vrot.slane %v7348_v5, 2  ;;  %v2656_v42 = vrot.slane %v7360_v24, 2  ;;  %v2659_v43 = vrot.slane %v7365_v31, 2 }
 0x415   : > { %2805 = vrot.lane.b32.xlu0 %v7467_v35, %s4795_s25  ;;  %2807 = vrot.lane.b32.xlu1 %v7471_v37, %s4795_s25  ;;  %v7575_v26 = vsel %vm552_vm3, %v2647_v38, %v2649_v44  ;;  %v2657_v5 = vrot.slane %v7367_v6, 2  ;;  %v2661_v24 = vrot.slane %v7379_v50, 2  ;;  %v2664_v31 = vrot.slane %v7384_v22, 2 }
 0x416   : > { %v7584_v56 = vsel %vm552_vm3, %v2651_v30, %v2652_v13  ;;  %v7588_v58 = vsel %vm552_vm3, %v2652_v13, %v2654_v62  ;;  %v2662_v13 = vrot.slane %v7386_v47, 2  ;;  %v2666_v50 = vrot.slane %v7398_v17, 2 }
 0x417   : > { %9550 = vst [vmem:[#allocation84_spill] sm:$0xff] %v7588_v58  ;;  %v7601_v30 = vsel %vm552_vm3, %v2656_v42, %v2657_v5  ;;  %v7605_v62 = vsel %vm552_vm3, %v2657_v5, %v2659_v43  ;;  %v2669_v22 = vrot.slane %v7403_v25, 2  ;;  %v2667_v47 = vrot.slane %v7405_v54, 2 }
 0x418   : > { %9551 = vst [vmem:[#allocation56_spill] sm:$0xff] %v7601_v30  ;;  %9552 = vst [vmem:[#allocation115_spill] sm:$0xff] %v7605_v62  ;;  %v7618_v42 = vsel %vm552_vm3, %v2661_v24, %v2662_v13  ;;  %v7622_v43 = vsel %vm552_vm3, %v2662_v13, %v2664_v31 }
 0x419   : > { %2809 = vrot.lane.b32.xlu0 %v7480_v19, %s4795_s25  ;;  %2811 = vrot.lane.b32.xlu1 %v7484_v7, %s4795_s25  ;;  %9553 = vst [vmem:[#allocation57_spill] sm:$0xff] %v7618_v42  ;;  %9554 = vst [vmem:[#allocation72_spill] sm:$0xff] %v7622_v43  ;;  %v7635_v24 = vsel %vm552_vm3, %v2666_v50, %v2667_v47  ;;  %v7638_v17 = vsel %vm552_vm3, %v2667_v47, %v2669_v22 }
 0x41a   : > { %9555 = vst [vmem:[#allocation85_spill] sm:$0xff] %v7635_v24  ;;  %9556 = vst [vmem:[#allocation73_spill] sm:$0xff] %v7638_v17 }
 0x41d   : > { %2813 = vrot.lane.b32.xlu0 %v7493_v45, %s4795_s25  ;;  %2815 = vrot.lane.b32.xlu1 %v7497_v36, %s4795_s25 }
 0x421   : > { %2817 = vrot.lane.b32.xlu0 %v7506_v23, %s4795_s25  ;;  %2819 = vrot.lane.b32.xlu1 %v7510_v55, %s4795_s25 }
 0x425   : > { %2821 = vrot.lane.b32.xlu0 %v7519_v9, %s4795_s25  ;;  %2823 = vrot.lane.b32.xlu1 %v7523_v1, %s4795_s25 }
 0x429   : > { %2825 = vrot.lane.b32.xlu0 %v7532_v2, %s4795_s25  ;;  %2827 = vrot.lane.b32.xlu1 %v7536_v4, %s4795_s25 }
 0x42d   : > { %2829 = vrot.lane.b32.xlu0 %v7545_v61, %s4795_s25  ;;  %2831 = vrot.lane.b32.xlu1 %v7549_v40, %s4795_s25 }
 0x430   : > { %v7597_v38 = vpop.permute.xlu1 %2699 }
 0x431   : > { %2833 = vrot.lane.b32.xlu0 %v7558_v49, %s4795_s25  ;;  %2835 = vrot.lane.b32.xlu1 %v7562_v0, %s4795_s25  ;;  %v7592_v44 = vpop.permute.xlu0 %2697 }
 0x435   : > { %2837 = vrot.lane.b32.xlu0 %v7571_v10, %s4795_s25  ;;  %2839 = vrot.lane.b32.xlu1 %v7575_v26, %s4795_s25 }
 0x439   : > { %2841 = vrot.lane.b32.xlu0 %v7584_v56, %s4795_s25  ;;  %2843 = vrot.lane.b32.xlu1 %v7588_v58, %s4795_s25 }
 0x43d   : > { %2845 = vrot.lane.b32.xlu0 %v7601_v30, %s4795_s25  ;;  %2847 = vrot.lane.b32.xlu1 %v7605_v62, %s4795_s25 }
 0x43f   : > { %v7613_v58 = vpop.permute.xlu0 %2701  ;;  %v7615_v6 = vpop.permute.xlu1 %2703 }
 0x441   : > { %2849 = vrot.lane.b32.xlu0 %v7618_v42, %s4795_s25  ;;  %2851 = vrot.lane.b32.xlu1 %v7622_v43, %s4795_s25  ;;  %v9584_v42 = vld [vmem:[#allocation64_spill] sm:$0xff] }
 0x443   : > { %v7630_v5 = vpop.permute.xlu0 %2705  ;;  %v7632_v62 = vpop.permute.xlu1 %2707 }
 0x445   : > { %2853 = vrot.lane.b32.xlu0 %v7635_v24, %s4795_s25  ;;  %2855 = vrot.lane.b32.xlu1 %v7638_v17, %s4795_s25 }
 0x447   : > { %v7644_v25 = vpop.permute.xlu0 %2709  ;;  %v7646_v31 = vpop.permute.xlu1 %2711 }
 0x449   : > { %2889 = vrot.lane.b32.xlu0 %v7125_v59, %s4796_s26  ;;  %2891 = vrot.lane.b32.xlu1 %v7119_v48, %s4796_s26  ;;  %v3721_v48 = vld [vmem:[%s9054_s3] sm:$0xff] }
 0x44b   : > { %v7652_v54 = vpop.permute.xlu0 %2713  ;;  %v7654_v13 = vpop.permute.xlu1 %2715 }
 0x44d   : > { %2985 = vrot.lane.b32.xlu0 %v7142_v27, %s4797_s27  ;;  %2987 = vrot.lane.b32.xlu1 %v7147_v57, %s4797_s27  ;;  %v3722_v27 = vld [vmem:[%s9054_s3 + $0x8] sm:$0xff] }
 0x44e   : > { %v4696_v57 = vpack.c.bf16 %v3722_v27, %v3721_v48 }
 0x44f   : > { %v7660_v50 = vpop.permute.xlu0 %2717  ;;  %v7662_v22 = vpop.permute.xlu1 %2719 }
 0x450   : > { %4697 = vmatprep.subr.bf16.mxu1 %v4696_v57 }
 0x451   : > { %3081 = vrot.lane.b32.xlu0 %v7441_v15, %s4798_s11  ;;  %3083 = vrot.lane.b32.xlu1 %v7445_v21, %s4798_s11  ;;  %v3723_v15 = vld [vmem:[%s9054_s3 + $0x10] sm:$0xff]  ;;  %v3724_v21 = vld [vmem:[%s9054_s3 + $0x18] sm:$0xff] }
 0x452   : > { %4699 = vmatpush3.bf16.msra.mxu1 %v4696_v57  ;;  %v4700_v48 = vpack.c.bf16 %v3724_v21, %v3723_v15 }
 0x453   : > { %v7674_v47 = vpop.permute.xlu0 %2721  ;;  %v7676_v17 = vpop.permute.xlu1 %2723 }
 0x454   : > { %4701 = vmatprep.subr.bf16.mxu1 %v4700_v48 }
 0x455   : > { %3177 = vrot.lane.b32.xlu0 %v7127_v63, %s4799_s14  ;;  %2893 = vrot.lane.b32.xlu1 %v7127_v63, %s4796_s26  ;;  %v3725_v63 = vld [vmem:[%s9054_s3 + $0x20] sm:$0xf] }
 0x456   : > { %4703 = vmatpush3.bf16.msra.mxu1 %v4700_v48 }
 0x457   : > { %v7688_v24 = vpop.permute.xlu0 %2725  ;;  %v7690_v27 = vpop.permute.xlu1 %2727  ;;  %4638 = vmatprep.subr.msk.mxu1 %vm1799_vm4, %v3725_v63 }
 0x458   : > { %9557 = vst [vmem:[#allocation30_spill] sm:$0xff] %v7688_v24  ;;  %9558 = vst [vmem:[#allocation86_spill] sm:$0xff] %v7690_v27 }
 0x459   : > { %3179 = vrot.lane.b32.xlu0 %v7139_v3, %s4799_s14  ;;  %3273 = vrot.lane.b32.xlu1 %v7165_v32, %s4800_s15 }
 0x45a   : > { %4639 = vmatpush3.msk.msra.mxu1 %vm1799_vm4, %v3725_v63 }
 0x45b   : > { %v7699_v57 = vpop.permute.xlu0 %2729  ;;  %v7702_v43 = vpop.permute.xlu1 %2731 }
 0x45c   : > { %9559 = vst [vmem:[#allocation116_spill] sm:$0xff] %v7699_v57  ;;  %9560 = vst [vmem:[#allocation58_spill] sm:$0xff] %v7702_v43 }
 0x45d   : > { %2895 = vrot.lane.b32.xlu0 %v7139_v3, %s4796_s26  ;;  %2989 = vrot.lane.b32.xlu1 %v7165_v32, %s4797_s27 }
 0x45f   : > { %v7709_v15 = vpop.permute.xlu0 %2733  ;;  %v7711_v21 = vpop.permute.xlu1 %2735 }
 0x460   : > { %9561 = vst [vmem:[#allocation59_spill] sm:$0xff] %v7709_v15  ;;  %9562 = vst [vmem:[#allocation75_spill] sm:$0xff] %v7711_v21 }
 0x461   : > { %3275 = vrot.lane.b32.xlu0 %v7169_v52, %s4800_s15  ;;  %3369 = vrot.lane.b32.xlu1 %v7454_v14, %s4801_s16 }
 0x463   : > { %v7717_v48 = vpop.permute.xlu0 %2737  ;;  %v7719_v43 = vpop.permute.xlu1 %2739 }
 0x464   : > { %9563 = vst [vmem:[#allocation87_spill] sm:$0xff] %v7717_v48  ;;  %9564 = vst [vmem:[#allocation34_spill] sm:$0xff] %v7719_v43 }
 0x465   : > { %2991 = vrot.lane.b32.xlu0 %v7169_v52, %s4797_s27  ;;  %3085 = vrot.lane.b32.xlu1 %v7454_v14, %s4798_s11 }
 0x467   : > { %v7725_v3 = vpop.permute.xlu0 %2741  ;;  %v7727_v32 = vpop.permute.xlu1 %2743 }
 0x468   : > { %9565 = vst [vmem:[#allocation53_spill] sm:$0xff] %v7725_v3  ;;  %9566 = vst [vmem:[#allocation88_spill] sm:$0xff] %v7727_v32  ;;  %v9576_v3 = vld [vmem:[#allocation47_spill] sm:$0xff] }
 0x469   : > { %3371 = vrot.lane.b32.xlu0 %v7458_v29, %s4801_s16  ;;  %3087 = vrot.lane.b32.xlu1 %v7458_v29, %s4798_s11 }
 0x46b   : > { %v7733_v63 = vpop.permute.xlu0 %2745  ;;  %v7735_v48 = vpop.permute.xlu1 %2747 }
 0x46c   : > { %9567 = vst [vmem:[#allocation76_spill] sm:$0xff] %v7733_v63  ;;  %9568 = vst [vmem:[#allocation106_spill] sm:$0xff] %v7735_v48 }
 0x46d   : > { %3181 = vrot.lane.b32.xlu0 %v7152_v46, %s4799_s14  ;;  %2897 = vrot.lane.b32.xlu1 %v7152_v46, %s4796_s26 }
 0x46f   : > { %v7741_v52 = vpop.permute.xlu0 %2749  ;;  %v7743_v14 = vpop.permute.xlu1 %2751 }
 0x470   : > { %9569 = vst [vmem:[#allocation107_spill] sm:$0xff] %v7741_v52  ;;  %9570 = vst [vmem:[#allocation35_spill] sm:$0xff] %v7743_v14 }
 0x471   : > { %3183 = vrot.lane.b32.xlu0 %v7159_v33, %s4799_s14  ;;  %3277 = vrot.lane.b32.xlu1 %v7187_v28, %s4800_s15 }
 0x473   : > { %v7749_v29 = vpop.permute.xlu0 %2753  ;;  %v7751_v63 = vpop.permute.xlu1 %2755 }
 0x474   : > { %9571 = vst [vmem:[#allocation89_spill] sm:$0xff] %v7749_v29  ;;  %9572 = vst [vmem:[#allocation36_spill] sm:$0xff] %v7751_v63  ;;  %v9575_v63 = vld [vmem:[#allocation74_spill] sm:$0xff] }
 0x475   : > { %2899 = vrot.lane.b32.xlu0 %v7159_v33, %s4796_s26  ;;  %2993 = vrot.lane.b32.xlu1 %v7187_v28, %s4797_s27 }
 0x477   : > { %v7757_v46 = vpop.permute.xlu0 %2757  ;;  %v7759_v52 = vpop.permute.xlu1 %2759 }
 0x478   : > { %9573 = vst [vmem:[#allocation121_spill] sm:$0xff] %v7757_v46  ;;  %9574 = vst [vmem:[#allocation90_spill] sm:$0xff] %v7759_v52 }
 0x479   : > { %3279 = vrot.lane.b32.xlu0 %v7193_v20, %s4800_s15  ;;  %3373 = vrot.lane.b32.xlu1 %v7467_v35, %s4801_s16 }
 0x47b   : > { %v7765_v14 = vpop.permute.xlu0 %2793  ;;  %v7767_v29 = vpop.permute.xlu1 %2795 }
 0x47d   : > { %2995 = vrot.lane.b32.xlu0 %v7193_v20, %s4797_s27  ;;  %3089 = vrot.lane.b32.xlu1 %v7467_v35, %s4798_s11 }
 0x47f   : > { %v7773_v33 = vpop.permute.xlu0 %2797  ;;  %v7775_v28 = vpop.permute.xlu1 %2799 }
 0x481   : > { %3375 = vrot.lane.b32.xlu0 %v7471_v37, %s4801_s16  ;;  %3091 = vrot.lane.b32.xlu1 %v7471_v37, %s4798_s11 }
 0x483   : > { %v7781_v52 = vpop.permute.xlu0 %2801  ;;  %v7783_v46 = vpop.permute.xlu1 %2803 }
 0x485   : > { %3185 = vrot.lane.b32.xlu0 %v7177_v8, %s4799_s14  ;;  %2901 = vrot.lane.b32.xlu1 %v7177_v8, %s4796_s26 }
 0x487   : > { %v7789_v20 = vpop.permute.xlu0 %2805  ;;  %v7791_v35 = vpop.permute.xlu1 %2807 }
 0x489   : > { %3187 = vrot.lane.b32.xlu0 %v7175_v16, %s4799_s14  ;;  %3281 = vrot.lane.b32.xlu1 %v9575_v63, %s4800_s15 }
 0x48b   : > { %v7797_v37 = vpop.permute.xlu0 %2809  ;;  %v7799_v48 = vpop.permute.xlu1 %2811 }
 0x48d   : > { %2903 = vrot.lane.b32.xlu0 %v7175_v16, %s4796_s26  ;;  %2997 = vrot.lane.b32.xlu1 %v9575_v63, %s4797_s27 }
 0x48f   : > { %v7805_v8 = vpop.permute.xlu0 %2813  ;;  %v7807_v32 = vpop.permute.xlu1 %2815 }
 0x491   : > { %3283 = vrot.lane.b32.xlu0 %v9576_v3, %s4800_s15  ;;  %3377 = vrot.lane.b32.xlu1 %v7480_v19, %s4801_s16 }
 0x493   : > { %v7813_v43 = vpop.permute.xlu0 %2817  ;;  %v7815_v21 = vpop.permute.xlu1 %2819 }
 0x494   : > { %9577 = vst [vmem:[#allocation37_spill] sm:$0xff] %v7815_v21  ;;  %v9602_v21 = vld [vmem:[#allocation78_spill] sm:$0xff] }
 0x495   : > { %2999 = vrot.lane.b32.xlu0 %v9576_v3, %s4797_s27  ;;  %3093 = vrot.lane.b32.xlu1 %v7480_v19, %s4798_s11 }
 0x497   : > { %v7821_v16 = vpop.permute.xlu0 %2821  ;;  %v7823_v63 = vpop.permute.xlu1 %2823 }
 0x498   : > { %9578 = vst [vmem:[#allocation91_spill] sm:$0xff] %v7821_v16  ;;  %9579 = vst [vmem:[#allocation38_spill] sm:$0xff] %v7823_v63  ;;  %v9601_v63 = vld [vmem:[#allocation63_spill] sm:$0xff] }
 0x499   : > { %3379 = vrot.lane.b32.xlu0 %v7484_v7, %s4801_s16  ;;  %3095 = vrot.lane.b32.xlu1 %v7484_v7, %s4798_s11 }
 0x49b   : > { %v7829_v15 = vpop.permute.xlu0 %2825  ;;  %v7831_v57 = vpop.permute.xlu1 %2827 }
 0x49c   : > { %9580 = vst [vmem:[#allocation92_spill] sm:$0xff] %v7829_v15  ;;  %9581 = vst [vmem:[#allocation39_spill] sm:$0xff] %v7831_v57 }
 0x49d   : > { %3189 = vrot.lane.b32.xlu0 %v7199_v51, %s4799_s14  ;;  %2905 = vrot.lane.b32.xlu1 %v7199_v51, %s4796_s26 }
 0x49f   : > { %v7837_v19 = vpop.permute.xlu0 %2829  ;;  %v7839_v3 = vpop.permute.xlu1 %2831 }
 0x4a0   : > { %9582 = vst [vmem:[#allocation93_spill] sm:$0xff] %v7837_v19  ;;  %9583 = vst [vmem:[#allocation40_spill] sm:$0xff] %v7839_v3  ;;  %v9589_v3 = vld [vmem:[#allocation105_spill] sm:$0xff] }
 0x4a1   : > { %3191 = vrot.lane.b32.xlu0 %v7206_v60, %s4799_s14  ;;  %3285 = vrot.lane.b32.xlu1 %v9584_v42, %s4800_s15 }
 0x4a3   : > { %v7845_v7 = vpop.permute.xlu0 %2833  ;;  %v7847_v15 = vpop.permute.xlu1 %2835 }
 0x4a4   : > { %9585 = vst [vmem:[#allocation122_spill] sm:$0xff] %v7845_v7  ;;  %9586 = vst [vmem:[#allocation94_spill] sm:$0xff] %v7847_v15  ;;  %v9600_v15 = vld [vmem:[#allocation65_spill] sm:$0xff] }
 0x4a5   : > { %2907 = vrot.lane.b32.xlu0 %v7206_v60, %s4796_s26  ;;  %3001 = vrot.lane.b32.xlu1 %v9584_v42, %s4797_s27 }
 0x4a7   : > { %v7853_v51 = vpop.permute.xlu0 %2837  ;;  %v7855_v19 = vpop.permute.xlu1 %2839 }
 0x4a8   : > { %9587 = vst [vmem:[#allocation41_spill] sm:$0xff] %v7853_v51  ;;  %9588 = vst [vmem:[#allocation123_spill] sm:$0xff] %v7855_v19 }
 0x4a9   : > { %3287 = vrot.lane.b32.xlu0 %v9589_v3, %s4800_s15  ;;  %3381 = vrot.lane.b32.xlu1 %v7493_v45, %s4801_s16 }
 0x4ab   : > { %v7861_v57 = vpop.permute.xlu0 %2841  ;;  %v7863_v7 = vpop.permute.xlu1 %2843 }
 0x4ac   : > { %9590 = vst [vmem:[#allocation95_spill] sm:$0xff] %v7861_v57  ;;  %9591 = vst [vmem:[#allocation42_spill] sm:$0xff] %v7863_v7 }
 0x4ad   : > { %3003 = vrot.lane.b32.xlu0 %v9589_v3, %s4797_s27  ;;  %3097 = vrot.lane.b32.xlu1 %v7493_v45, %s4798_s11 }
 0x4af   : > { %v7869_v60 = vpop.permute.xlu0 %2845  ;;  %v7871_v42 = vpop.permute.xlu1 %2847 }
 0x4b0   : > { %9592 = vst [vmem:[#allocation124_spill] sm:$0xff] %v7869_v60  ;;  %9593 = vst [vmem:[#allocation60_spill] sm:$0xff] %v7871_v42  ;;  %v9598_v42 = vld [vmem:[#allocation77_spill] sm:$0xff] }
 0x4b1   : > { %3383 = vrot.lane.b32.xlu0 %v7497_v36, %s4801_s16  ;;  %3099 = vrot.lane.b32.xlu1 %v7497_v36, %s4798_s11 }
 0x4b3   : > { %v7877_v19 = vpop.permute.xlu0 %2849  ;;  %v7879_v57 = vpop.permute.xlu1 %2851 }
 0x4b4   : > { %9594 = vst [vmem:[#allocation96_spill] sm:$0xff] %v7877_v19  ;;  %9595 = vst [vmem:[#allocation43_spill] sm:$0xff] %v7879_v57 }
 0x4b5   : > { %3193 = vrot.lane.b32.xlu0 %v7222_v39, %s4799_s14  ;;  %2909 = vrot.lane.b32.xlu1 %v7222_v39, %s4796_s26 }
 0x4b7   : > { %v7885_v45 = vpop.permute.xlu0 %2853  ;;  %v7887_v3 = vpop.permute.xlu1 %2855 }
 0x4b8   : > { %9596 = vst [vmem:[#allocation125_spill] sm:$0xff] %v7885_v45  ;;  %9597 = vst [vmem:[#allocation61_spill] sm:$0xff] %v7887_v3  ;;  %v9599_v45 = vld [vmem:[#allocation48_spill] sm:$0xff] }
 0x4b9   : > { %3195 = vrot.lane.b32.xlu0 %v7231_v18, %s4799_s14  ;;  %3289 = vrot.lane.b32.xlu1 %v9598_v42, %s4800_s15 }
 0x4bb   : > { %v2890_v36 = vpop.permute.xlu0 %2889  ;;  %v2892_v19 = vpop.permute.xlu1 %2891 }
 0x4bd   : > { %2911 = vrot.lane.b32.xlu0 %v7231_v18, %s4796_s26  ;;  %3005 = vrot.lane.b32.xlu1 %v9598_v42, %s4797_s27 }
 0x4bf   : > { %v2986_v57 = vpop.permute.xlu0 %2985  ;;  %v2988_v39 = vpop.permute.xlu1 %2987 }
 0x4c1   : > { %3291 = vrot.lane.b32.xlu0 %v9599_v45, %s4800_s15  ;;  %3385 = vrot.lane.b32.xlu1 %v7506_v23, %s4801_s16 }
 0x4c3   : > { %v3082_v3 = vpop.permute.xlu0 %3081  ;;  %v3084_v60 = vpop.permute.xlu1 %3083 }
 0x4c5   : > { %3007 = vrot.lane.b32.xlu0 %v9599_v45, %s4797_s27  ;;  %3101 = vrot.lane.b32.xlu1 %v7506_v23, %s4798_s11  ;;  %v3465_v45 = vsel %vm258_vm0, %v9601_v63, %v7592_v44 }
 0x4c6   : > { %v3497_v23 = vsel %vm1459_vm5, %v3465_v45, %v7765_v14  ;;  %v4756_v45 = vld [vmem:[#allocation2 + $0x8] sm:$0xff] }
 0x4c7   : > { %v3178_v18 = vpop.permute.xlu0 %3177  ;;  %v2894_v7 = vpop.permute.xlu1 %2893  ;;  %v3529_v16 = vsel %vm1492_vm6, %v3497_v23, %v2890_v36  ;;  %v3466_v36 = vsel %vm258_vm0, %v4756_v45, %v7597_v38 }
 0x4c9   : > { %3387 = vrot.lane.b32.xlu0 %v7510_v55, %s4801_s16  ;;  %3103 = vrot.lane.b32.xlu1 %v7510_v55, %s4798_s11  ;;  %v3561_v55 = vsel %vm1525_vm7, %v3529_v16, %v2986_v57  ;;  %v3498_v16 = vsel %vm1459_vm5, %v3466_v36, %v7767_v29 }
 0x4ca   : > { %v3593_v30 = vsel %vm1558_vm8, %v3561_v55, %v3082_v3 }
 0x4cb   : > { %v3180_v42 = vpop.permute.xlu0 %3179  ;;  %v3274_v51 = vpop.permute.xlu1 %3273  ;;  %v3625_v44 = vsel %vm1591_vm9, %v3593_v30, %v3178_v18  ;;  %v3530_v30 = vsel %vm1492_vm6, %v3498_v16, %v2892_v19 }
 0x4cc   : > { %v3657_v63 = vsel %vm1624_vm10, %v3625_v44, %v3274_v51  ;;  %v3562_v3 = vsel %vm1525_vm7, %v3530_v30, %v2988_v39 }
 0x4cd   : > { %3197 = vrot.lane.b32.xlu0 %v9600_v15, %s4799_s14  ;;  %2913 = vrot.lane.b32.xlu1 %v9600_v15, %s4796_s26  ;;  %v3594_v38 = vsel %vm1558_vm8, %v3562_v3, %v3084_v60  ;;  %v4757_v3 = vld [vmem:[#allocation2 + $0x20] sm:$0xff] }
 0x4ce   : > { %v3626_v23 = vsel %vm1591_vm9, %v3594_v38, %v3180_v42 }
 0x4cf   : > { %v2896_v27 = vpop.permute.xlu0 %2895  ;;  %v2990_v24 = vpop.permute.xlu1 %2989 }
 0x4d1   : > { %3199 = vrot.lane.b32.xlu0 %v7253_v12, %s4799_s14  ;;  %3293 = vrot.lane.b32.xlu1 %v9602_v21, %s4800_s15 }
 0x4d3   : > { %v3276_v15 = vpop.permute.xlu0 %3275  ;;  %v3370_v14 = vpop.permute.xlu1 %3369 }
 0x4d4   : > { %v3689_v57 = vsel %vm1657_vm11, %v3657_v63, %v3370_v14  ;;  %v3467_v63 = vsel %vm258_vm0, %v7125_v59, %v7613_v58  ;;  %v9605_v59 = vld [vmem:[#allocation109_spill] sm:$0xff] }
 0x4d5   : > { %2915 = vrot.lane.b32.xlu0 %v7253_v12, %s4796_s26  ;;  %3009 = vrot.lane.b32.xlu1 %v9602_v21, %s4797_s27  ;;  %v9603_v12 = vld [vmem:[#allocation49_spill] sm:$0xff]  ;;  %v3658_v21 = vsel %vm1624_vm10, %v3626_v23, %v3276_v15  ;;  %v9604_v15 = vld [vmem:[#allocation108_spill] sm:$0xff] }
 0x4d6   : > { %4640 = vmatprep.mubr.msk.f32.mxu1 %vm1702_vm12, %v3689_v57 }
 0x4d7   : > { %v2992_v51 = vpop.permute.xlu0 %2991  ;;  %v3086_v18 = vpop.permute.xlu1 %3085 }
 0x4d9   : > { %3295 = vrot.lane.b32.xlu0 %v9603_v12, %s4800_s15  ;;  %3389 = vrot.lane.b32.xlu1 %v7519_v9, %s4801_s16 }
 0x4db   : > { %v3372_v29 = vpop.permute.xlu0 %3371  ;;  %v3088_v55 = vpop.permute.xlu1 %3087 }
 0x4dc   : > { %v3690_v19 = vsel %vm1657_vm11, %v3658_v21, %v3372_v29  ;;  %v9606_v29 = vld [vmem:[#allocation67_spill] sm:$0xff] }
 0x4dd   : > { %3011 = vrot.lane.b32.xlu0 %v9603_v12, %s4797_s27  ;;  %4641 = vmatmul.mubr.msk.f32.vlgmr.msra.gmra.mrb[0].mxu1 %vm1702_vm12, %v3690_v19 }
 0x4de   : > { %3105 = vrot.lane.b32.xlu1 %v7519_v9, %s4798_s11  ;;  %v3499_v9 = vsel %vm1459_vm5, %v3467_v63, %v7773_v33  ;;  %v4758_v63 = vld [vmem:[#allocation2 + $0x30] sm:$0xff] }
 0x4df   : > { %v3182_v60 = vpop.permute.xlu0 %3181  ;;  %v2898_v39 = vpop.permute.xlu1 %2897  ;;  %v3531_v45 = vsel %vm1492_vm6, %v3499_v9, %v2894_v7  ;;  %v3468_v7 = vsel %vm258_vm0, %v4757_v3, %v7615_v6  ;;  %v3469_v9 = vsel %vm258_vm0, %v4758_v63, %v7630_v5  ;;  %v9608_v5 = vld [vmem:[#allocation110_spill] sm:$0xff] }
 0x4e0   : > { %v3563_v36 = vsel %vm1525_vm7, %v3531_v45, %v2990_v24 }
 0x4e1   : > { %3391 = vrot.lane.b32.xlu0 %v7523_v1, %s4801_s16  ;;  %v3595_v57 = vsel %vm1558_vm8, %v3563_v36, %v3086_v18  ;;  %v3500_v18 = vsel %vm1459_vm5, %v3468_v7, %v7775_v28 }
 0x4e2   : > { %3107 = vrot.lane.b32.xlu1 %v7523_v1, %s4798_s11  ;;  %v3627_v58 = vsel %vm1591_vm9, %v3595_v57, %v3182_v60  ;;  %v3532_v38 = vsel %vm1492_vm6, %v3500_v18, %v2896_v27 }
 0x4e3   : > { %v3184_v42 = vpop.permute.xlu0 %3183  ;;  %v3278_v44 = vpop.permute.xlu1 %3277  ;;  %v3564_v23 = vsel %vm1525_vm7, %v3532_v38, %v2992_v51 }
 0x4e4   : > { %v3659_v33 = vsel %vm1624_vm10, %v3627_v58, %v3278_v44  ;;  %v3596_v6 = vsel %vm1558_vm8, %v3564_v23, %v3088_v55  ;;  %v9609_v23 = vld [vmem:[#allocation80_spill] sm:$0xff] }
 0x4e5   : > { %3201 = vrot.lane.b32.xlu0 %v9604_v15, %s4799_s14 }
 0x4e6   : > { %2917 = vrot.lane.b32.xlu1 %v9604_v15, %s4796_s26  ;;  %v9607_v15 = vld [vmem:[#allocation66_spill] sm:$0xff] }
 0x4e7   : > { %v7965_v14 = vpop.permute.xlu0 %2899  ;;  %v2994_v1 = vpop.permute.xlu1 %2993 }
 0x4e9   : > { %3203 = vrot.lane.b32.xlu0 %v7272_v41, %s4799_s14 }
 0x4ea   : > { %3297 = vrot.lane.b32.xlu1 %v9605_v59, %s4800_s15 }
 0x4eb   : > { %v3280_v16 = vpop.permute.xlu0 %3279  ;;  %v3374_v30 = vpop.permute.xlu1 %3373 }
 0x4ec   : > { %v3691_v24 = vsel %vm1657_vm11, %v3659_v33, %v3374_v30  ;;  %v4759_v30 = vld [vmem:[#allocation2 + $0x38] sm:$0xff] }
 0x4ed   : > { %2919 = vrot.lane.b32.xlu0 %v7272_v41, %s4796_s26  ;;  %4643 = vmatprep.mubr.msk.f32.mxu1 %vm1702_vm12, %v3691_v24  ;;  %v3628_v41 = vsel %vm1591_vm9, %v3596_v6, %v3184_v42 }
 0x4ee   : > { %3013 = vrot.lane.b32.xlu1 %v9605_v59, %s4797_s27  ;;  %v3660_v28 = vsel %vm1624_vm10, %v3628_v41, %v3280_v16 }
 0x4ef   : > { %v2996_v12 = vpop.permute.xlu0 %2995  ;;  %v3090_v21 = vpop.permute.xlu1 %3089 }
 0x4f1   : > { %3299 = vrot.lane.b32.xlu0 %v9606_v29, %s4800_s15 }
 0x4f2   : > { %3393 = vrot.lane.b32.xlu1 %v7532_v2, %s4801_s16 }
 0x4f3   : > { %v3376_v19 = vpop.permute.xlu0 %3375  ;;  %v3092_v60 = vpop.permute.xlu1 %3091 }
 0x4f4   : > { %v3692_v27 = vsel %vm1657_vm11, %v3660_v28, %v3376_v19  ;;  %v9610_v19 = vld [vmem:[#allocation79_spill] sm:$0xff] }
 0x4f5   : > { %3015 = vrot.lane.b32.xlu0 %v9606_v29, %s4797_s27  ;;  %4644 = vmatmul.mubr.msk.f32.gmra.mrb[2].mxu1 %vm1702_vm12, %v3692_v27 }
 0x4f6   : > { %3109 = vrot.lane.b32.xlu1 %v7532_v2, %s4798_s11  ;;  %v3501_v2 = vsel %vm1459_vm5, %v3469_v9, %v7781_v52 }
 0x4f7   : > { %v3186_v51 = vpop.permute.xlu0 %3185  ;;  %v2902_v55 = vpop.permute.xlu1 %2901  ;;  %v3533_v36 = vsel %vm1492_vm6, %v3501_v2, %v2898_v39  ;;  %v3470_v39 = vsel %vm258_vm0, %v4759_v30, %v7632_v62 }
 0x4f8   : > { %v3565_v57 = vsel %vm1525_vm7, %v3533_v36, %v2994_v1  ;;  %v3502_v3 = vsel %vm1459_vm5, %v3470_v39, %v7783_v46  ;;  %v4761_v36 = vld [vmem:[#allocation2 + $0x50] sm:$0xff] }
 0x4f9   : > { %3395 = vrot.lane.b32.xlu0 %v7536_v4, %s4801_s16  ;;  %v3597_v59 = vsel %vm1558_vm8, %v3565_v57, %v3090_v21  ;;  %v3534_v7 = vsel %vm1492_vm6, %v3502_v3, %v7965_v14 }
 0x4fa   : > { %3111 = vrot.lane.b32.xlu1 %v7536_v4, %s4798_s11  ;;  %v3629_v58 = vsel %vm1591_vm9, %v3597_v59, %v3186_v51  ;;  %v3566_v18 = vsel %vm1525_vm7, %v3534_v7, %v2996_v12 }
 0x4fb   : > { %v3188_v42 = vpop.permute.xlu0 %3187  ;;  %v3282_v44 = vpop.permute.xlu1 %3281  ;;  %v3598_v38 = vsel %vm1558_vm8, %v3566_v18, %v3092_v60  ;;  %v4760_v60 = vld [vmem:[#allocation2 + $0x48] sm:$0xff]  ;;  %v4762_v18 = vld [vmem:[#allocation2 + $0x60] sm:$0xff] }
 0x4fc   : > { %v3661_v52 = vsel %vm1624_vm10, %v3629_v58, %v3282_v44  ;;  %v3471_v27 = vsel %vm258_vm0, %v4760_v60, %v7644_v25  ;;  %v9611_v25 = vld [vmem:[#allocation68_spill] sm:$0xff] }
 0x4fd   : > { %3205 = vrot.lane.b32.xlu0 %v9607_v15, %s4799_s14 }
 0x4fe   : > { %2921 = vrot.lane.b32.xlu1 %v9607_v15, %s4796_s26 }
 0x4ff   : > { %v8013_v45 = vpop.permute.xlu0 %2903  ;;  %v2998_v4 = vpop.permute.xlu1 %2997 }
 0x501   : > { %3207 = vrot.lane.b32.xlu0 %v7291_v11, %s4799_s14 }
 0x502   : > { %3301 = vrot.lane.b32.xlu1 %v9608_v5, %s4800_s15 }
 0x503   : > { %v3284_v16 = vpop.permute.xlu0 %3283  ;;  %v3378_v33 = vpop.permute.xlu1 %3377 }
 0x504   : > { %v3693_v1 = vsel %vm1657_vm11, %v3661_v52, %v3378_v33  ;;  %v9612_v52 = vld [vmem:[#allocation111_spill] sm:$0xff] }
 0x505   : > { %2923 = vrot.lane.b32.xlu0 %v7291_v11, %s4796_s26  ;;  %4646 = vmatprep.mubr.msk.f32.mxu1 %vm1702_vm12, %v3693_v1  ;;  %v3630_v11 = vsel %vm1591_vm9, %v3598_v38, %v3188_v42 }
 0x506   : > { %3017 = vrot.lane.b32.xlu1 %v9608_v5, %s4797_s27  ;;  %v3662_v46 = vsel %vm1624_vm10, %v3630_v11, %v3284_v16 }
 0x507   : > { %v3000_v24 = vpop.permute.xlu0 %2999  ;;  %v3094_v62 = vpop.permute.xlu1 %3093 }
 0x509   : > { %3303 = vrot.lane.b32.xlu0 %v9609_v23, %s4800_s15 }
 0x50a   : > { %3397 = vrot.lane.b32.xlu1 %v7545_v61, %s4801_s16 }
 0x50b   : > { %v3380_v21 = vpop.permute.xlu0 %3379  ;;  %v3096_v6 = vpop.permute.xlu1 %3095 }
 0x50c   : > { %v3694_v14 = vsel %vm1657_vm11, %v3662_v46, %v3380_v21 }
 0x50d   : > { %3019 = vrot.lane.b32.xlu0 %v9609_v23, %s4797_s27  ;;  %4647 = vmatmul.mubr.msk.f32.gmra.mrb[4].mxu1 %vm1702_vm12, %v3694_v14 }
 0x50e   : > { %3113 = vrot.lane.b32.xlu1 %v7545_v61, %s4798_s11  ;;  %v3503_v61 = vsel %vm1459_vm5, %v3471_v27, %v7789_v20 }
 0x50f   : > { %v3190_v12 = vpop.permute.xlu0 %3189  ;;  %v2906_v29 = vpop.permute.xlu1 %2905  ;;  %v3535_v42 = vsel %vm1492_vm6, %v3503_v61, %v2902_v55  ;;  %v3472_v55 = vsel %vm258_vm0, %v4761_v36, %v7646_v31 }
 0x510   : > { %v3567_v44 = vsel %vm1525_vm7, %v3535_v42, %v2998_v4  ;;  %v3504_v57 = vsel %vm1459_vm5, %v3472_v55, %v7791_v35  ;;  %v9615_v42 = vld [vmem:[#allocation81_spill] sm:$0xff] }
 0x511   : > { %3399 = vrot.lane.b32.xlu0 %v7549_v40, %s4801_s16  ;;  %v3599_v15 = vsel %vm1558_vm8, %v3567_v44, %v3094_v62  ;;  %v3536_v59 = vsel %vm1492_vm6, %v3504_v57, %v8013_v45  ;;  %v3473_v62 = vsel %vm258_vm0, %v4762_v18, %v7652_v54  ;;  %v9614_v54 = vld [vmem:[#allocation69_spill] sm:$0xff] }
 0x512   : > { %3115 = vrot.lane.b32.xlu1 %v7549_v40, %s4798_s11  ;;  %v3631_v63 = vsel %vm1591_vm9, %v3599_v15, %v3190_v12  ;;  %v3568_v58 = vsel %vm1525_vm7, %v3536_v59, %v3000_v24  ;;  %v9613_v24 = vld [vmem:[#allocation52_spill] sm:$0xff]  ;;  %v4763_v12 = vld [vmem:[#allocation2 + $0x68] sm:$0xff] }
 0x513   : > { %v3192_v41 = vpop.permute.xlu0 %3191  ;;  %v3286_v28 = vpop.permute.xlu1 %3285  ;;  %v3600_v16 = vsel %vm1558_vm8, %v3568_v58, %v3096_v6  ;;  %v8166_v59 = vld [vmem:[#allocation2 + $0x128] sm:$0xff] }
 0x514   : > { %v3663_v20 = vsel %vm1624_vm10, %v3631_v63, %v3286_v28 }
 0x515   : > { %3209 = vrot.lane.b32.xlu0 %v9610_v19, %s4799_s14 }
 0x516   : > { %2925 = vrot.lane.b32.xlu1 %v9610_v19, %s4796_s26 }
 0x517   : > { %v8062_v51 = vpop.permute.xlu0 %2907  ;;  %v3002_v40 = vpop.permute.xlu1 %3001 }
 0x519   : > { %3211 = vrot.lane.b32.xlu0 %v7310_v53, %s4799_s14 }
 0x51a   : > { %3305 = vrot.lane.b32.xlu1 %v9611_v25, %s4800_s15 }
 0x51b   : > { %v3288_v9 = vpop.permute.xlu0 %3287  ;;  %v3382_v2 = vpop.permute.xlu1 %3381 }
 0x51c   : > { %v3695_v4 = vsel %vm1657_vm11, %v3663_v20, %v3382_v2  ;;  %v8152_v20 = vld [vmem:[#allocation2 + $0x120] sm:$0xff]  ;;  %v4765_v2 = vld [vmem:[#allocation2 + $0x78] sm:$0xff] }
 0x51d   : > { %2927 = vrot.lane.b32.xlu0 %v7310_v53, %s4796_s26  ;;  %4649 = vmatprep.mubr.msk.f32.mxu1 %vm1702_vm12, %v3695_v4  ;;  %v3632_v53 = vsel %vm1591_vm9, %v3600_v16, %v3192_v41  ;;  %v3475_v36 = vsel %vm258_vm0, %v4765_v2, %v7660_v50 }
 0x51e   : > { %3021 = vrot.lane.b32.xlu1 %v9611_v25, %s4797_s27  ;;  %v3664_v35 = vsel %vm1624_vm10, %v3632_v53, %v3288_v9 }
 0x51f   : > { %v3004_v5 = vpop.permute.xlu0 %3003  ;;  %v3098_v31 = vpop.permute.xlu1 %3097 }
 0x521   : > { %3307 = vrot.lane.b32.xlu0 %v9612_v52, %s4800_s15 }
 0x522   : > { %3401 = vrot.lane.b32.xlu1 %v7558_v49, %s4801_s16 }
 0x523   : > { %v3384_v33 = vpop.permute.xlu0 %3383  ;;  %v3100_v30 = vpop.permute.xlu1 %3099 }
 0x524   : > { %v3696_v45 = vsel %vm1657_vm11, %v3664_v35, %v3384_v33 }
 0x525   : > { %3023 = vrot.lane.b32.xlu0 %v9612_v52, %s4797_s27  ;;  %4650 = vmatmul.mubr.msk.f32.gmra.mrb[6].mxu1 %vm1702_vm12, %v3696_v45  ;;  %v4767_v52 = vld [vmem:[#allocation2 + $0x80] sm:$0xff] }
 0x526   : > { %3117 = vrot.lane.b32.xlu1 %v7558_v49, %s4798_s11  ;;  %v3505_v49 = vsel %vm1459_vm5, %v3473_v62, %v7797_v37  ;;  %v3476_v53 = vsel %vm258_vm0, %v4767_v52, %v7662_v22 }
 0x527   : > { %v3194_v39 = vpop.permute.xlu0 %3193  ;;  %v2910_v1 = vpop.permute.xlu1 %2909  ;;  %v3537_v23 = vsel %vm1492_vm6, %v3505_v49, %v2906_v29  ;;  %v3474_v29 = vsel %vm258_vm0, %v4763_v12, %v7654_v13  ;;  %v3508_v33 = vsel %vm1459_vm5, %v3476_v53, %v7807_v32 }
 0x528   : > { %v3569_v11 = vsel %vm1525_vm7, %v3537_v23, %v3002_v40  ;;  %v3506_v28 = vsel %vm1459_vm5, %v3474_v29, %v7799_v48  ;;  %v9618_v23 = vld [vmem:[#allocation84_spill] sm:$0xff]  ;;  %v8219_v29 = vld [vmem:[#allocation2 + $0x140] sm:$0xff] }
 0x529   : > { %3403 = vrot.lane.b32.xlu0 %v7562_v0, %s4801_s16  ;;  %v3601_v46 = vsel %vm1558_vm8, %v3569_v11, %v3098_v31  ;;  %v3538_v19 = vsel %vm1492_vm6, %v3506_v28, %v8062_v51 }
 0x52a   : > { %3119 = vrot.lane.b32.xlu1 %v7562_v0, %s4798_s11  ;;  %v3633_v21 = vsel %vm1591_vm9, %v3601_v46, %v3194_v39  ;;  %v3570_v27 = vsel %vm1525_vm7, %v3538_v19, %v3004_v5  ;;  %v9616_v5 = vld [vmem:[#allocation112_spill] sm:$0xff] }
 0x52b   : > { %v3196_v3 = vpop.permute.xlu0 %3195  ;;  %v3290_v7 = vpop.permute.xlu1 %3289  ;;  %v3602_v61 = vsel %vm1558_vm8, %v3570_v27, %v3100_v30  ;;  %v8205_v46 = vld [vmem:[#allocation2 + $0x138] sm:$0xff] }
 0x52c   : > { %v3665_v37 = vsel %vm1624_vm10, %v3633_v21, %v3290_v7  ;;  %v4771_v27 = vld [vmem:[#allocation2 + $0x98] sm:$0xff] }
 0x52d   : > { %3213 = vrot.lane.b32.xlu0 %v9613_v24, %s4799_s14 }
 0x52e   : > { %2929 = vrot.lane.b32.xlu1 %v9613_v24, %s4796_s26 }
 0x52f   : > { %v8111_v38 = vpop.permute.xlu0 %2911  ;;  %v3006_v0 = vpop.permute.xlu1 %3005 }
 0x530   : > { %v3540_v30 = vsel %vm1492_vm6, %v3508_v33, %v8111_v38 }
 0x531   : > { %3215 = vrot.lane.b32.xlu0 %v7329_v34, %s4799_s14 }
 0x532   : > { %3309 = vrot.lane.b32.xlu1 %v9614_v54, %s4800_s15 }
 0x533   : > { %v3292_v6 = vpop.permute.xlu0 %3291  ;;  %v3386_v14 = vpop.permute.xlu1 %3385 }
 0x534   : > { %v3697_v41 = vsel %vm1657_vm11, %v3665_v37, %v3386_v14 }
 0x535   : > { %2931 = vrot.lane.b32.xlu0 %v7329_v34, %s4796_s26  ;;  %4652 = vmatprep.mubr.msk.f32.mxu1 %vm1702_vm12, %v3697_v41  ;;  %v3634_v34 = vsel %vm1591_vm9, %v3602_v61, %v3196_v3  ;;  %v9617_v3 = vld [vmem:[#allocation82_spill] sm:$0xff] }
 0x536   : > { %3025 = vrot.lane.b32.xlu1 %v9614_v54, %s4797_s27  ;;  %v3666_v48 = vsel %vm1624_vm10, %v3634_v34, %v3292_v6  ;;  %v4769_v54 = vld [vmem:[#allocation2 + $0x90] sm:$0xff]  ;;  %v9619_v41 = vld [vmem:[#allocation54_spill] sm:$0xff] }
 0x537   : > { %v3008_v60 = vpop.permute.xlu0 %3007  ;;  %v3102_v13 = vpop.permute.xlu1 %3101  ;;  %v3477_v21 = vsel %vm258_vm0, %v4769_v54, %v7674_v47 }
 0x538   : > { %v3572_v39 = vsel %vm1525_vm7, %v3540_v30, %v3008_v60 }
 0x539   : > { %3311 = vrot.lane.b32.xlu0 %v9615_v42, %s4800_s15 }
 0x53a   : > { %3405 = vrot.lane.b32.xlu1 %v7571_v10, %s4801_s16 }
 0x53b   : > { %v3388_v40 = vpop.permute.xlu0 %3387  ;;  %v3104_v44 = vpop.permute.xlu1 %3103 }
 0x53c   : > { %v3698_v51 = vsel %vm1657_vm11, %v3666_v48, %v3388_v40 }
 0x53d   : > { %3027 = vrot.lane.b32.xlu0 %v9615_v42, %s4797_s27  ;;  %4653 = vmatmul.mubr.msk.f32.gmra.mrb[8].mxu1 %vm1702_vm12, %v3698_v51  ;;  %v9620_v42 = vld [vmem:[#allocation37_spill] sm:$0xff] }
 0x53e   : > { %3121 = vrot.lane.b32.xlu1 %v7571_v10, %s4798_s11  ;;  %v3507_v10 = vsel %vm1459_vm5, %v3475_v36, %v7805_v8 }
 0x53f   : > { %v3198_v15 = vpop.permute.xlu0 %3197  ;;  %v2914_v25 = vpop.permute.xlu1 %2913 }
 0x541   : > { %3407 = vrot.lane.b32.xlu0 %v7575_v26, %s4801_s16 }
 0x542   : > { %3123 = vrot.lane.b32.xlu1 %v7575_v26, %s4798_s11  ;;  %v3539_v26 = vsel %vm1492_vm6, %v3507_v10, %v2910_v1  ;;  %v3604_v1 = vsel %vm1558_vm8, %v3572_v39, %v3104_v44 }
 0x543   : > { %v3200_v63 = vpop.permute.xlu0 %3199  ;;  %v3294_v9 = vpop.permute.xlu1 %3293  ;;  %v3571_v57 = vsel %vm1525_vm7, %v3539_v26, %v3006_v0 }
 0x544   : > { %v3603_v50 = vsel %vm1558_vm8, %v3571_v57, %v3102_v13  ;;  %v3636_v7 = vsel %vm1591_vm9, %v3604_v1, %v3200_v63  ;;  %v3478_v13 = vsel %vm258_vm0, %v4771_v27, %v7676_v17  ;;  %v9622_v63 = vld [vmem:[#allocation56_spill] sm:$0xff] }
 0x545   : > { %3217 = vrot.lane.b32.xlu0 %v8152_v20, %s4799_s14  ;;  %v3635_v58 = vsel %vm1591_vm9, %v3603_v50, %v3198_v15  ;;  %v3510_v34 = vsel %vm1459_vm5, %v3478_v13, %v9620_v42  ;;  %v9621_v15 = vld [vmem:[#allocation70_spill] sm:$0xff]  ;;  %v4777_v42 = vld [vmem:[#allocation2 + $0xc0] sm:$0xff] }
 0x546   : > { %2933 = vrot.lane.b32.xlu1 %v8152_v20, %s4796_s26  ;;  %v3667_v31 = vsel %vm1624_vm10, %v3635_v58, %v3294_v9  ;;  %v4773_v58 = vld [vmem:[#allocation2 + $0xa8] sm:$0xff] }
 0x547   : > { %v8162_v55 = vpop.permute.xlu0 %2915  ;;  %v3010_v4 = vpop.permute.xlu1 %3009 }
 0x548   : > { %v3542_v48 = vsel %vm1492_vm6, %v3510_v34, %v8162_v55  ;;  %v9632_v34 = vld [vmem:[#allocation116_spill] sm:$0xff] }
 0x549   : > { %3219 = vrot.lane.b32.xlu0 %v8166_v59, %s4799_s14 }
 0x54a   : > { %3313 = vrot.lane.b32.xlu1 %v9616_v5, %s4800_s15 }
 0x54b   : > { %v3296_v8 = vpop.permute.xlu0 %3295  ;;  %v3390_v16 = vpop.permute.xlu1 %3389 }
 0x54c   : > { %v3699_v35 = vsel %vm1657_vm11, %v3667_v31, %v3390_v16  ;;  %v3668_v32 = vsel %vm1624_vm10, %v3636_v7, %v3296_v8  ;;  %v9624_v8 = vld [vmem:[#allocation30_spill] sm:$0xff]  ;;  %v9625_v16 = vld [vmem:[#allocation91_spill] sm:$0xff] }
 0x54d   : > { %2935 = vrot.lane.b32.xlu0 %v8166_v59, %s4796_s26  ;;  %4655 = vmatprep.mubr.msk.f32.mxu1 %vm1702_vm12, %v3699_v35  ;;  %v3479_v31 = vsel %vm258_vm0, %v4773_v58, %v9624_v8  ;;  %v9636_v8 = vld [vmem:[#allocation39_spill] sm:$0xff] }
 0x54e   : > { %3029 = vrot.lane.b32.xlu1 %v9616_v5, %s4797_s27  ;;  %v8258_v5 = vld [vmem:[#allocation2 + $0x150] sm:$0xff]  ;;  %v3511_v52 = vsel %vm1459_vm5, %v3479_v31, %v9625_v16 }
 0x54f   : > { %v3012_v45 = vpop.permute.xlu0 %3011 }
 0x550   : > { %v3106_v22 = vpop.permute.xlu1 %3105  ;;  %v3574_v44 = vsel %vm1525_vm7, %v3542_v48, %v3012_v45  ;;  %v8272_v45 = vld [vmem:[#allocation2 + $0x158] sm:$0xff]  ;;  %v3481_v48 = vsel %vm258_vm0, %v4777_v42, %v9632_v34 }
 0x551   : > { %3315 = vrot.lane.b32.xlu0 %v9617_v3, %s4800_s15 }
 0x552   : > { %3409 = vrot.lane.b32.xlu1 %v7584_v56, %s4801_s16 }
 0x553   : > { %v3392_v24 = vpop.permute.xlu0 %3391 }
 0x554   : > { %v3108_v18 = vpop.permute.xlu1 %3107  ;;  %v3700_v62 = vsel %vm1657_vm11, %v3668_v32, %v3392_v24  ;;  %v4775_v24 = vld [vmem:[#allocation2 + $0xb0] sm:$0xff] }
 0x555   : > { %3031 = vrot.lane.b32.xlu0 %v9617_v3, %s4797_s27  ;;  %4656 = vmatmul.mubr.msk.f32.gmra.mrb[10].mxu1 %vm1702_vm12, %v3700_v62  ;;  %v3606_v51 = vsel %vm1558_vm8, %v3574_v44, %v3108_v18  ;;  %v9627_v18 = vld [vmem:[#allocation86_spill] sm:$0xff] }
 0x556   : > { %3125 = vrot.lane.b32.xlu1 %v7584_v56, %s4798_s11  ;;  %v3509_v56 = vsel %vm1459_vm5, %v3477_v21, %v7813_v43  ;;  %v3480_v62 = vsel %vm258_vm0, %v4775_v24, %v9627_v18 }
 0x557   : > { %v3202_v49 = vpop.permute.xlu0 %3201  ;;  %v3541_v37 = vsel %vm1492_vm6, %v3509_v56, %v2914_v25 }
 0x558   : > { %v2918_v38 = vpop.permute.xlu1 %2917  ;;  %v3573_v12 = vsel %vm1525_vm7, %v3541_v37, %v3010_v4  ;;  %v9623_v4 = vld [vmem:[#allocation115_spill] sm:$0xff] }
 0x559   : > { %3411 = vrot.lane.b32.xlu0 %v9618_v23, %s4801_s16  ;;  %v3605_v47 = vsel %vm1558_vm8, %v3573_v12, %v3106_v22  ;;  %v3543_v35 = vsel %vm1492_vm6, %v3511_v52, %v2918_v38  ;;  %v9626_v22 = vld [vmem:[#allocation113_spill] sm:$0xff]  ;;  %v9628_v38 = vld [vmem:[#allocation38_spill] sm:$0xff]  ;;  %v9629_v37 = vld [vmem:[#allocation71_spill] sm:$0xff] }
 0x55a   : > { %3127 = vrot.lane.b32.xlu1 %v9618_v23, %s4798_s11  ;;  %v3637_v28 = vsel %vm1591_vm9, %v3605_v47, %v3202_v49  ;;  %v3512_v23 = vsel %vm1459_vm5, %v3480_v62, %v9628_v38  ;;  %v9630_v12 = vld [vmem:[#allocation57_spill] sm:$0xff] }
 0x55b   : > { %v3204_v0 = vpop.permute.xlu0 %3203  ;;  %v9639_v62 = vld [vmem:[#allocation73_spill] sm:$0xff] }
 0x55c   : > { %v3298_v11 = vpop.permute.xlu1 %3297  ;;  %v3638_v25 = vsel %vm1591_vm9, %v3606_v51, %v3204_v0 }
 0x55d   : > { %3221 = vrot.lane.b32.xlu0 %v8205_v46, %s4799_s14  ;;  %v3669_v19 = vsel %vm1624_vm10, %v3637_v28, %v3298_v11 }
 0x55e   : > { %2937 = vrot.lane.b32.xlu1 %v8205_v46, %s4796_s26 }
 0x55f   : > { %v8215_v6 = vpop.permute.xlu0 %2919 }
 0x560   : > { %v3014_v14 = vpop.permute.xlu1 %3013  ;;  %v3544_v0 = vsel %vm1492_vm6, %v3512_v23, %v8215_v6 }
 0x561   : > { %3223 = vrot.lane.b32.xlu0 %v8219_v29, %s4799_s14  ;;  %v3575_v30 = vsel %vm1525_vm7, %v3543_v35, %v3014_v14 }
 0x562   : > { %3317 = vrot.lane.b32.xlu1 %v9619_v41, %s4800_s15 }
 0x563   : > { %v3300_v43 = vpop.permute.xlu0 %3299 }
 0x564   : > { %v3394_v60 = vpop.permute.xlu1 %3393  ;;  %v3670_v9 = vsel %vm1624_vm10, %v3638_v25, %v3300_v43 }
 0x565   : > { %v3701_v61 = vsel %vm1657_vm11, %v3669_v19, %v3394_v60  ;;  %2939 = vrot.lane.b32.xlu0 %v8219_v29, %s4796_s26  ;;  %v9631_v60 = vld [vmem:[#allocation72_spill] sm:$0xff] }
 0x566   : > { %3033 = vrot.lane.b32.xlu1 %v9619_v41, %s4797_s27  ;;  %4658 = vmatprep.mubr.msk.f32.mxu1 %vm1702_vm12, %v3701_v61  ;;  %v8311_v61 = vld [vmem:[#allocation2 + $0x168] sm:$0xff] }
 0x567   : > { %v3016_v40 = vpop.permute.xlu0 %3015 }
 0x568   : > { %v3110_v17 = vpop.permute.xlu1 %3109  ;;  %v3576_v54 = vsel %vm1525_vm7, %v3544_v0, %v3016_v40  ;;  %v9633_v40 = vld [vmem:[#allocation92_spill] sm:$0xff]  ;;  %v2458_v0 = vld [vmem:[#allocation2 + $0x188] sm:$0xff] }
 0x569   : > { %3319 = vrot.lane.b32.xlu0 %v9621_v15, %s4800_s15  ;;  %v3607_v39 = vsel %vm1558_vm8, %v3575_v30, %v3110_v17  ;;  %v3513_v44 = vsel %vm1459_vm5, %v3481_v48, %v9633_v40  ;;  %v4781_v40 = vld [vmem:[#allocation2 + $0xe0] sm:$0xff] }
 0x56a   : > { %3413 = vrot.lane.b32.xlu1 %v9622_v63, %s4801_s16 }
 0x56b   : > { %v3396_v2 = vpop.permute.xlu0 %3395 }
 0x56c   : > { %v3112_v36 = vpop.permute.xlu1 %3111  ;;  %v3702_v10 = vsel %vm1657_vm11, %v3670_v9, %v3396_v2  ;;  %v9634_v2 = vld [vmem:[#allocation83_spill] sm:$0xff] }
 0x56d   : > { %3035 = vrot.lane.b32.xlu0 %v9621_v15, %s4797_s27  ;;  %4659 = vmatmul.mubr.msk.f32.gmra.mrb[12].mxu1 %vm1702_vm12, %v3702_v10  ;;  %v3608_v56 = vsel %vm1558_vm8, %v3576_v54, %v3112_v36  ;;  %v4780_v54 = vld [vmem:[#allocation2 + $0xd8] sm:$0xff] }
 0x56e   : > { %3129 = vrot.lane.b32.xlu1 %v9622_v63, %s4798_s11  ;;  %v8325_v63 = vld [vmem:[#allocation2 + $0x170] sm:$0xff] }
 0x56f   : > { %v3206_v55 = vpop.permute.xlu0 %3205 }
 0x570   : > { %v2922_v26 = vpop.permute.xlu1 %2921  ;;  %v3639_v1 = vsel %vm1591_vm9, %v3607_v39, %v3206_v55  ;;  %v9637_v39 = vld [vmem:[#allocation114_spill] sm:$0xff] }
 0x571   : > { %3415 = vrot.lane.b32.xlu0 %v9623_v4, %s4801_s16  ;;  %v3545_v51 = vsel %vm1492_vm6, %v3513_v44, %v2922_v26  ;;  %v4779_v26 = vld [vmem:[#allocation2 + $0xc8] sm:$0xff]  ;;  %v9642_v44 = vld [vmem:[#allocation75_spill] sm:$0xff] }
 0x572   : > { %3131 = vrot.lane.b32.xlu1 %v9623_v4, %s4798_s11 }
 0x573   : > { %v3208_v57 = vpop.permute.xlu0 %3207 }
 0x574   : > { %v3302_v50 = vpop.permute.xlu1 %3301  ;;  %v3640_v14 = vsel %vm1591_vm9, %v3608_v56, %v3208_v57  ;;  %v9635_v57 = vld [vmem:[#allocation58_spill] sm:$0xff] }
 0x575   : > { %3225 = vrot.lane.b32.xlu0 %v8258_v5, %s4799_s14  ;;  %v3671_v7 = vsel %vm1624_vm10, %v3639_v1, %v3302_v50  ;;  %v3482_v50 = vsel %vm258_vm0, %v4779_v26, %v9635_v57  ;;  %v9638_v1 = vld [vmem:[#allocation85_spill] sm:$0xff] }
 0x576   : > { %2941 = vrot.lane.b32.xlu1 %v8258_v5, %s4796_s26  ;;  %v3514_v31 = vsel %vm1459_vm5, %v3482_v50, %v9636_v8 }
 0x577   : > { %v8268_v53 = vpop.permute.xlu0 %2923 }
 0x578   : > { %v3018_v33 = vpop.permute.xlu1 %3017  ;;  %v3546_v16 = vsel %vm1492_vm6, %v3514_v31, %v8268_v53 }
 0x579   : > { %3227 = vrot.lane.b32.xlu0 %v8272_v45, %s4799_s14  ;;  %v3577_v25 = vsel %vm1525_vm7, %v3545_v51, %v3018_v33  ;;  %v3484_v51 = vsel %vm258_vm0, %v4781_v40, %v9642_v44  ;;  %v4783_v40 = vld [vmem:[#allocation2 + $0xf8] sm:$0xff] }
 0x57a   : > { %3321 = vrot.lane.b32.xlu1 %v9626_v22, %s4800_s15 }
 0x57b   : > { %v3304_v3 = vpop.permute.xlu0 %3303 }
 0x57c   : > { %v3398_v32 = vpop.permute.xlu1 %3397  ;;  %v3672_v47 = vsel %vm1624_vm10, %v3640_v14, %v3304_v3 }
 0x57d   : > { %v3703_v49 = vsel %vm1657_vm11, %v3671_v7, %v3398_v32  ;;  %2943 = vrot.lane.b32.xlu0 %v8272_v45, %s4796_s26 }
 0x57e   : > { %3037 = vrot.lane.b32.xlu1 %v9626_v22, %s4797_s27  ;;  %4661 = vmatprep.mubr.msk.f32.mxu1 %vm1702_vm12, %v3703_v49  ;;  %v2457_v49 = vld [vmem:[#allocation2 + $0x180] sm:$0xff] }
 0x57f   : > { %v3020_v11 = vpop.permute.xlu0 %3019 }
 0x580   : > { %v3114_v21 = vpop.permute.xlu1 %3113  ;;  %v3578_v35 = vsel %vm1525_vm7, %v3546_v16, %v3020_v11  ;;  %v2674_v11 = vrot.slane %v2457_v49, 1 }
 0x581   : > { %3323 = vrot.lane.b32.xlu0 %v9629_v37, %s4800_s15  ;;  %v3609_v9 = vsel %vm1558_vm8, %v3577_v25, %v3114_v21  ;;  %v9640_v21 = vld [vmem:[#allocation59_spill] sm:$0xff] }
 0x582   : > { %3417 = vrot.lane.b32.xlu1 %v9630_v12, %s4801_s16  ;;  %v3483_v56 = vsel %vm258_vm0, %v4780_v54, %v9640_v21  ;;  %v9645_v54 = vld [vmem:[#allocation122_spill] sm:$0xff] }
 0x583   : > { %v3400_v41 = vpop.permute.xlu0 %3399 }
 0x584   : > { %v3116_v28 = vpop.permute.xlu1 %3115  ;;  %v3704_v6 = vsel %vm1657_vm11, %v3672_v47, %v3400_v41  ;;  %v2675_v47 = vrot.slane %v2458_v0, 1 }
 0x585   : > { %3039 = vrot.lane.b32.xlu0 %v9629_v37, %s4797_s27  ;;  %4662 = vmatmul.mubr.msk.f32.gmra.mrb[14].mxu1 %vm1702_vm12, %v3704_v6  ;;  %v3610_v30 = vsel %vm1558_vm8, %v3578_v35, %v3116_v28  ;;  %v9641_v37 = vld [vmem:[#allocation93_spill] sm:$0xff] }
 0x586   : > { %3133 = vrot.lane.b32.xlu1 %v9630_v12, %s4798_s11  ;;  %v3515_v14 = vsel %vm1459_vm5, %v3483_v56, %v9641_v37 }
 0x587   : > { %v3210_v43 = vpop.permute.xlu0 %3209 }
 0x588   : > { %v2926_v19 = vpop.permute.xlu1 %2925  ;;  %v3641_v36 = vsel %vm1591_vm9, %v3609_v9, %v3210_v43  ;;  %v2676_v43 = vsel %vm471_vm2, %v2674_v11, %v2675_v47  ;;  %v9643_v9 = vld [vmem:[#allocation40_spill] sm:$0xff] }
 0x589   : > { %3419 = vrot.lane.b32.xlu0 %v9631_v60, %s4801_s16  ;;  %v3547_v41 = vsel %vm1492_vm6, %v3515_v14, %v2926_v19 }
 0x58a   : > { %3135 = vrot.lane.b32.xlu1 %v9631_v60, %s4798_s11  ;;  %v2459_v60 = vld [vmem:[#allocation2 + $0x190] sm:$0x3] }
 0x58b   : > { %v3212_v27 = vpop.permute.xlu0 %3211  ;;  %v2677_v19 = vrot.slane %v2459_v60, 1 }
 0x58c   : > { %v3306_v13 = vpop.permute.xlu1 %3305  ;;  %v3642_v22 = vsel %vm1591_vm9, %v3610_v30, %v3212_v27  ;;  %v2682_v30 = vrot.slane %v2459_v60, 2 }
 0x58d   : > { %3229 = vrot.lane.b32.xlu0 %v8311_v61, %s4799_s14  ;;  %v3673_v55 = vsel %vm1624_vm10, %v3641_v36, %v3306_v13  ;;  %v2678_v50 = vsel %vm471_vm2, %v2675_v47, %v2677_v19 }
 0x58e   : > { %2945 = vrot.lane.b32.xlu1 %v8311_v61, %s4796_s26 }
 0x58f   : > { %v8321_v17 = vpop.permute.xlu0 %2927 }
 0x590   : > { %v3022_v15 = vpop.permute.xlu1 %3021 }
 0x591   : > { %3231 = vrot.lane.b32.xlu0 %v8325_v63, %s4799_s14  ;;  %v3579_v6 = vsel %vm1525_vm7, %v3547_v41, %v3022_v15  ;;  %v2679_v15 = vrot.slane %v2457_v49, 2 }
 0x592   : > { %3325 = vrot.lane.b32.xlu1 %v9634_v2, %s4800_s15 }
 0x593   : > { %v3308_v10 = vpop.permute.xlu0 %3307 }
 0x594   : > { %v3402_v4 = vpop.permute.xlu1 %3401  ;;  %v3674_v3 = vsel %vm1624_vm10, %v3642_v22, %v3308_v10 }
 0x595   : > { %v3705_v58 = vsel %vm1657_vm11, %v3673_v55, %v3402_v4  ;;  %2947 = vrot.lane.b32.xlu0 %v8325_v63, %s4796_s26  ;;  %v2680_v55 = vrot.slane %v2458_v0, 2 }
 0x596   : > { %3041 = vrot.lane.b32.xlu1 %v9634_v2, %s4797_s27  ;;  %4664 = vmatprep.mubr.msk.f32.mxu1 %vm1702_vm12, %v3705_v58  ;;  %v3516_v2 = vsel %vm1459_vm5, %v3484_v51, %v9643_v9 }
 0x597   : > { %v3024_v52 = vpop.permute.xlu0 %3023  ;;  %v3548_v36 = vsel %vm1492_vm6, %v3516_v2, %v8321_v17  ;;  %v2681_v8 = vsel %vm552_vm3, %v2679_v15, %v2680_v55 }
 0x598   : > { %v3118_v33 = vpop.permute.xlu1 %3117  ;;  %v3580_v4 = vsel %vm1525_vm7, %v3548_v36, %v3024_v52 }
 0x599   : > { %3327 = vrot.lane.b32.xlu0 %v9637_v39, %s4800_s15  ;;  %v3611_v27 = vsel %vm1558_vm8, %v3579_v6, %v3118_v33 }
 0x59a   : > { %3421 = vrot.lane.b32.xlu1 %v9638_v1, %s4801_s16 }
 0x59b   : > { %v3404_v7 = vpop.permute.xlu0 %3403 }
 0x59c   : > { %v3120_v32 = vpop.permute.xlu1 %3119  ;;  %v3706_v53 = vsel %vm1657_vm11, %v3674_v3, %v3404_v7  ;;  %v2460_v3 = vld [vmem:[#allocation2 + $0x198] sm:$0xff]  ;;  %v2462_v7 = vld [vmem:[#allocation2 + $0x1a8] sm:$0x3] }
 0x59d   : > { %3043 = vrot.lane.b32.xlu0 %v9637_v39, %s4797_s27  ;;  %4665 = vmatmul.mubr.msk.f32.gmra.mrb[16].mxu1 %vm1702_vm12, %v3706_v53  ;;  %v3612_v58 = vsel %vm1558_vm8, %v3580_v4, %v3120_v32  ;;  %v2461_v53 = vld [vmem:[#allocation2 + $0x1a0] sm:$0xff]  ;;  %v2692_v14 = vrot.slane %v2460_v3, 2  ;;  %v2695_v60 = vrot.slane %v2462_v7, 2 }
 0x59e   : > { %3137 = vrot.lane.b32.xlu1 %v9638_v1, %s4798_s11  ;;  %v2683_v1 = vsel %vm552_vm3, %v2680_v55, %v2682_v30  ;;  %v2688_v11 = vrot.slane %v2461_v53, 1 }
 0x59f   : > { %v3214_v24 = vpop.permute.xlu0 %3213 }
 0x5a0   : > { %v8360_v18 = vpop.permute.xlu1 %2929  ;;  %v3643_v13 = vsel %vm1591_vm9, %v3611_v27, %v3214_v24 }
 0x5a1   : > { %3423 = vrot.lane.b32.xlu0 %v9639_v62, %s4801_s16 }
 0x5a2   : > { %3139 = vrot.lane.b32.xlu1 %v9639_v62, %s4798_s11  ;;  %v2687_v62 = vrot.slane %v2460_v3, 1 }
 0x5a3   : > { %v3216_v38 = vpop.permute.xlu0 %3215 }
 0x5a4   : > { %v3310_v23 = vpop.permute.xlu1 %3309  ;;  %v3644_v17 = vsel %vm1591_vm9, %v3612_v58, %v3216_v38  ;;  %v4782_v38 = vld [vmem:[#allocation2 + $0xf0] sm:$0xff]  ;;  %v2689_v41 = vsel %vm471_vm2, %v2687_v62, %v2688_v11 }
 0x5a5   : > { %3233 = vrot.lane.b32.xlu0 %v2457_v49, %s4799_s14  ;;  %v3675_v34 = vsel %vm1624_vm10, %v3643_v13, %v3310_v23  ;;  %v9644_v23 = vld [vmem:[#allocation87_spill] sm:$0xff]  ;;  %v2693_v13 = vrot.slane %v2461_v53, 2 }
 0x5a6   : > { %2949 = vrot.lane.b32.xlu1 %v2457_v49, %s4796_s26  ;;  %v2690_v49 = vrot.slane %v2462_v7, 1  ;;  %v9649_v7 = vld [vmem:[#allocation41_spill] sm:$0xff] }
 0x5a7   : > { %v8372_v12 = vpop.permute.xlu0 %2931  ;;  %v2694_v19 = vsel %vm552_vm3, %v2692_v14, %v2693_v13  ;;  %v2696_v15 = vsel %vm552_vm3, %v2693_v13, %v2695_v60 }
 0x5a8   : > { %v8375_v28 = vpop.permute.xlu1 %3025 }
 0x5a9   : > { %3235 = vrot.lane.b32.xlu0 %v2458_v0, %s4799_s14 }
 0x5aa   : > { %3329 = vrot.lane.b32.xlu1 %v2676_v43, %s4800_s15 }
 0x5ab   : > { %v3312_v42 = vpop.permute.xlu0 %3311 }
 0x5ac   : > { %v3406_v48 = vpop.permute.xlu1 %3405  ;;  %v3676_v16 = vsel %vm1624_vm10, %v3644_v17, %v3312_v42 }
 0x5ad   : > { %v3707_v25 = vsel %vm1657_vm11, %v3675_v34, %v3406_v48  ;;  %2951 = vrot.lane.b32.xlu0 %v2458_v0, %s4796_s26  ;;  %v3485_v0 = vsel %vm258_vm0, %v4782_v38, %v9644_v23 }
 0x5ae   : > { %3045 = vrot.lane.b32.xlu1 %v2676_v43, %s4797_s27  ;;  %4667 = vmatprep.mubr.msk.f32.mxu1 %vm1702_vm12, %v3707_v25  ;;  %v3517_v21 = vsel %vm1459_vm5, %v3485_v0, %v9645_v54  ;;  %v2691_v43 = vsel %vm471_vm2, %v2688_v11, %v2690_v49  ;;  %v9647_v25 = vld [vmem:[#allocation94_spill] sm:$0xff] }
 0x5af   : > { %v8394_v10 = vpop.permute.xlu0 %3027  ;;  %v3549_v37 = vsel %vm1492_vm6, %v3517_v21, %v8360_v18  ;;  %v4785_v21 = vld [vmem:[#allocation2 + $0x110] sm:$0xff] }
 0x5b0   : > { %v3122_v26 = vpop.permute.xlu1 %3121  ;;  %v8397_v57 = vpop.f32.mrb[0].mxu1  ;;  %v3581_v6 = vsel %vm1525_vm7, %v3549_v37, %v8375_v28  ;;  %v9646_v28 = vld [vmem:[#allocation34_spill] sm:$0xff]  ;;  %v9650_v37 = vld [vmem:[#allocation88_spill] sm:$0xff] }
 0x5b1   : > { %v8402_v31 = vpop.f32.mrb[1].mxu1  ;;  %3331 = vrot.lane.b32.xlu0 %v2678_v50, %s4800_s15  ;;  %v3613_v27 = vsel %vm1558_vm8, %v3581_v6, %v3122_v26  ;;  %v3486_v44 = vsel %vm258_vm0, %v4783_v40, %v9646_v28  ;;  %v3488_v14 = vsel %vm258_vm0, %v4785_v21, %v9650_v37  ;;  %v9651_v6 = vld [vmem:[#allocation123_spill] sm:$0xff] }
 0x5b2   : > { %3425 = vrot.lane.b32.xlu1 %v2681_v8, %s4801_s16  ;;  %v3518_v9 = vsel %vm1459_vm5, %v3486_v44, %v9647_v25  ;;  %v9652_v25 = vld [vmem:[#allocation76_spill] sm:$0xff] }
 0x5b3   : > { %v3408_v52 = vpop.permute.xlu0 %3407  ;;  %v3550_v2 = vsel %vm1492_vm6, %v3518_v9, %v8372_v12  ;;  %v3489_v9 = vsel %vm258_vm0, %v8152_v20, %v9652_v25 }
 0x5b4   : > { %v3124_v35 = vpop.permute.xlu1 %3123  ;;  %v3708_v33 = vsel %vm1657_vm11, %v3676_v16, %v3408_v52  ;;  %v3582_v55 = vsel %vm1525_vm7, %v3550_v2, %v8394_v10  ;;  %v9653_v2 = vld [vmem:[#allocation95_spill] sm:$0xff] }
 0x5b5   : > { %3047 = vrot.lane.b32.xlu0 %v2678_v50, %s4797_s27  ;;  %4668 = vmatmul.mubr.msk.f32.gmra.mrb[18].mxu1 %vm1702_vm12, %v3708_v33  ;;  %v3614_v50 = vsel %vm1558_vm8, %v3582_v55, %v3124_v35 }
 0x5b6   : > { %3141 = vrot.lane.b32.xlu1 %v2681_v8, %s4798_s11 }
 0x5b7   : > { %v3218_v39 = vpop.permute.xlu0 %3217 }
 0x5b8   : > { %v8412_v22 = vpop.permute.xlu1 %2933  ;;  %v3645_v42 = vsel %vm1591_vm9, %v3613_v27, %v3218_v39 }
 0x5b9   : > { %3427 = vrot.lane.b32.xlu0 %v2683_v1, %s4801_s16 }
 0x5ba   : > { %3143 = vrot.lane.b32.xlu1 %v2683_v1, %s4798_s11  ;;  %v4784_v1 = vld [vmem:[#allocation2 + $0x108] sm:$0xff]  ;;  %s8950_s11 = scalar_lea.vmem %s9056_s5, %s4496_s20 }
 0x5bb   : > { %v3220_v32 = vpop.permute.xlu0 %3219 }
 0x5bc   : > { %v3314_v24 = vpop.permute.xlu1 %3313  ;;  %v3646_v8 = vsel %vm1591_vm9, %v3614_v50, %v3220_v32 }
 0x5bd   : > { %3237 = vrot.lane.b32.xlu0 %v2460_v3, %s4799_s14  ;;  %v3677_v34 = vsel %vm1624_vm10, %v3645_v42, %v3314_v24  ;;  %v9648_v3 = vld [vmem:[#allocation53_spill] sm:$0xff] }
 0x5be   : > { %3239 = vrot.lane.b32.xlu1 %v2461_v53, %s4799_s14  ;;  %v3487_v35 = vsel %vm258_vm0, %v4784_v1, %v9648_v3  ;;  %v9655_v1 = vld [vmem:[#allocation42_spill] sm:$0xff] }
 0x5bf   : > { %v2936_v56 = vpop.permute.xlu0 %2935  ;;  %v3519_v53 = vsel %vm1459_vm5, %v3487_v35, %v9649_v7 }
 0x5c0   : > { %v3030_v47 = vpop.permute.xlu1 %3029  ;;  %v3551_v24 = vsel %vm1492_vm6, %v3519_v53, %v8412_v22  ;;  %v3520_v22 = vsel %vm1459_vm5, %v3488_v14, %v9651_v6  ;;  %v9656_v14 = vld [vmem:[#allocation107_spill] sm:$0xff]  ;;  %v9657_v6 = vld [vmem:[#allocation124_spill] sm:$0xff] }
 0x5c1   : > { %3333 = vrot.lane.b32.xlu0 %v2689_v41, %s4800_s15  ;;  %v3583_v49 = vsel %vm1525_vm7, %v3551_v24, %v3030_v47  ;;  %v3552_v47 = vsel %vm1492_vm6, %v3520_v22, %v2936_v56 }
 0x5c2   : > { %3335 = vrot.lane.b32.xlu1 %v2691_v43, %s4800_s15 }
 0x5c3   : > { %v3316_v18 = vpop.permute.xlu0 %3315 }
 0x5c4   : > { %v3410_v48 = vpop.permute.xlu1 %3409  ;;  %v3678_v17 = vsel %vm1624_vm10, %v3646_v8, %v3316_v18 }
 0x5c5   : > { %v3709_v51 = vsel %vm1657_vm11, %v3677_v34, %v3410_v48  ;;  %3429 = vrot.lane.b32.xlu0 %v2694_v19, %s4801_s16 }
 0x5c6   : > { %3431 = vrot.lane.b32.xlu1 %v2696_v15, %s4801_s16  ;;  %4670 = vmatprep.mubr.msk.f32.mxu1 %vm1702_vm12, %v3709_v51 }
 0x5c7   : > { %v3032_v36 = vpop.permute.xlu0 %3031 }
 0x5c8   : > { %v3126_v4 = vpop.permute.xlu1 %3125  ;;  %v8448_v26 = vpop.f32.mrb[2].mxu1  ;;  %v3584_v60 = vsel %vm1525_vm7, %v3552_v47, %v3032_v36  ;;  %v3521_v36 = vsel %vm1459_vm5, %v3489_v9, %v9653_v2 }
 0x5c9   : > { %v8451_v58 = vpop.f32.mrb[3].mxu1  ;;  %v3615_v38 = vsel %vm1558_vm8, %v3583_v49, %v3126_v4 }
 0x5cb   : > { %v3412_v16 = vpop.permute.xlu0 %3411 }
 0x5cc   : > { %v3128_v52 = vpop.permute.xlu1 %3127  ;;  %v3710_v33 = vsel %vm1657_vm11, %v3678_v17, %v3412_v16 }
 0x5cd   : > { %4671 = vmatmul.mubr.msk.f32.gmra.mrb[20].mxu1 %vm1702_vm12, %v3710_v33  ;;  %v3616_v42 = vsel %vm1558_vm8, %v3584_v60, %v3128_v52 }
 0x5cf   : > { %v3222_v12 = vpop.permute.xlu0 %3221 }
 0x5d0   : > { %v2938_v30 = vpop.permute.xlu1 %2937  ;;  %v3647_v23 = vsel %vm1591_vm9, %v3615_v38, %v3222_v12 }
 0x5d1   : > { %v3553_v4 = vsel %vm1492_vm6, %v3521_v36, %v2938_v30 }
 0x5d3   : > { %v3224_v10 = vpop.permute.xlu0 %3223 }
 0x5d4   : > { %v3318_v39 = vpop.permute.xlu1 %3317  ;;  %v3648_v34 = vsel %vm1591_vm9, %v3616_v42, %v3224_v10  ;;  %v9654_v10 = vld [vmem:[#allocation106_spill] sm:$0xff] }
 0x5d5   : > { %v3679_v11 = vsel %vm1624_vm10, %v3647_v23, %v3318_v39  ;;  %v3490_v20 = vsel %vm258_vm0, %v8166_v59, %v9654_v10 }
 0x5d6   : > { %v3522_v30 = vsel %vm1459_vm5, %v3490_v20, %v9655_v1  ;;  %v9660_v20 = vld [vmem:[#allocation89_spill] sm:$0xff]  ;;  %v9661_v1 = vld [vmem:[#allocation96_spill] sm:$0xff] }
 0x5d7   : > { %v2940_v32 = vpop.permute.xlu0 %2939 }
 0x5d8   : > { %v3034_v62 = vpop.permute.xlu1 %3033  ;;  %v3554_v3 = vsel %vm1492_vm6, %v3522_v30, %v2940_v32 }
 0x5d9   : > { %v3585_v8 = vsel %vm1525_vm7, %v3553_v4, %v3034_v62 }
 0x5db   : > { %v3320_v0 = vpop.permute.xlu0 %3319 }
 0x5dc   : > { %v3414_v54 = vpop.permute.xlu1 %3413  ;;  %v3680_v48 = vsel %vm1624_vm10, %v3648_v34, %v3320_v0 }
 0x5dd   : > { %v3711_v41 = vsel %vm1657_vm11, %v3679_v11, %v3414_v54 }
 0x5de   : > { %4673 = vmatprep.mubr.msk.f32.mxu1 %vm1702_vm12, %v3711_v41  ;;  %v3491_v41 = vsel %vm258_vm0, %v8205_v46, %v9656_v14 }
 0x5df   : > { %v3036_v43 = vpop.permute.xlu0 %3035  ;;  %v3523_v22 = vsel %vm1459_vm5, %v3491_v41, %v9657_v6 }
 0x5e0   : > { %v3130_v27 = vpop.permute.xlu1 %3129  ;;  %v8475_v13 = vpop.f32.mrb[4].mxu1  ;;  %v3586_v7 = vsel %vm1525_vm7, %v3554_v3, %v3036_v43 }
 0x5e1   : > { %v8478_v18 = vpop.f32.mrb[5].mxu1  ;;  %v3617_v17 = vsel %vm1558_vm8, %v3585_v8, %v3130_v27 }
 0x5e3   : > { %v3416_v19 = vpop.permute.xlu0 %3415 }
 0x5e4   : > { %v3132_v40 = vpop.permute.xlu1 %3131  ;;  %v3712_v28 = vsel %vm1657_vm11, %v3680_v48, %v3416_v19 }
 0x5e5   : > { %4674 = vmatmul.mubr.msk.f32.gmra.mrb[22].mxu1 %vm1702_vm12, %v3712_v28  ;;  %v3618_v62 = vsel %vm1558_vm8, %v3586_v7, %v3132_v40  ;;  %v9658_v28 = vld [vmem:[#allocation35_spill] sm:$0xff] }
 0x5e6   : > { %v3492_v46 = vsel %vm258_vm0, %v8219_v29, %v9658_v28 }
 0x5e7   : > { %v3226_v56 = vpop.permute.xlu0 %3225 }
 0x5e8   : > { %v2942_v44 = vpop.permute.xlu1 %2941  ;;  %v3649_v16 = vsel %vm1591_vm9, %v3617_v17, %v3226_v56 }
 0x5e9   : > { %v3555_v43 = vsel %vm1492_vm6, %v3523_v22, %v2942_v44 }
 0x5eb   : > { %v3228_v51 = vpop.permute.xlu0 %3227 }
 0x5ec   : > { %v3322_v15 = vpop.permute.xlu1 %3321  ;;  %v3650_v59 = vsel %vm1591_vm9, %v3618_v62, %v3228_v51  ;;  %v9659_v51 = vld [vmem:[#allocation60_spill] sm:$0xff] }
 0x5ed   : > { %v3681_v33 = vsel %vm1624_vm10, %v3649_v16, %v3322_v15  ;;  %v3524_v44 = vsel %vm1459_vm5, %v3492_v46, %v9659_v51  ;;  %v9665_v46 = vld [vmem:[#allocation90_spill] sm:$0xff]  ;;  %v9666_v51 = vld [vmem:[#allocation125_spill] sm:$0xff] }
 0x5ef   : > { %v2944_v55 = vpop.permute.xlu0 %2943 }
 0x5f0   : > { %v3038_v50 = vpop.permute.xlu1 %3037  ;;  %v3556_v15 = vsel %vm1492_vm6, %v3524_v44, %v2944_v55 }
 0x5f1   : > { %v3587_v27 = vsel %vm1525_vm7, %v3555_v43, %v3038_v50 }
 0x5f3   : > { %v3324_v52 = vpop.permute.xlu0 %3323 }
 0x5f4   : > { %v3418_v12 = vpop.permute.xlu1 %3417  ;;  %v3682_v38 = vsel %vm1624_vm10, %v3650_v59, %v3324_v52 }
 0x5f5   : > { %v3713_v39 = vsel %vm1657_vm11, %v3681_v33, %v3418_v12 }
 0x5f6   : > { %4676 = vmatprep.mubr.msk.f32.mxu1 %vm1702_vm12, %v3713_v39  ;;  %v3493_v39 = vsel %vm258_vm0, %v8258_v5, %v9660_v20 }
 0x5f7   : > { %v3040_v35 = vpop.permute.xlu0 %3039  ;;  %v3525_v30 = vsel %vm1459_vm5, %v3493_v39, %v9661_v1 }
 0x5f8   : > { %v3134_v53 = vpop.permute.xlu1 %3133  ;;  %v8503_v24 = vpop.f32.mrb[6].mxu1  ;;  %v3588_v9 = vsel %vm1525_vm7, %v3556_v15, %v3040_v35  ;;  %v9667_v15 = vld [vmem:[#allocation61_spill] sm:$0xff] }
 0x5f9   : > { %v8506_v49 = vpop.f32.mrb[7].mxu1  ;;  %v3619_v42 = vsel %vm1558_vm8, %v3587_v27, %v3134_v53 }
 0x5fb   : > { %v3420_v23 = vpop.permute.xlu0 %3419 }
 0x5fc   : > { %v3136_v0 = vpop.permute.xlu1 %3135  ;;  %v3714_v11 = vsel %vm1657_vm11, %v3682_v38, %v3420_v23 }
 0x5fd   : > { %4677 = vmatmul.mubr.msk.f32.gmra.mrb[24].mxu1 %vm1702_vm12, %v3714_v11  ;;  %v3620_v4 = vsel %vm1558_vm8, %v3588_v9, %v3136_v0  ;;  %v9662_v11 = vld [vmem:[#allocation36_spill] sm:$0xff] }
 0x5fe   : > { %v3494_v5 = vsel %vm258_vm0, %v8272_v45, %v9662_v11 }
 0x5ff   : > { %v3230_v32 = vpop.permute.xlu0 %3229 }
 0x600   : > { %v2946_v54 = vpop.permute.xlu1 %2945  ;;  %v3651_v34 = vsel %vm1591_vm9, %v3619_v42, %v3230_v32 }
 0x601   : > { %v3557_v35 = vsel %vm1492_vm6, %v3525_v30, %v2946_v54 }
 0x603   : > { %v3232_v21 = vpop.permute.xlu0 %3231 }
 0x604   : > { %v3326_v37 = vpop.permute.xlu1 %3325  ;;  %v3652_v29 = vsel %vm1591_vm9, %v3620_v4, %v3232_v21  ;;  %v9663_v21 = vld [vmem:[#allocation43_spill] sm:$0xff] }
 0x605   : > { %v3683_v19 = vsel %vm1624_vm10, %v3651_v34, %v3326_v37  ;;  %v3526_v54 = vsel %vm1459_vm5, %v3494_v5, %v9663_v21 }
 0x607   : > { %v2948_v47 = vpop.permute.xlu0 %2947 }
 0x608   : > { %v3042_v60 = vpop.permute.xlu1 %3041  ;;  %v3558_v37 = vsel %vm1492_vm6, %v3526_v54, %v2948_v47 }
 0x609   : > { %v3589_v53 = vsel %vm1525_vm7, %v3557_v35, %v3042_v60 }
 0x60b   : > { %v3328_v48 = vpop.permute.xlu0 %3327 }
 0x60c   : > { %v3422_v40 = vpop.permute.xlu1 %3421  ;;  %v3684_v8 = vsel %vm1624_vm10, %v3652_v29, %v3328_v48 }
 0x60d   : > { %v3715_v56 = vsel %vm1657_vm11, %v3683_v19, %v3422_v40  ;;  %v9664_v40 = vld [vmem:[#allocation121_spill] sm:$0xff] }
 0x60e   : > { %4679 = vmatprep.mubr.msk.f32.mxu1 %vm1702_vm12, %v3715_v56  ;;  %v3495_v28 = vsel %vm258_vm0, %v8311_v61, %v9664_v40  ;;  %v3496_v56 = vsel %vm258_vm0, %v8325_v63, %v9665_v46 }
 0x60f   : > { %v3044_v25 = vpop.permute.xlu0 %3043  ;;  %v3527_v44 = vsel %vm1459_vm5, %v3495_v28, %v9666_v51 }
 0x610   : > { %v3138_v2 = vpop.permute.xlu1 %3137  ;;  %v8531_v36 = vpop.f32.mrb[8].mxu1  ;;  %v3590_v41 = vsel %vm1525_vm7, %v3558_v37, %v3044_v25  ;;  %v3528_v25 = vsel %vm1459_vm5, %v3496_v56, %v9667_v15 }
 0x611   : > { %v8534_v50 = vpop.f32.mrb[9].mxu1  ;;  %v3621_v62 = vsel %vm1558_vm8, %v3589_v53, %v3138_v2 }
 0x613   : > { %v3424_v17 = vpop.permute.xlu0 %3423 }
 0x614   : > { %v3140_v16 = vpop.permute.xlu1 %3139  ;;  %v3716_v52 = vsel %vm1657_vm11, %v3684_v8, %v3424_v17 }
 0x615   : > { %4680 = vmatmul.mubr.msk.f32.gmra.mrb[26].mxu1 %vm1702_vm12, %v3716_v52  ;;  %v3622_v43 = vsel %vm1558_vm8, %v3590_v41, %v3140_v16 }
 0x617   : > { %v3234_v55 = vpop.permute.xlu0 %3233 }
 0x618   : > { %v2950_v33 = vpop.permute.xlu1 %2949  ;;  %v3653_v59 = vsel %vm1591_vm9, %v3621_v62, %v3234_v55 }
 0x619   : > { %v3559_v9 = vsel %vm1492_vm6, %v3527_v44, %v2950_v33 }
 0x61b   : > { %v3236_v12 = vpop.permute.xlu0 %3235 }
 0x61c   : > { %v3330_v10 = vpop.permute.xlu1 %3329  ;;  %v3654_v45 = vsel %vm1591_vm9, %v3622_v43, %v3236_v12 }
 0x61d   : > { %v3685_v23 = vsel %vm1624_vm10, %v3653_v59, %v3330_v10 }
 0x61f   : > { %v2952_v3 = vpop.permute.xlu0 %2951 }
 0x620   : > { %v3046_v7 = vpop.permute.xlu1 %3045  ;;  %v3560_v29 = vsel %vm1492_vm6, %v3528_v25, %v2952_v3  ;;  %v8599_v3 = vld [vmem:[%s9055_s4] ss:$0 sm:$0xff] }
 0x621   : > { %v3591_v4 = vsel %vm1525_vm7, %v3559_v9, %v3046_v7  ;;  %v8603_v35 = vadd.f32 %v8397_v57, %v8599_v3  ;;  %v8607_v7 = vadd.f32 %v8599_v3, %v8402_v31  ;;  %v8611_v53 = vadd.f32 %v8599_v3, %v8451_v58 }
 0x622   : > { %v8631_v5 = vadd.f32 %v8448_v26, %v8599_v3  ;;  %v8637_v21 = vadd.f32 %v8599_v3, %v8478_v18  ;;  %v8672_v44 = vadd.f32 %v8599_v3, %v8534_v50  ;;  %v8684_v50 = vadd.f32 %v8531_v36, %v8599_v3 }
 0x623   : > { %v3332_v38 = vpop.permute.xlu0 %3331  ;;  %v4127_v62 = vmul.f32 %v8603_v35, %v8603_v35  ;;  %v4126_v59 = vmul.f32 %v8607_v7, %v8607_v7  ;;  %v4057_v57 = vsel %vm258_vm0, %v8607_v7, 0.0  ;;  %v4128_v31 = vmul.f32 %v8611_v53, %v8611_v53 }
 0x624   : > { %v3426_v0 = vpop.permute.xlu1 %3425  ;;  %v3686_v27 = vsel %vm1624_vm10, %v3654_v45, %v3332_v38  ;;  %v4058_v38 = vsel %vm258_vm0, %v8603_v35, 0.0  ;;  %v4130_v43 = vmul.f32 %v8637_v21, %v8637_v21  ;;  %v4062_v45 = vsel %vm258_vm0, %v8631_v5, 0.0 }
 0x625   : > { %v3717_v32 = vsel %vm1657_vm11, %v3685_v23, %v3426_v0  ;;  %v4159_v58 = vsel %vm258_vm0, %v4127_v62, 0.0  ;;  %v4158_v11 = vsel %vm258_vm0, %v4126_v59, 0.0  ;;  %v4059_v54 = vadd.f32 %v4058_v38, %v4057_v57 }
 0x626   : > { %4682 = vmatprep.mubr.msk.f32.mxu1 %vm1702_vm12, %v3717_v32  ;;  %v4060_v32 = vsel %vm258_vm0, %v8611_v53, 0.0  ;;  %v4161_v37 = vsel %vm258_vm0, %v4128_v31, 0.0  ;;  %v4064_v18 = vsel %vm258_vm0, %v8637_v21, 0.0 }
 0x627   : > { %v3048_v14 = vpop.permute.xlu0 %3047  ;;  %v4061_v41 = vadd.f32 %v4060_v32, %v4059_v54 }
 0x628   : > { %v3142_v6 = vpop.permute.xlu1 %3141  ;;  %v8559_v22 = vpop.f32.mrb[10].mxu1  ;;  %v3592_v17 = vsel %vm1525_vm7, %v3560_v29, %v3048_v14  ;;  %v4160_v14 = vadd.f32 %v4159_v58, %v4158_v11 }
 0x629   : > { %v8562_v60 = vpop.f32.mrb[11].mxu1  ;;  %v3623_v61 = vsel %vm1558_vm8, %v3591_v4, %v3142_v6  ;;  %v4129_v6 = vmul.f32 %v8631_v5, %v8631_v5  ;;  %v8702_v59 = vadd.f32 %v8559_v22, %v8599_v3 }
 0x62a   : > { %v4162_v26 = vadd.f32 %v4161_v37, %v4160_v14 }
 0x62b   : > { %v3428_v42 = vpop.permute.xlu0 %3427  ;;  %v4137_v37 = vmul.f32 %v8702_v59, %v8702_v59 }
 0x62c   : > { %v3144_v34 = vpop.permute.xlu1 %3143  ;;  %v3718_v48 = vsel %vm1657_vm11, %v3686_v27, %v3428_v42  ;;  %v8648_v27 = vadd.f32 %v8475_v13, %v8599_v3  ;;  %v8654_v42 = vadd.f32 %v8599_v3, %v8506_v49  ;;  %v8666_v49 = vadd.f32 %v8503_v24, %v8599_v3 }
 0x62d   : > { %4683 = vmatmul.mubr.msk.f32.gmra.mrb[28].mxu1 %vm1702_vm12, %v3718_v48  ;;  %v3624_v63 = vsel %vm1558_vm8, %v3592_v17, %v3144_v34  ;;  %v4063_v34 = vadd.f32 %v4062_v45, %v4061_v41  ;;  %v4163_v48 = vsel %vm258_vm0, %v4129_v6, 0.0  ;;  %v4134_v24 = vmul.f32 %v8672_v44, %v8672_v44 }
 0x62e   : > { %v4164_v40 = vadd.f32 %v4163_v48, %v4162_v26  ;;  %v4131_v28 = vmul.f32 %v8648_v27, %v8648_v27  ;;  %v4132_v13 = vmul.f32 %v8654_v42, %v8654_v42  ;;  %v4066_v56 = vsel %vm258_vm0, %v8648_v27, 0.0 }
 0x62f   : > { %v3238_v47 = vpop.permute.xlu0 %3237  ;;  %v4068_v51 = vsel %vm258_vm0, %v8654_v42, 0.0  ;;  %v4133_v29 = vmul.f32 %v8666_v49, %v8666_v49  ;;  %v4072_v17 = vsel %vm258_vm0, %v8672_v44, 0.0  ;;  %v4078_v41 = vsel %vm258_vm0, %v8702_v59, 0.0 }
 0x630   : > { %v3240_v19 = vpop.permute.xlu1 %3239  ;;  %v3655_v16 = vsel %vm1591_vm9, %v3623_v61, %v3238_v47  ;;  %v4165_v47 = vsel %vm258_vm0, %v4130_v43, 0.0  ;;  %v4167_v25 = vsel %vm258_vm0, %v4131_v28, 0.0  ;;  %v4169_v9 = vsel %vm258_vm0, %v4132_v13, 0.0 }
 0x631   : > { %v3656_v52 = vsel %vm1591_vm9, %v3624_v63, %v3240_v19  ;;  %v4065_v19 = vadd.f32 %v4064_v18, %v4063_v34  ;;  %v4166_v46 = vadd.f32 %v4165_v47, %v4164_v40  ;;  %v4070_v61 = vsel %vm258_vm0, %v8666_v49, 0.0 }
 0x632   : > { %v8690_v63 = vadd.f32 %v8599_v3, %v8562_v60  ;;  %v4074_v60 = vsel %vm258_vm0, %v8684_v50, 0.0  ;;  %v4179_v45 = vsel %vm258_vm0, %v4137_v37, 0.0 }
 0x633   : > { %v3334_v2 = vpop.permute.xlu0 %3333  ;;  %v4067_v15 = vadd.f32 %v4066_v56, %v4065_v19  ;;  %v4168_v4 = vadd.f32 %v4167_v25, %v4166_v46 }
 0x634   : > { %v3336_v8 = vpop.permute.xlu1 %3335  ;;  %v3687_v55 = vsel %vm1624_vm10, %v3655_v16, %v3334_v2  ;;  %v4136_v36 = vmul.f32 %v8690_v63, %v8690_v63  ;;  %v4076_v38 = vsel %vm258_vm0, %v8690_v63, 0.0 }
 0x635   : > { %v3688_v33 = vsel %vm1624_vm10, %v3656_v52, %v3336_v8  ;;  %v4069_v2 = vadd.f32 %v4068_v51, %v4067_v15  ;;  %v4170_v8 = vadd.f32 %v4169_v9, %v4168_v4  ;;  %v4171_v52 = vsel %vm258_vm0, %v4133_v29, 0.0 }
 0x636   : > { %v4177_v11 = vsel %vm258_vm0, %v4136_v36, 0.0 }
 0x637   : > { %v3430_v12 = vpop.permute.xlu0 %3429  ;;  %v4071_v16 = vadd.f32 %v4070_v61, %v4069_v2 }
 0x638   : > { %v3432_v10 = vpop.permute.xlu1 %3431  ;;  %v3719_v20 = vsel %vm1657_vm11, %v3687_v55, %v3430_v12  ;;  %v4173_v55 = vsel %vm258_vm0, %v4134_v24, 0.0 }
 0x639   : > { %v3720_v39 = vsel %vm1657_vm11, %v3688_v33, %v3432_v10  ;;  %4685 = vmatprep.mubr.msk.f32.mxu1 %vm1702_vm12, %v3719_v20  ;;  %v4073_v12 = vadd.f32 %v4072_v17, %v4071_v16  ;;  %v4172_v33 = vadd.f32 %v4171_v52, %v4170_v8  ;;  %v4135_v10 = vmul.f32 %v8684_v50, %v8684_v50 }
 0x63a   : > { %4686 = vmatmul.mubr.msk.f32.gmra.mrb[30].mxu1 %vm1702_vm12, %v3720_v39 }
 0x63b   : > { %v4174_v39 = vadd.f32 %v4173_v55, %v4172_v33  ;;  %v4075_v31 = vadd.f32 %v4074_v60, %v4073_v12  ;;  %v4175_v58 = vsel %vm258_vm0, %v4135_v10, 0.0 }
 0x63d   : > { %v4077_v32 = vadd.f32 %v4076_v38, %v4075_v31  ;;  %v4176_v54 = vadd.f32 %v4175_v58, %v4174_v39 }
 0x63f   : > { %v4178_v14 = vadd.f32 %v4177_v11, %v4176_v54  ;;  %v4079_v26 = vadd.f32 %v4078_v41, %v4077_v32 }
 0x640   : > { %v8592_v1 = vpop.f32.mrb[12].mxu1 }
 0x641   : > { %v8594_v30 = vpop.f32.mrb[13].mxu1  ;;  %v4180_v48 = vadd.f32 %v4179_v45, %v4178_v14 }
 0x642   : > { %v8708_v57 = vadd.f32 %v8599_v3, %v8594_v30  ;;  %v8720_v30 = vadd.f32 %v8592_v1, %v8599_v3 }
 0x644   : > { %v4138_v22 = vmul.f32 %v8708_v57, %v8708_v57  ;;  %v4080_v6 = vsel %vm258_vm0, %v8708_v57, 0.0  ;;  %v4139_v47 = vmul.f32 %v8720_v30, %v8720_v30  ;;  %v4082_v40 = vsel %vm258_vm0, %v8720_v30, 0.0 }
 0x645   : > { %v4081_v34 = vadd.f32 %v4080_v6, %v4079_v26 }
 0x646   : > { %v4181_v18 = vsel %vm258_vm0, %v4138_v22, 0.0  ;;  %v4183_v56 = vsel %vm258_vm0, %v4139_v47, 0.0 }
 0x647   : > { %v4182_v19 = vadd.f32 %v4181_v18, %v4180_v48  ;;  %v4083_v46 = vadd.f32 %v4082_v40, %v4081_v34 }
 0x649   : > { %v4184_v25 = vadd.f32 %v4183_v56, %v4182_v19 }
 0x658   : > { %v8623_v23 = vpop.f32.mrb[14].mxu1 }
 0x659   : > { %v8626_v0 = vpop.f32.mrb[15].mxu1 }
 0x65a   : > { %v8726_v43 = vadd.f32 %v8599_v3, %v8626_v0  ;;  %v8738_v0 = vadd.f32 %v8623_v23, %v8599_v3 }
 0x65c   : > { %v4140_v1 = vmul.f32 %v8726_v43, %v8726_v43  ;;  %v4084_v28 = vsel %vm258_vm0, %v8726_v43, 0.0  ;;  %v4141_v9 = vmul.f32 %v8738_v0, %v8738_v0  ;;  %v4086_v4 = vsel %vm258_vm0, %v8738_v0, 0.0 }
 0x65d   : > { %v4085_v15 = vadd.f32 %v4084_v28, %v4083_v46 }
 0x65e   : > { %v4185_v51 = vsel %vm258_vm0, %v4140_v1, 0.0  ;;  %v4187_v61 = vsel %vm258_vm0, %v4141_v9, 0.0 }
 0x65f   : > { %v4186_v2 = vadd.f32 %v4185_v51, %v4184_v25  ;;  %v4087_v8 = vadd.f32 %v4086_v4, %v4085_v15 }
 0x661   : > { %v4188_v52 = vadd.f32 %v4187_v61, %v4186_v2 }
 0x670   : > { %v4666_v20 = vpop.f32.mrb[16].mxu1 }
 0x671   : > { %v3978_v62 = vpop.f32.mrb[17].mxu1  ;;  %v8754_v29 = vadd.f32 %v4666_v20, %v8599_v3 }
 0x672   : > { %v8743_v13 = vadd.f32 %v8599_v3, %v3978_v62 }
 0x673   : > { %v4143_v55 = vmul.f32 %v8754_v29, %v8754_v29  ;;  %v4090_v20 = vsel %vm258_vm0, %v8754_v29, 0.0 }
 0x674   : > { %v4142_v23 = vmul.f32 %v8743_v13, %v8743_v13  ;;  %v4088_v24 = vsel %vm258_vm0, %v8743_v13, 0.0 }
 0x675   : > { %v4089_v16 = vadd.f32 %v4088_v24, %v4087_v8  ;;  %v4191_v60 = vsel %vm258_vm0, %v4143_v55, 0.0 }
 0x676   : > { %v4189_v17 = vsel %vm258_vm0, %v4142_v23, 0.0 }
 0x677   : > { %v4190_v33 = vadd.f32 %v4189_v17, %v4188_v52  ;;  %v4091_v62 = vadd.f32 %v4090_v20, %v4089_v16 }
 0x679   : > { %v4192_v32 = vadd.f32 %v4191_v60, %v4190_v33 }
 0x688   : > { %v4669_v12 = vpop.f32.mrb[18].mxu1 }
 0x689   : > { %v8763_v10 = vadd.f32 %v4669_v12, %v8599_v3  ;;  %v3988_v36 = vpop.f32.mrb[19].mxu1 }
 0x68a   : > { %v8768_v39 = vadd.f32 %v8599_v3, %v3988_v36 }
 0x68b   : > { %v4145_v38 = vmul.f32 %v8763_v10, %v8763_v10  ;;  %v4094_v54 = vsel %vm258_vm0, %v8763_v10, 0.0 }
 0x68c   : > { %v4092_v31 = vsel %vm258_vm0, %v8768_v39, 0.0  ;;  %v4144_v58 = vmul.f32 %v8768_v39, %v8768_v39 }
 0x68d   : > { %v4093_v11 = vadd.f32 %v4092_v31, %v4091_v62  ;;  %v4195_v41 = vsel %vm258_vm0, %v4145_v38, 0.0 }
 0x68e   : > { %v4193_v37 = vsel %vm258_vm0, %v4144_v58, 0.0 }
 0x68f   : > { %v4194_v22 = vadd.f32 %v4193_v37, %v4192_v32  ;;  %v4095_v14 = vadd.f32 %v4094_v54, %v4093_v11 }
 0x691   : > { %v4196_v6 = vadd.f32 %v4195_v41, %v4194_v22 }
 0x6a0   : > { %v4672_v26 = vpop.f32.mrb[20].mxu1 }
 0x6a1   : > { %v8782_v45 = vadd.f32 %v4672_v26, %v8599_v3  ;;  %v3998_v18 = vpop.f32.mrb[21].mxu1 }
 0x6a2   : > { %v8785_v34 = vadd.f32 %v8599_v3, %v3998_v18 }
 0x6a3   : > { %v4147_v48 = vmul.f32 %v8782_v45, %v8782_v45  ;;  %v4098_v40 = vsel %vm258_vm0, %v8782_v45, 0.0 }
 0x6a4   : > { %v4096_v47 = vsel %vm258_vm0, %v8785_v34, 0.0  ;;  %v4146_v1 = vmul.f32 %v8785_v34, %v8785_v34 }
 0x6a5   : > { %v4097_v19 = vadd.f32 %v4096_v47, %v4095_v14  ;;  %v4199_v51 = vsel %vm258_vm0, %v4147_v48, 0.0 }
 0x6a6   : > { %v4197_v28 = vsel %vm258_vm0, %v4146_v1, 0.0 }
 0x6a7   : > { %v4198_v46 = vadd.f32 %v4197_v28, %v4196_v6  ;;  %v4099_v56 = vadd.f32 %v4098_v40, %v4097_v19 }
 0x6a9   : > { %v4200_v15 = vadd.f32 %v4199_v51, %v4198_v46 }
 0x6b8   : > { %v4675_v25 = vpop.f32.mrb[22].mxu1 }
 0x6b9   : > { %v8798_v9 = vadd.f32 %v4675_v25, %v8599_v3  ;;  %v4008_v23 = vpop.f32.mrb[23].mxu1 }
 0x6ba   : > { %v8801_v2 = vadd.f32 %v8599_v3, %v4008_v23 }
 0x6bb   : > { %v4149_v4 = vmul.f32 %v8798_v9, %v8798_v9  ;;  %v4102_v17 = vsel %vm258_vm0, %v8798_v9, 0.0 }
 0x6bc   : > { %v4100_v24 = vsel %vm258_vm0, %v8801_v2, 0.0  ;;  %v4148_v8 = vmul.f32 %v8801_v2, %v8801_v2 }
 0x6bd   : > { %v4101_v61 = vadd.f32 %v4100_v24, %v4099_v56  ;;  %v4203_v12 = vsel %vm258_vm0, %v4149_v4, 0.0 }
 0x6be   : > { %v4201_v16 = vsel %vm258_vm0, %v4148_v8, 0.0 }
 0x6bf   : > { %v4202_v52 = vadd.f32 %v4201_v16, %v4200_v15  ;;  %v4103_v55 = vadd.f32 %v4102_v17, %v4101_v61 }
 0x6c1   : > { %v4204_v33 = vadd.f32 %v4203_v12, %v4202_v52 }
 0x6d0   : > { %v4678_v36 = vpop.f32.mrb[24].mxu1 }
 0x6d1   : > { %v8814_v20 = vadd.f32 %v4678_v36, %v8599_v3  ;;  %v4018_v62 = vpop.f32.mrb[25].mxu1 }
 0x6d2   : > { %v8817_v60 = vadd.f32 %v8599_v3, %v4018_v62 }
 0x6d3   : > { %v4151_v38 = vmul.f32 %v8814_v20, %v8814_v20  ;;  %v4106_v32 = vsel %vm258_vm0, %v8814_v20, 0.0 }
 0x6d4   : > { %v4104_v31 = vsel %vm258_vm0, %v8817_v60, 0.0  ;;  %v4150_v58 = vmul.f32 %v8817_v60, %v8817_v60 }
 0x6d5   : > { %v4105_v11 = vadd.f32 %v4104_v31, %v4103_v55  ;;  %v4207_v14 = vsel %vm258_vm0, %v4151_v38, 0.0 }
 0x6d6   : > { %v4205_v54 = vsel %vm258_vm0, %v4150_v58, 0.0 }
 0x6d7   : > { %v4206_v37 = vadd.f32 %v4205_v54, %v4204_v33  ;;  %v4107_v22 = vadd.f32 %v4106_v32, %v4105_v11 }
 0x6d9   : > { %v4208_v41 = vadd.f32 %v4207_v14, %v4206_v37 }
 0x6e8   : > { %v4681_v6 = vpop.f32.mrb[26].mxu1 }
 0x6e9   : > { %v8830_v26 = vadd.f32 %v4681_v6, %v8599_v3  ;;  %v4028_v18 = vpop.f32.mrb[27].mxu1 }
 0x6ea   : > { %v8833_v48 = vadd.f32 %v8599_v3, %v4028_v18 }
 0x6eb   : > { %v4153_v47 = vmul.f32 %v8830_v26, %v8830_v26  ;;  %v4110_v28 = vsel %vm258_vm0, %v8830_v26, 0.0 }
 0x6ec   : > { %v4108_v1 = vsel %vm258_vm0, %v8833_v48, 0.0  ;;  %v4152_v19 = vmul.f32 %v8833_v48, %v8833_v48 }
 0x6ed   : > { %v4109_v40 = vadd.f32 %v4108_v1, %v4107_v22  ;;  %v4211_v15 = vsel %vm258_vm0, %v4153_v47, 0.0 }
 0x6ee   : > { %v4209_v46 = vsel %vm258_vm0, %v4152_v19, 0.0 }
 0x6ef   : > { %v4210_v56 = vadd.f32 %v4209_v46, %v4208_v41  ;;  %v4111_v51 = vadd.f32 %v4110_v28, %v4109_v40 }
 0x6f1   : > { %v4212_v25 = vadd.f32 %v4211_v15, %v4210_v56 }
 0x700   : > { %v4684_v23 = vpop.f32.mrb[28].mxu1 }
 0x701   : > { %v8846_v4 = vadd.f32 %v4684_v23, %v8599_v3  ;;  %v4038_v24 = vpop.f32.mrb[29].mxu1 }
 0x702   : > { %v8849_v8 = vadd.f32 %v8599_v3, %v4038_v24 }
 0x703   : > { %v4155_v61 = vmul.f32 %v8846_v4, %v8846_v4  ;;  %v4114_v55 = vsel %vm258_vm0, %v8846_v4, 0.0 }
 0x704   : > { %v4112_v17 = vsel %vm258_vm0, %v8849_v8, 0.0  ;;  %v4154_v16 = vmul.f32 %v8849_v8, %v8849_v8 }
 0x705   : > { %v4113_v52 = vadd.f32 %v4112_v17, %v4111_v51  ;;  %v4215_v62 = vsel %vm258_vm0, %v4155_v61, 0.0 }
 0x706   : > { %v4213_v12 = vsel %vm258_vm0, %v4154_v16, 0.0 }
 0x707   : > { %v4214_v33 = vadd.f32 %v4213_v12, %v4212_v25  ;;  %v4115_v36 = vadd.f32 %v4114_v55, %v4113_v52 }
 0x709   : > { %v4216_v38 = vadd.f32 %v4215_v62, %v4214_v33 }
 0x70d   : > { %v4687_v31 = vpop.f32.mrb[30].mxu1 }
 0x70e   : > { %v8862_v58 = vadd.f32 %v4687_v31, %v8599_v3  ;;  %v4048_v11 = vpop.f32.mrb[31].mxu1 }
 0x70f   : > { %v8865_v32 = vadd.f32 %v8599_v3, %v4048_v11 }
 0x710   : > { %v4157_v54 = vmul.f32 %v8862_v58, %v8862_v58  ;;  %v4118_v41 = vsel %vm258_vm0, %v8862_v58, 0.0 }
 0x711   : > { %v4116_v37 = vsel %vm258_vm0, %v8865_v32, 0.0  ;;  %v4156_v22 = vmul.f32 %v8865_v32, %v8865_v32 }
 0x712   : > { %v4117_v14 = vadd.f32 %v4116_v37, %v4115_v36  ;;  %v4219_v3 = vsel %vm258_vm0, %v4157_v54, 0.0 }
 0x713   : > { %v4217_v6 = vsel %vm258_vm0, %v4156_v22, 0.0 }
 0x714   : > { %v4119_v18 = vadd.f32 %v4118_v41, %v4117_v14  ;;  %v4218_v47 = vadd.f32 %v4217_v6, %v4216_v38 }
 0x716   : > { %v4120_v1 = vrot.slane %v4119_v18, 4  ;;  %v4220_v19 = vadd.f32 %v4219_v3, %v4218_v47 }
 0x718   : > { %v4121_v40 = vadd.f32 %v4120_v1, %v4119_v18  ;;  %v4221_v28 = vrot.slane %v4220_v19, 4 }
 0x71a   : > { %v4122_v46 = vrot.slane %v4121_v40, 2  ;;  %v4222_v56 = vadd.f32 %v4221_v28, %v4220_v19 }
 0x71c   : > { %v4123_v51 = vadd.f32 %v4122_v46, %v4121_v40  ;;  %v4223_v15 = vrot.slane %v4222_v56, 2 }
 0x71e   : > { %v4124_v25 = vrot.slane %v4123_v51, 1  ;;  %v4224_v23 = vadd.f32 %v4223_v15, %v4222_v56 }
 0x720   : > { %v4125_v24 = vadd.f32 %v4124_v25, %v4123_v51  ;;  %v4225_v61 = vrot.slane %v4224_v23, 1 }
 0x722   : > { %v4226_v17 = vadd.f32 %v4225_v61, %v4224_v23  ;;  %v8877_v16 = vmul.f32 0.00390625, %v4125_v24 }
 0x724   : > { %v4228_v52 = vmul.f32 0.00390625, %v4226_v17  ;;  %v4229_v55 = vmul.f32 %v8877_v16, %v8877_v16  ;;  %v4252_v36 = vsub.f32 %v8768_v39, %v8877_v16  ;;  %v4253_v62 = vsub.f32 %v8763_v10, %v8877_v16 }
 0x725   : > { %v4254_v31 = vsub.f32 %v8785_v34, %v8877_v16  ;;  %v4255_v11 = vsub.f32 %v8782_v45, %v8877_v16  ;;  %v4256_v54 = vsub.f32 %v8801_v2, %v8877_v16  ;;  %v4257_v37 = vsub.f32 %v8798_v9, %v8877_v16 }
 0x726   : > { %v4230_v12 = vsub.f32 %v4228_v52, %v4229_v55  ;;  %v4258_v22 = vsub.f32 %v8817_v60, %v8877_v16  ;;  %v4259_v39 = vsub.f32 %v8814_v20, %v8877_v16  ;;  %v4260_v10 = vsub.f32 %v8833_v48, %v8877_v16 }
 0x727   : > { %v4261_v34 = vsub.f32 %v8830_v26, %v8877_v16  ;;  %v4262_v45 = vsub.f32 %v8849_v8, %v8877_v16  ;;  %v4263_v2 = vsub.f32 %v8846_v4, %v8877_v16  ;;  %v4264_v9 = vsub.f32 %v8865_v32, %v8877_v16 }
 0x728   : > { %v4231_v33 = vmax.f32 %v4230_v12, 0.0  ;;  %v4265_v60 = vsub.f32 %v8862_v58, %v8877_v16  ;;  %v4234_v20 = vsub.f32 %v8607_v7, %v8877_v16  ;;  %v4235_v48 = vsub.f32 %v8603_v35, %v8877_v16 }
 0x729   : > { %v4236_v26 = vsub.f32 %v8611_v53, %v8877_v16  ;;  %v4237_v8 = vsub.f32 %v8631_v5, %v8877_v16  ;;  %v4238_v4 = vsub.f32 %v8637_v21, %v8877_v16  ;;  %v4239_v32 = vsub.f32 %v8648_v27, %v8877_v16 }
 0x72a   : > { %v4232_v38 = vadd.f32 1e-05, %v4231_v33  ;;  %v4240_v58 = vsub.f32 %v8654_v42, %v8877_v16  ;;  %v4241_v7 = vsub.f32 %v8666_v49, %v8877_v16  ;;  %v4242_v35 = vsub.f32 %v8672_v44, %v8877_v16 }
 0x72b   : > { %v4243_v53 = vsub.f32 %v8684_v50, %v8877_v16  ;;  %v4244_v5 = vsub.f32 %v8690_v63, %v8877_v16  ;;  %v4245_v21 = vsub.f32 %v8702_v59, %v8877_v16  ;;  %v4246_v27 = vsub.f32 %v8708_v57, %v8877_v16 }
 0x72c   : > { %4722 = vrsqrt.f32 %v4232_v38  ;;  %v4247_v42 = vsub.f32 %v8720_v30, %v8877_v16  ;;  %v4248_v49 = vsub.f32 %v8726_v43, %v8877_v16  ;;  %v4249_v44 = vsub.f32 %v8738_v0, %v8877_v16  ;;  %v9668_v38 = vld [vmem:[#allocation5_spill] sm:$0xff] }
 0x72d   : > { %v4250_v50 = vsub.f32 %v8743_v13, %v8877_v16  ;;  %v4251_v63 = vsub.f32 %v8754_v29, %v8877_v16 }
 0x736   : > { %v4723_v14 = vpop.eup %4722 }
 0x737   : > { %v4266_v59 = vmul.f32 %v4723_v14, %v4234_v20  ;;  %v4267_v41 = vmul.f32 %v4723_v14, %v4235_v48  ;;  %v4268_v6 = vmul.f32 %v4723_v14, %v4236_v26  ;;  %v4269_v57 = vmul.f32 %v4723_v14, %v4237_v8  ;;  %v9673_v48 = vld [vmem:[#allocation8_spill] sm:$0xff]  ;;  %v9674_v26 = vld [vmem:[#allocation9_spill] sm:$0xff]  ;;  %v9676_v8 = vld [vmem:[#allocation11_spill] sm:$0xff] }
 0x738   : > { %v4270_v18 = vmul.f32 %v4723_v14, %v4238_v4  ;;  %v4271_v47 = vmul.f32 %v4723_v14, %v4239_v32  ;;  %v4272_v30 = vmul.f32 %v4723_v14, %v4240_v58  ;;  %v4273_v3 = vmul.f32 %v4723_v14, %v4241_v7  ;;  %v9677_v32 = vld [vmem:[#allocation12_spill] sm:$0xff]  ;;  %v9678_v7 = vld [vmem:[#allocation13_spill] sm:$0xff] }
 0x739   : > { %v4274_v1 = vmul.f32 %v4723_v14, %v4242_v35  ;;  %v4275_v19 = vmul.f32 %v4723_v14, %v4243_v53  ;;  %v4276_v43 = vmul.f32 %v4723_v14, %v4244_v5  ;;  %v4277_v40 = vmul.f32 %v4723_v14, %v4245_v21  ;;  %v9679_v53 = vld [vmem:[#allocation14_spill] sm:$0xff]  ;;  %v9680_v21 = vld [vmem:[#allocation15_spill] sm:$0xff] }
 0x73a   : > { %v4278_v28 = vmul.f32 %v4723_v14, %v4246_v27  ;;  %v4279_v0 = vmul.f32 %v4723_v14, %v4247_v42  ;;  %v4280_v46 = vmul.f32 %v4723_v14, %v4248_v49  ;;  %v4281_v13 = vmul.f32 %v4723_v14, %v4249_v44  ;;  %v9681_v42 = vld [vmem:[#allocation16_spill] sm:$0xff]  ;;  %v9682_v49 = vld [vmem:[#allocation17_spill] sm:$0xff] }
 0x73b   : > { %v4282_v56 = vmul.f32 %v4723_v14, %v4250_v50  ;;  %v4283_v51 = vmul.f32 %v4723_v14, %v4251_v63  ;;  %v4284_v29 = vmul.f32 %v4723_v14, %v4252_v36  ;;  %v4285_v15 = vmul.f32 %v4723_v14, %v4253_v62  ;;  %v9683_v50 = vld [vmem:[#allocation18_spill] sm:$0xff] }
 0x73c   : > { %v4286_v25 = vmul.f32 %v4723_v14, %v4254_v31  ;;  %v4287_v23 = vmul.f32 %v4723_v14, %v4255_v11  ;;  %v4288_v24 = vmul.f32 %v4723_v14, %v4256_v54  ;;  %v4289_v61 = vmul.f32 %v4723_v14, %v4257_v37  ;;  %v9669_v11 = vld [vmem:[#allocation6_spill] sm:$0xff]  ;;  %v9670_v37 = vld [vmem:[#allocation3_spill] sm:$0xff] }
 0x73d   : > { %v4290_v17 = vmul.f32 %v4723_v14, %v4258_v22  ;;  %v4291_v16 = vmul.f32 %v4723_v14, %v4259_v39  ;;  %v4292_v52 = vmul.f32 %v4723_v14, %v4260_v10  ;;  %v4293_v55 = vmul.f32 %v4723_v14, %v4261_v34  ;;  %v9671_v39 = vld [vmem:[#allocation4_spill] sm:$0xff]  ;;  %v9672_v34 = vld [vmem:[#allocation7_spill] sm:$0xff] }
 0x73e   : > { %v4294_v12 = vmul.f32 %v4723_v14, %v4262_v45  ;;  %v4295_v33 = vmul.f32 %v4723_v14, %v4263_v2  ;;  %v4296_v36 = vmul.f32 %v4723_v14, %v4264_v9  ;;  %v4297_v62 = vmul.f32 %v4723_v14, %v4265_v60  ;;  %v9675_v9 = vld [vmem:[#allocation10_spill] sm:$0xff] }
 0x73f   : > { %v4298_v31 = vadd.f32 %v4266_v59, %v9668_v38  ;;  %v4299_v54 = vadd.f32 %v4267_v41, %v9669_v11  ;;  %v4300_v22 = vadd.f32 %v4268_v6, %v9670_v37  ;;  %v4301_v10 = vadd.f32 %v4269_v57, %v9671_v39  ;;  %v9684_v59 = vld [vmem:[#allocation19_spill] sm:$0xff]  ;;  %v9685_v6 = vld [vmem:[#allocation20_spill] sm:$0xff]  ;;  %v9697_v38 = vld [vmem:[#allocation33_spill] sm:$0xff] }
 0x740   : > { %v4302_v20 = vadd.f32 %v4270_v18, %v9672_v34  ;;  %v4303_v45 = vadd.f32 %v4271_v47, %v9673_v48  ;;  %v4304_v2 = vadd.f32 %v4272_v30, %v9674_v26  ;;  %v4305_v60 = vadd.f32 %v4273_v3, %v9675_v9  ;;  %v9686_v18 = vld [vmem:[#allocation21_spill] sm:$0xff]  ;;  %v9687_v30 = vld [vmem:[#allocation22_spill] sm:$0xff] }
 0x741   : > { %v4306_v4 = vadd.f32 %v4274_v1, %v9676_v8  ;;  %v4307_v58 = vadd.f32 %v4275_v19, %v9677_v32  ;;  %v4308_v35 = vadd.f32 %v4276_v43, %v9678_v7  ;;  %v4309_v5 = vadd.f32 %v4277_v40, %v9679_v53  ;;  %4330 = vst.msk [vmem:[%s8950_s11] sm:$0xff] %vm258_vm0, %v4298_v31  ;;  %v9688_v1 = vld [vmem:[#allocation23_spill] sm:$0xff]  ;;  %v9689_v43 = vld [vmem:[#allocation24_spill] sm:$0xff]  ;;  %v9698_v31 = vld [vmem:[#allocation50_spill] sm:$0xff] }
 0x742   : > { %4331 = vst.msk [vmem:[%s8950_s11 + $0x8] sm:$0xff] %vm258_vm0, %v4299_v54  ;;  %4332 = vst.msk [vmem:[%s8950_s11 + $0x10] sm:$0xff] %vm258_vm0, %v4300_v22  ;;  %v4310_v27 = vadd.f32 %v4278_v28, %v9680_v21  ;;  %v4311_v14 = vadd.f32 %v4279_v0, %v9681_v42  ;;  %v4312_v44 = vadd.f32 %v4280_v46, %v9682_v49  ;;  %v9690_v28 = vld [vmem:[#allocation25_spill] sm:$0xff]  ;;  %v9691_v46 = vld [vmem:[#allocation26_spill] sm:$0xff] }
 0x743   : > { %4333 = vst.msk [vmem:[%s8950_s11 + $0x18] sm:$0xff] %vm258_vm0, %v4301_v10  ;;  %v4313_v63 = vadd.f32 %v4281_v13, %v9683_v50  ;;  %4334 = vst.msk [vmem:[%s8950_s11 + $0x20] sm:$0xff] %vm258_vm0, %v4302_v20  ;;  %v4314_v41 = vadd.f32 %v4282_v56, %v9684_v59  ;;  %v4315_v57 = vadd.f32 %v4283_v51, %v9685_v6  ;;  %v9692_v56 = vld [vmem:[#allocation27_spill] sm:$0xff] }
 0x744   : > { %4335 = vst.msk [vmem:[%s8950_s11 + $0x28] sm:$0xff] %vm258_vm0, %v4303_v45  ;;  %4336 = vst.msk [vmem:[%s8950_s11 + $0x30] sm:$0xff] %vm258_vm0, %v4304_v2  ;;  %v4316_v47 = vadd.f32 %v4284_v29, %v9686_v18  ;;  %v4317_v3 = vadd.f32 %v4285_v15, %v9687_v30  ;;  %v4318_v19 = vadd.f32 %v4286_v25, %v9688_v1  ;;  %v9693_v29 = vld [vmem:[#allocation28_spill] sm:$0xff]  ;;  %v9694_v25 = vld [vmem:[#allocation29_spill] sm:$0xff] }
 0x745   : > { %4337 = vst.msk [vmem:[%s8950_s11 + $0x38] sm:$0xff] %vm258_vm0, %v4305_v60  ;;  %4338 = vst.msk [vmem:[%s8950_s11 + $0x40] sm:$0xff] %vm258_vm0, %v4306_v4  ;;  %v4319_v40 = vadd.f32 %v4287_v23, %v9689_v43  ;;  %v4320_v0 = vadd.f32 %v4288_v24, %v9690_v28  ;;  %v4321_v13 = vadd.f32 %v4289_v61, %v9691_v46  ;;  %v9695_v24 = vld [vmem:[#allocation31_spill] sm:$0xff] }
 0x746   : > { %4339 = vst.msk [vmem:[%s8950_s11 + $0x48] sm:$0xff] %vm258_vm0, %v4307_v58  ;;  %4340 = vst.msk [vmem:[%s8950_s11 + $0x50] sm:$0xff] %vm258_vm0, %v4308_v35  ;;  %v4322_v51 = vadd.f32 %v4290_v17, %v9692_v56  ;;  %v4323_v15 = vadd.f32 %v4291_v16, %v9693_v29  ;;  %v4324_v23 = vadd.f32 %v4292_v52, %v9694_v25  ;;  %v9696_v17 = vld [vmem:[#allocation32_spill] sm:$0xff] }
 0x747   : > { %4341 = vst.msk [vmem:[%s8950_s11 + $0x58] sm:$0xff] %vm258_vm0, %v4309_v5  ;;  %4342 = vst.msk [vmem:[%s8950_s11 + $0x60] sm:$0xff] %vm258_vm0, %v4310_v27  ;;  %v4325_v61 = vadd.f32 %v4293_v55, %v9695_v24  ;;  %v4326_v16 = vadd.f32 %v4294_v12, %v9696_v17  ;;  %v4327_v52 = vadd.f32 %v4295_v33, %v9697_v38  ;;  %v9699_v55 = vld [vmem:[#allocation55_spill] sm:$0xff] }
 0x748   : > { %4343 = vst.msk [vmem:[%s8950_s11 + $0x68] sm:$0xff] %vm258_vm0, %v4311_v14  ;;  %4344 = vst.msk [vmem:[%s8950_s11 + $0x70] sm:$0xff] %vm258_vm0, %v4312_v44  ;;  %v4328_v11 = vadd.f32 %v4296_v36, %v9698_v31  ;;  %v4329_v54 = vadd.f32 %v4297_v62, %v9699_v55 }
 0x749   : > { %4345 = vst.msk [vmem:[%s8950_s11 + $0x78] sm:$0xff] %vm258_vm0, %v4313_v63  ;;  %4346 = vst.msk [vmem:[%s8950_s11 + $0x80] sm:$0xff] %vm258_vm0, %v4314_v41 }
 0x74a   : > { %4347 = vst.msk [vmem:[%s8950_s11 + $0x88] sm:$0xff] %vm258_vm0, %v4315_v57  ;;  %4348 = vst.msk [vmem:[%s8950_s11 + $0x90] sm:$0xff] %vm258_vm0, %v4316_v47 }
 0x74b   : > { %4349 = vst.msk [vmem:[%s8950_s11 + $0x98] sm:$0xff] %vm258_vm0, %v4317_v3  ;;  %4350 = vst.msk [vmem:[%s8950_s11 + $0xa0] sm:$0xff] %vm258_vm0, %v4318_v19 }
 0x74c   : > { %4351 = vst.msk [vmem:[%s8950_s11 + $0xa8] sm:$0xff] %vm258_vm0, %v4319_v40  ;;  %4352 = vst.msk [vmem:[%s8950_s11 + $0xb0] sm:$0xff] %vm258_vm0, %v4320_v0 }
 0x74d   : > { %4353 = vst.msk [vmem:[%s8950_s11 + $0xb8] sm:$0xff] %vm258_vm0, %v4321_v13  ;;  %4354 = vst.msk [vmem:[%s8950_s11 + $0xc0] sm:$0xff] %vm258_vm0, %v4322_v51 }
 0x74e   : > { %4355 = vst.msk [vmem:[%s8950_s11 + $0xc8] sm:$0xff] %vm258_vm0, %v4323_v15  ;;  %4356 = vst.msk [vmem:[%s8950_s11 + $0xd0] sm:$0xff] %vm258_vm0, %v4324_v23 }
 0x74f   : > { %4357 = vst.msk [vmem:[%s8950_s11 + $0xd8] sm:$0xff] %vm258_vm0, %v4325_v61  ;;  %4358 = vst.msk [vmem:[%s8950_s11 + $0xe0] sm:$0xff] %vm258_vm0, %v4326_v16 }
 0x750   : > { %4359 = vst.msk [vmem:[%s8950_s11 + $0xe8] sm:$0xff] %vm258_vm0, %v4327_v52  ;;  %4360 = vst.msk [vmem:[%s8950_s11 + $0xf0] sm:$0xff] %vm258_vm0, %v4328_v11 }
 0x751   : > { %4361 = vst.msk [vmem:[%s8950_s11 + $0xf8] sm:$0xff] %vm258_vm0, %v4329_v54 }
 0x752 PF: > { %s15_s18 = sadd.s32 1, %s4792_s18  }
 0x753   : > { %p12_p4 = scmp.ge.s32.totalorder %s15_s18, 4  }
 0x755   :  { %14 = sbr.rel (!%p12_p4) target bundleno = 1 (0x1), region = 72 }

</bundles_post_ra>
